<compile_context>
chip_gen: v7x
topology: tpu7x:2x2x1
jax: 0.10.0
libtpu: 0.0.40
codegen_flags: <defaults>
</compile_context>

<pallas_src>
import math

import jax
import jax.numpy as jnp
from jax.experimental import pallas as pl
from jax.experimental.pallas import tpu as pltpu

# ---------------- small synthetic config (stand-in for BERT-base sizes) ----------------
VOCAB      = 100
MAX_POS    = 16
D_MODEL    = 32
N_HEADS    = 4
HEAD_DIM   = D_MODEL // N_HEADS
FFN_DIM    = 64
N_LAYERS   = 2
N_DOMAINS  = 2
N_CLASSES  = 2
SUP_LAYER  = 1          # supervision layer index into hidden_states (0 .. N_LAYERS)
EPS_BERT   = 1e-12
EPS_TORCH  = 1e-5
NEG_INF    = -1e9       # additive key-padding mask value


# ---------------- in-kernel helpers (traced inside the kernel bodies) ----------------
def _layernorm(x, g, b, eps):
    mu = jnp.mean(x, axis=-1, keepdims=True)
    var = jnp.mean(jnp.square(x - mu), axis=-1, keepdims=True)
    return (x - mu) * jax.lax.rsqrt(var + eps) * g + b


def _relu(t):
    return jnp.maximum(t, 0.0)


def _gelu(t):
    # TODO(synk): HF/BERT 'gelu' is erf-based; tanh approximation used (erf lowering
    # on Mosaic is not guaranteed), drift ~1e-3.
    return jax.nn.gelu(t, approximate=True)


def _encoder_layer(x, mask4, hm, bsz, seq,
                   wqkv, bqkv, wo, bo,
                   ln1g, ln1b, fw1, fb1, fw2, fb2, ln2g, ln2b,
                   act, eps):
    """One post-norm transformer encoder layer on a flat [B*S, D] slab.

    mask4 : [B*NH, S, S] additive key-padding bias
    hm    : [NH, D] per-head lane mask (1.0 on that head's feature lanes)
    """
    nh, dm = hm.shape
    dh = dm // nh
    m = bsz * seq

    # fused QKV projection (single wide matmul, x read once)
    qkv = jnp.dot(x, wqkv, preferred_element_type=jnp.float32) + bqkv        # [M, 3D]

    # head-batched layout [B*NH, S, D]; per-head lane mask replaces lane slicing.
    q = (qkv[:, 0:dm].reshape(bsz, 1, seq, dm)
         * hm[None, :, None, :]).reshape(bsz * nh, seq, dm)
    k = jnp.broadcast_to(qkv[:, dm:2 * dm].reshape(bsz, 1, seq, dm),
                         (bsz, nh, seq, dm)).reshape(bsz * nh, seq, dm)
    v = (qkv[:, 2 * dm:3 * dm].reshape(bsz, 1, seq, dm)
         * hm[None, :, None, :]).reshape(bsz * nh, seq, dm)

    s = jnp.einsum('nqd,nkd->nqk', q, k, preferred_element_type=jnp.float32)
    s = s * (1.0 / math.sqrt(dh)) + mask4
    s = s - jnp.max(s, axis=-1, keepdims=True)
    p = jnp.exp(s)
    p = p * pl.reciprocal(jnp.sum(p, axis=-1, keepdims=True), approx=True)
    ctx = jnp.einsum('nqk,nkd->nqd', p, v, preferred_element_type=jnp.float32)
    ctx = jnp.sum(ctx.reshape(bsz, nh, seq, dm), axis=1).reshape(m, dm)      # merge heads

    sa = jnp.dot(ctx, wo, preferred_element_type=jnp.float32) + bo
    x = _layernorm(x + sa, ln1g, ln1b, eps)

    h = act(jnp.dot(x, fw1, preferred_element_type=jnp.float32) + fb1)
    ff = jnp.dot(h, fw2, preferred_element_type=jnp.float32) + fb2
    x = _layernorm(x + ff, ln2g, ln2b, eps)
    return x


# ---------------- kernel 1: fused multi-domain transformer encoder ----------------
def _multi_encoder_kernel(word_ref, pos_ref, eg_ref, eb_ref, mask4_ref, hm_ref,
                          wqkv_ref, bqkv_ref, wo_ref, bo_ref,
                          ln1g_ref, ln1b_ref, fw1_ref, fb1_ref,
                          fw2_ref, fb2_ref, ln2g_ref, ln2b_ref,
                          pooled_ref):
    bsz, seq, dm = word_ref.shape
    m = bsz * seq
    hm = hm_ref[...]
    mask4 = mask4_ref[...]

    # embeddings: word (already gathered) + positional, then LayerNorm (shared emb table)
    x = (word_ref[...] + pos_ref[...][None, :, :]).reshape(m, dm)
    x = _layernorm(x, eg_ref[...], eb_ref[...], EPS_BERT)

    n_layers = wqkv_ref.shape[1]
    for l in range(n_layers):
        x = _encoder_layer(
            x, mask4, hm, bsz, seq,
            wqkv_ref[0, l], bqkv_ref[0, l], wo_ref[0, l], bo_ref[0, l],
            ln1g_ref[0, l], ln1b_ref[0, l], fw1_ref[0, l], fb1_ref[0, l],
            fw2_ref[0, l], fb2_ref[0, l], ln2g_ref[0, l], ln2b_ref[0, l],
            _relu, EPS_TORCH)

    # pooled output = sequence position 0 (== output[0] after permute(1,0,2) in torch)
    pooled_ref[0] = x.reshape(bsz, seq, dm)[:, 0, :]


# ---------------- kernel 2: fused shared BERT encoder + pooler + classifier ----------------
def _shared_bert_kernel(word_ref, pos_ref, eg_ref, eb_ref, mask4_ref, hm_ref,
                        wqkv_ref, bqkv_ref, wo_ref, bo_ref,
                        ln1g_ref, ln1b_ref, fw1_ref, fb1_ref,
                        fw2_ref, fb2_ref, ln2g_ref, ln2b_ref,
                        pool_w_ref, pool_b_ref, cls_w_ref, cls_b_ref,
                        cls_all_ref, logits_ref):
    bsz, seq, dm = word_ref.shape
    m = bsz * seq
    hm = hm_ref[...]
    mask4 = mask4_ref[...]

    x = (word_ref[...] + pos_ref[...][None, :, :]).reshape(m, dm)
    x = _layernorm(x, eg_ref[...], eb_ref[...], EPS_BERT)

    cls_states = [x.reshape(bsz, seq, dm)[:, 0, :]]          # hidden_states[0] = embeddings
    n_layers = wqkv_ref.shape[0]
    for l in range(n_layers):
        x = _encoder_layer(
            x, mask4, hm, bsz, seq,
            wqkv_ref[l], bqkv_ref[l], wo_ref[l], bo_ref[l],
            ln1g_ref[l], ln1b_ref[l], fw1_ref[l], fb1_ref[l],
            fw2_ref[l], fb2_ref[l], ln2g_ref[l], ln2b_ref[l],
            _gelu, EPS_BERT)
        cls_states.append(x.reshape(bsz, seq, dm)[:, 0, :])

    for i, c in enumerate(cls_states):
        cls_all_ref[i] = c

    pooled = jnp.tanh(jnp.dot(cls_states[-1], pool_w_ref[...],
                              preferred_element_type=jnp.float32) + pool_b_ref[...])
    logits_ref[...] = (jnp.dot(pooled, cls_w_ref[...],
                               preferred_element_type=jnp.float32) + cls_b_ref[...])


# ---------------- kernel 3: multi-view attention + classifiers + mixing ----------------
def _heads_kernel(pooled_ref, shared_ref, sup_ref, lsh_ref,
                  qm_ref, km_ref, dom_w_ref, dom_b_ref, cw_ref, cb_ref,
                  preds_ref, attn_ref, adv_ref, lpriv_ref):
    nd, bsz, dm = pooled_ref.shape
    nv = nd + 1
    ncls = lsh_ref.shape[1]

    shared = shared_ref[...]                                                 # [B, D]
    qv = jnp.dot(shared, qm_ref[...], preferred_element_type=jnp.float32)    # [B, D]
    scale = 1.0 / math.sqrt(dm)

    col = jax.lax.broadcasted_iota(jnp.int32, (1, nv), 1)
    scores = jnp.zeros((bsz, nv), jnp.float32)
    probs = []
    for j in range(nv):
        if j < nd:
            pj = pooled_ref[j]                                               # [B, D]
            lj = (jnp.dot(pj, cw_ref[j], preferred_element_type=jnp.float32)
                  + cb_ref[j])                                               # [B, C]
            lpriv_ref[j] = lj
        else:
            pj = shared
            lj = lsh_ref[...]
        kj = jnp.dot(pj, km_ref[...], preferred_element_type=jnp.float32)    # [B, D]
        sj = jnp.sum(kj * qv, axis=-1, keepdims=True) * scale                # [B, 1]
        scores = scores + jnp.where(col == j, sj, 0.0)
        lj = lj - jnp.max(lj, axis=-1, keepdims=True)
        ej = jnp.exp(lj)
        probs.append(ej / jnp.sum(ej, axis=-1, keepdims=True))

    scores = scores - jnp.max(scores, axis=-1, keepdims=True)
    es = jnp.exp(scores)
    alpha = es / jnp.sum(es, axis=-1, keepdims=True)                         # [B, NV]
    attn_ref[...] = alpha

    preds = jnp.zeros((bsz, ncls), jnp.float32)
    for j in range(nv):
        preds = preds + probs[j] * alpha[:, j:j + 1]
    preds_ref[...] = preds

    adv_ref[...] = (jnp.dot(sup_ref[...], dom_w_ref[...],
                            preferred_element_type=jnp.float32) + dom_b_ref[...])


# ---------------- BlockSpec helpers ----------------
def _spec_full(shape):
    n = len(shape)
    return pl.BlockSpec(tuple(shape), lambda *_: (0,) * n)


def _spec_dom(shape):
    n = len(shape)
    return pl.BlockSpec((1,) + tuple(shape[1:]), lambda d: (d,) + (0,) * (n - 1))


_LAYER_KEYS = ("wqkv", "bqkv", "wo", "bo", "ln1g", "ln1b",
               "fw1", "fb1", "fw2", "fb2", "ln2g", "ln2b")


# ---------------- pallas_call wrappers ----------------
def _run_multi_encoder(word, pos, eg, eb, mask4, hm, P):
    nd = P["wqkv"].shape[0]
    bsz, seq, dm = word.shape
    base = [word, pos, eg, eb, mask4, hm]
    weights = [P[k] for k in _LAYER_KEYS]
    in_specs = [_spec_full(a.shape) for a in base] + [_spec_dom(w.shape) for w in weights]
    return pl.pallas_call(
        _multi_encoder_kernel,
        out_shape=jax.ShapeDtypeStruct((nd, bsz, dm), jnp.float32),
        grid=(nd,),
        in_specs=in_specs,
        out_specs=pl.BlockSpec((1, bsz, dm), lambda d: (d, 0, 0)),
        compiler_params=pltpu.CompilerParams(dimension_semantics=("parallel",)),
    )(*base, *weights)


def _run_shared_bert(word, pos, eg, eb, mask4, hm, P):
    bsz, seq, dm = word.shape
    ncls = P["cls_w"].shape[1]
    n_hidden = P["wqkv"].shape[0] + 1
    args = [word, pos, eg, eb, mask4, hm] + [P[k] for k in _LAYER_KEYS] + \
           [P["pool_w"], P["pool_b"], P["cls_w"], P["cls_b"]]
    in_specs = [_spec_full(a.shape) for a in args]
    return pl.pallas_call(
        _shared_bert_kernel,
        out_shape=(jax.ShapeDtypeStruct((n_hidden, bsz, dm), jnp.float32),
                   jax.ShapeDtypeStruct((bsz, ncls), jnp.float32)),
        grid=(1,),
        in_specs=in_specs,
        out_specs=(pl.BlockSpec((n_hidden, bsz, dm), lambda i: (0, 0, 0)),
                   pl.BlockSpec((bsz, ncls), lambda i: (0, 0))),
    )(*args)


def _run_heads(pooled, shared_cls, sup_cls, logits_sh, H):
    nd, bsz, dm = pooled.shape
    ncls = logits_sh.shape[1]
    args = [pooled, shared_cls, sup_cls, logits_sh,
            H["Q"], H["K"], H["dom_w"], H["dom_b"], H["cls_w"], H["cls_b"]]
    in_specs = [_spec_full(a.shape) for a in args]
    return pl.pallas_call(
        _heads_kernel,
        out_shape=(jax.ShapeDtypeStruct((bsz, ncls), jnp.float32),
                   jax.ShapeDtypeStruct((bsz, nd + 1), jnp.float32),
                   jax.ShapeDtypeStruct((bsz, nd + 1), jnp.float32),
                   jax.ShapeDtypeStruct((nd, bsz, ncls), jnp.float32)),
        grid=(1,),
        in_specs=in_specs,
        out_specs=(pl.BlockSpec((bsz, ncls), lambda i: (0, 0)),
                   pl.BlockSpec((bsz, nd + 1), lambda i: (0, 0)),
                   pl.BlockSpec((bsz, nd + 1), lambda i: (0, 0)),
                   pl.BlockSpec((nd, bsz, ncls), lambda i: (0, 0, 0))),
    )(*args)


# ---------------- parameter construction (synthetic, deterministic) ----------------
def init_params(key):
    keys = iter(jax.random.split(key, 64))

    def nrm(shape, scale=0.02):
        return scale * jax.random.normal(next(keys), shape, jnp.float32)

    def layer_stack(lead):
        return {
            "wqkv": nrm(lead + (D_MODEL, 3 * D_MODEL)),
            "bqkv": jnp.zeros(lead + (1, 3 * D_MODEL), jnp.float32),
            "wo":   nrm(lead + (D_MODEL, D_MODEL)),
            "bo":   jnp.zeros(lead + (1, D_MODEL), jnp.float32),
            "ln1g": jnp.ones(lead + (1, D_MODEL), jnp.float32),
            "ln1b": jnp.zeros(lead + (1, D_MODEL), jnp.float32),
            "fw1":  nrm(lead + (D_MODEL, FFN_DIM)),
            "fb1":  jnp.zeros(lead + (1, FFN_DIM), jnp.float32),
            "fw2":  nrm(lead + (FFN_DIM, D_MODEL)),
            "fb2":  jnp.zeros(lead + (1, D_MODEL), jnp.float32),
            "ln2g": jnp.ones(lead + (1, D_MODEL), jnp.float32),
            "ln2b": jnp.zeros(lead + (1, D_MODEL), jnp.float32),
        }

    def embeddings():
        return {
            "word_emb": nrm((VOCAB, D_MODEL)),
            "pos_emb":  nrm((MAX_POS, D_MODEL)),
            "emb_g":    jnp.ones((1, D_MODEL), jnp.float32),
            "emb_b":    jnp.zeros((1, D_MODEL), jnp.float32),
        }

    mx = {**embeddings(), **layer_stack((N_DOMAINS, N_LAYERS))}
    sb = {**embeddings(), **layer_stack((N_LAYERS,)),
          "pool_w": nrm((D_MODEL, D_MODEL)),
          "pool_b": jnp.zeros((1, D_MODEL), jnp.float32),
          "cls_w":  nrm((D_MODEL, N_CLASSES)),
          "cls_b":  jnp.zeros((1, N_CLASSES), jnp.float32)}
    heads = {
        "Q":     nrm((D_MODEL, D_MODEL), scale=1.0 / math.sqrt(D_MODEL)),
        "K":     nrm((D_MODEL, D_MODEL), scale=1.0 / math.sqrt(D_MODEL)),
        "dom_w": nrm((D_MODEL, N_DOMAINS + 1)),
        "dom_b": jnp.zeros((1, N_DOMAINS + 1), jnp.float32),
        "cls_w": nrm((N_DOMAINS, D_MODEL, N_CLASSES)),
        "cls_b": jnp.zeros((N_DOMAINS, 1, N_CLASSES), jnp.float32),
    }
    return {"mx": mx, "sb": sb, "heads": heads}


# ---------------- jitted forward (3 fused pallas_calls + cheap glue) ----------------
@jax.jit
def _forward(params, input_ids, attention_mask):
    bsz, seq = input_ids.shape
    mx, sb, hd = params["mx"], params["sb"], params["heads"]

    mask_bias = (1.0 - attention_mask.astype(jnp.float32)) * NEG_INF               # [B, S]
    mask4 = jnp.broadcast_to(mask_bias[:, None, None, :],
                             (bsz, N_HEADS, seq, seq)).reshape(bsz * N_HEADS, seq, seq)
    head_mask = (jnp.arange(D_MODEL)[None, :] // HEAD_DIM ==
                 jnp.arange(N_HEADS)[:, None]).astype(jnp.float32)                 # [NH, D]

    # multi-domain encoders (one call, grid over domains)
    word_m = jnp.take(mx["word_emb"], input_ids, axis=0)                           # [B, S, D]
    pooled = _run_multi_encoder(word_m, mx["pos_emb"][:seq], mx["emb_g"], mx["emb_b"],
                                mask4, head_mask, mx)                              # [ND, B, D]

    # shared BERT (one call)
    word_s = jnp.take(sb["word_emb"], input_ids, axis=0)
    cls_all, logits_shared = _run_shared_bert(word_s, sb["pos_emb"][:seq],
                                              sb["emb_g"], sb["emb_b"],
                                              mask4, head_mask, sb)
    sup_cls = cls_all[SUP_LAYER]          # hidden_states[supervision_layer][:, 0, :]
    shared_cls = cls_all[-1]              # hidden_states[-1][:, 0, :]

    # multi-view attention / classifiers / mixing (one call)
    preds, alpha, adv_logits, logits_private = _run_heads(
        pooled, shared_cls, sup_cls, logits_shared, hd)
    return preds, alpha, adv_logits, logits_private


# ---------------- loss glue (outside the kernels, matches torch losses) ----------------
def _log_softmax(x):
    x = x - jnp.max(x, axis=-1, keepdims=True)
    return x - jnp.log(jnp.sum(jnp.exp(x), axis=-1, keepdims=True))


def _xent_loss(logits, labels):
    return -jnp.mean(jnp.take_along_axis(_log_softmax(logits), labels[:, None], axis=-1))


def _nll_loss(log_probs, labels):
    return -jnp.mean(jnp.take_along_axis(log_probs, labels[:, None], axis=-1))


# ---------------- module equivalent ----------------
class MultiViewTransformerNetworkProbabilitiesAdversarialPallas:
    def __init__(self, n_domains=N_DOMAINS, n_classes=N_CLASSES, supervision_layer=SUP_LAYER):
        self.params = init_params(jax.random.PRNGKey(42))
        self.n_domains = n_domains
        self.n_classes = n_classes
        self.supervision_layer = supervision_layer
        self.d_model = D_MODEL
        # TODO(synk): eval mode only; training-mode view exclusion (domains given while
        # self.training) and the GradientReversal backward are not implemented.
        self.training = False

    def __call__(self, input_ids, attention_mask, domains=None, labels=None, ret_alpha=False):
        assert input_ids.shape[1] <= MAX_POS, "sequence length exceeds MAX_POS"
        preds, alpha, adv_logits, logits_private = _forward(self.params, input_ids, attention_mask)

        n_hidden = N_LAYERS + 1
        divisor = min(1, 2 * (n_hidden - self.supervision_layer))
        outputs = (preds,)
        if labels is not None:
            loss = 0.5 * _nll_loss(jnp.log(preds), labels)
            if domains is not None:
                d = int(domains[0])
                loss = loss + 0.5 * _xent_loss(logits_private[d], labels)
                loss = loss + (0.001 / divisor) * _xent_loss(adv_logits, domains)
            outputs = (loss,) + outputs
        elif domains is not None:
            loss = (0.001 / divisor) * _xent_loss(adv_logits, domains)
            outputs = (loss,) + outputs
        if ret_alpha:
            outputs = outputs + (alpha,)
        return outputs


# ---------------- demo ----------------
if __name__ == "__main__":
    B, S = 2, 8
    key = jax.random.PRNGKey(0)
    k_ids, _ = jax.random.split(key)
    input_ids = jax.random.randint(k_ids, (B, S), 0, VOCAB, dtype=jnp.int32)
    attention_mask = jnp.ones((B, S), dtype=jnp.int32).at[1, 6:].set(0)  # pad tail of example 1

    model = MultiViewTransformerNetworkProbabilitiesAdversarialPallas()

    # branch 1: eval, no labels/domains -> (preds,) (+ attn with ret_alpha)
    preds, alpha = model(input_ids, attention_mask, ret_alpha=True)
    preds = jax.block_until_ready(preds)
    alpha = jax.block_until_ready(alpha)

    # branch 2: domains given (eval) -> (adversarial loss, preds)
    domains = jnp.array([1, 1], dtype=jnp.int32)
    loss_d, preds_d = model(input_ids, attention_mask, domains=domains)
    preds_d = jax.block_until_ready(preds_d)

    # branch 3: labels + domains -> (full loss, preds)
    labels = jnp.array([0, 1], dtype=jnp.int32)
    loss_full, preds_full = model(input_ids, attention_mask, domains=domains, labels=labels)
    loss_full = jax.block_until_ready(loss_full)

    assert preds.shape == (B, N_CLASSES)
    assert alpha.shape == (B, N_DOMAINS + 1)
    assert preds_d.shape == (B, N_CLASSES) and preds_full.shape == (B, N_CLASSES)
    assert bool(jnp.all(jnp.isfinite(preds))) and bool(jnp.all(jnp.isfinite(alpha)))
    assert bool(jnp.allclose(jnp.sum(preds, axis=-1), 1.0, atol=1e-3))
    assert bool(jnp.all(jnp.isfinite(jnp.asarray(loss_d))))
    assert bool(jnp.all(jnp.isfinite(jnp.asarray(loss_full))))

    print("KERNEL_OK")
</pallas_src>

<mosaic_0001>
module attributes {stable_mosaic.version = 11 : i64} {
  func.func @_shared_bert_kernel(%arg0: i32, %arg1: memref<2x8x32xf32, #tpu.memory_space<vmem>>, %arg2: memref<8x32xf32, #tpu.memory_space<vmem>>, %arg3: memref<1x32xf32, #tpu.memory_space<vmem>>, %arg4: memref<1x32xf32, #tpu.memory_space<vmem>>, %arg5: memref<8x8x8xf32, #tpu.memory_space<vmem>>, %arg6: memref<4x32xf32, #tpu.memory_space<vmem>>, %arg7: memref<2x32x96xf32, #tpu.memory_space<vmem>>, %arg8: memref<2x1x96xf32, #tpu.memory_space<vmem>>, %arg9: memref<2x32x32xf32, #tpu.memory_space<vmem>>, %arg10: memref<2x1x32xf32, #tpu.memory_space<vmem>>, %arg11: memref<2x1x32xf32, #tpu.memory_space<vmem>>, %arg12: memref<2x1x32xf32, #tpu.memory_space<vmem>>, %arg13: memref<2x32x64xf32, #tpu.memory_space<vmem>>, %arg14: memref<2x1x64xf32, #tpu.memory_space<vmem>>, %arg15: memref<2x64x32xf32, #tpu.memory_space<vmem>>, %arg16: memref<2x1x32xf32, #tpu.memory_space<vmem>>, %arg17: memref<2x1x32xf32, #tpu.memory_space<vmem>>, %arg18: memref<2x1x32xf32, #tpu.memory_space<vmem>>, %arg19: memref<32x32xf32, #tpu.memory_space<vmem>>, %arg20: memref<1x32xf32, #tpu.memory_space<vmem>>, %arg21: memref<32x2xf32, #tpu.memory_space<vmem>>, %arg22: memref<1x2xf32, #tpu.memory_space<vmem>>, %arg23: memref<3x2x32xf32, #tpu.memory_space<vmem>>, %arg24: memref<2x2xf32, #tpu.memory_space<vmem>>) attributes {dimension_semantics = [#tpu.dimension_semantics<arbitrary>], iteration_bounds = array<i64: 1>, scalar_prefetch = 0 : i64, scratch_operands = 0 : i64, tpu.core_type = #tpu.core_type<tc>, window_params = [{pipeline_mode = #tpu.pipeline_mode<synchronous>, transform_indices = @transform_0, window_bounds = array<i64: 2, 8, 32>}, {pipeline_mode = #tpu.pipeline_mode<synchronous>, transform_indices = @transform_1, window_bounds = array<i64: 8, 32>}, {pipeline_mode = #tpu.pipeline_mode<synchronous>, transform_indices = @transform_2, window_bounds = array<i64: 1, 32>}, {pipeline_mode = #tpu.pipeline_mode<synchronous>, transform_indices = @transform_3, window_bounds = array<i64: 1, 32>}, {pipeline_mode = #tpu.pipeline_mode<synchronous>, transform_indices = @transform_4, window_bounds = array<i64: 8, 8, 8>}, {pipeline_mode = #tpu.pipeline_mode<synchronous>, transform_indices = @transform_5, window_bounds = array<i64: 4, 32>}, {pipeline_mode = #tpu.pipeline_mode<synchronous>, transform_indices = @transform_6, window_bounds = array<i64: 2, 32, 96>}, {pipeline_mode = #tpu.pipeline_mode<synchronous>, transform_indices = @transform_7, window_bounds = array<i64: 2, 1, 96>}, {pipeline_mode = #tpu.pipeline_mode<synchronous>, transform_indices = @transform_8, window_bounds = array<i64: 2, 32, 32>}, {pipeline_mode = #tpu.pipeline_mode<synchronous>, transform_indices = @transform_9, window_bounds = array<i64: 2, 1, 32>}, {pipeline_mode = #tpu.pipeline_mode<synchronous>, transform_indices = @transform_10, window_bounds = array<i64: 2, 1, 32>}, {pipeline_mode = #tpu.pipeline_mode<synchronous>, transform_indices = @transform_11, window_bounds = array<i64: 2, 1, 32>}, {pipeline_mode = #tpu.pipeline_mode<synchronous>, transform_indices = @transform_12, window_bounds = array<i64: 2, 32, 64>}, {pipeline_mode = #tpu.pipeline_mode<synchronous>, transform_indices = @transform_13, window_bounds = array<i64: 2, 1, 64>}, {pipeline_mode = #tpu.pipeline_mode<synchronous>, transform_indices = @transform_14, window_bounds = array<i64: 2, 64, 32>}, {pipeline_mode = #tpu.pipeline_mode<synchronous>, transform_indices = @transform_15, window_bounds = array<i64: 2, 1, 32>}, {pipeline_mode = #tpu.pipeline_mode<synchronous>, transform_indices = @transform_16, window_bounds = array<i64: 2, 1, 32>}, {pipeline_mode = #tpu.pipeline_mode<synchronous>, transform_indices = @transform_17, window_bounds = array<i64: 2, 1, 32>}, {pipeline_mode = #tpu.pipeline_mode<synchronous>, transform_indices = @transform_18, window_bounds = array<i64: 32, 32>}, {pipeline_mode = #tpu.pipeline_mode<synchronous>, transform_indices = @transform_19, window_bounds = array<i64: 1, 32>}, {pipeline_mode = #tpu.pipeline_mode<synchronous>, transform_indices = @transform_20, window_bounds = array<i64: 32, 2>}, {pipeline_mode = #tpu.pipeline_mode<synchronous>, transform_indices = @transform_21, window_bounds = array<i64: 1, 2>}, {pipeline_mode = #tpu.pipeline_mode<synchronous>, transform_indices = @transform_22, window_bounds = array<i64: 3, 2, 32>}, {pipeline_mode = #tpu.pipeline_mode<synchronous>, transform_indices = @transform_23, window_bounds = array<i64: 2, 2>}]} {
    %c0 = arith.constant 0 : index
    %c0_0 = arith.constant 0 : index
    %0 = vector.load %arg6[%c0, %c0_0] : memref<4x32xf32, #tpu.memory_space<vmem>>, vector<4x32xf32>
    %c0_1 = arith.constant 0 : index
    %c0_2 = arith.constant 0 : index
    %c0_3 = arith.constant 0 : index
    %1 = vector.load %arg5[%c0_1, %c0_2, %c0_3] : memref<8x8x8xf32, #tpu.memory_space<vmem>>, vector<8x8x8xf32>
    %c0_4 = arith.constant 0 : index
    %c0_5 = arith.constant 0 : index
    %c0_6 = arith.constant 0 : index
    %2 = vector.load %arg1[%c0_4, %c0_5, %c0_6] : memref<2x8x32xf32, #tpu.memory_space<vmem>>, vector<2x8x32xf32>
    %c0_7 = arith.constant 0 : index
    %c0_8 = arith.constant 0 : index
    %3 = vector.load %arg2[%c0_7, %c0_8] : memref<8x32xf32, #tpu.memory_space<vmem>>, vector<8x32xf32>
    %4 = vector.shape_cast %3 : vector<8x32xf32> to vector<1x8x32xf32>
    %5 = vector.broadcast %4 : vector<1x8x32xf32> to vector<2x8x32xf32>
    %6 = arith.addf %2, %5 : vector<2x8x32xf32>
    %7 = vector.shape_cast %6 : vector<2x8x32xf32> to vector<16x32xf32>
    %c0_9 = arith.constant 0 : index
    %c0_10 = arith.constant 0 : index
    %8 = vector.load %arg3[%c0_9, %c0_10] : memref<1x32xf32, #tpu.memory_space<vmem>>, vector<1x32xf32>
    %c0_11 = arith.constant 0 : index
    %c0_12 = arith.constant 0 : index
    %9 = vector.load %arg4[%c0_11, %c0_12] : memref<1x32xf32, #tpu.memory_space<vmem>>, vector<1x32xf32>
    %cst = arith.constant dense<0.000000e+00> : vector<16xf32>
    %10 = vector.multi_reduction <add>, %7, %cst [1] : vector<16x32xf32> to vector<16xf32>
    %11 = vector.shape_cast %10 : vector<16xf32> to vector<16x1xf32>
    %cst_13 = arith.constant 3.200000e+01 : f32
    %12 = vector.broadcast %cst_13 : f32 to vector<16x1xf32>
    %13 = arith.divf %11, %12 : vector<16x1xf32>
    %14 = vector.broadcast %13 : vector<16x1xf32> to vector<16x32xf32>
    %15 = arith.subf %7, %14 : vector<16x32xf32>
    %16 = arith.mulf %15, %15 : vector<16x32xf32>
    %cst_14 = arith.constant dense<0.000000e+00> : vector<16xf32>
    %17 = vector.multi_reduction <add>, %16, %cst_14 [1] : vector<16x32xf32> to vector<16xf32>
    %18 = vector.shape_cast %17 : vector<16xf32> to vector<16x1xf32>
    %cst_15 = arith.constant 3.200000e+01 : f32
    %19 = vector.broadcast %cst_15 : f32 to vector<16x1xf32>
    %20 = arith.divf %18, %19 : vector<16x1xf32>
    %21 = vector.broadcast %13 : vector<16x1xf32> to vector<16x32xf32>
    %22 = arith.subf %7, %21 : vector<16x32xf32>
    %cst_16 = arith.constant 9.99999996E-13 : f32
    %23 = vector.broadcast %cst_16 : f32 to vector<16x1xf32>
    %24 = arith.addf %20, %23 : vector<16x1xf32>
    %25 = math.rsqrt %24 : vector<16x1xf32>
    %26 = vector.broadcast %25 : vector<16x1xf32> to vector<16x32xf32>
    %27 = arith.mulf %22, %26 : vector<16x32xf32>
    %28 = vector.broadcast %8 : vector<1x32xf32> to vector<16x32xf32>
    %29 = arith.mulf %27, %28 : vector<16x32xf32>
    %30 = vector.broadcast %9 : vector<1x32xf32> to vector<16x32xf32>
    %31 = arith.addf %29, %30 : vector<16x32xf32>
    %32 = vector.shape_cast %31 : vector<16x32xf32> to vector<2x8x32xf32>
    %33 = vector.extract_strided_slice %32 {offsets = [0, 0, 0], sizes = [2, 1, 32], strides = [1, 1, 1]} : vector<2x8x32xf32> to vector<2x1x32xf32>
    %34 = vector.shape_cast %33 : vector<2x1x32xf32> to vector<2x32xf32>
    %c0_17 = arith.constant 0 : index
    %c0_18 = arith.constant 0 : index
    %c0_19 = arith.constant 0 : index
    %35 = vector.load %arg7[%c0_17, %c0_18, %c0_19] : memref<2x32x96xf32, #tpu.memory_space<vmem>>, vector<1x32x96xf32>
    %36 = vector.shape_cast %35 : vector<1x32x96xf32> to vector<32x96xf32>
    %c0_20 = arith.constant 0 : index
    %c0_21 = arith.constant 0 : index
    %c0_22 = arith.constant 0 : index
    %37 = vector.load %arg8[%c0_20, %c0_21, %c0_22] : memref<2x1x96xf32, #tpu.memory_space<vmem>>, vector<1x1x96xf32>
    %38 = vector.shape_cast %37 : vector<1x1x96xf32> to vector<1x96xf32>
    %c0_23 = arith.constant 0 : index
    %c0_24 = arith.constant 0 : index
    %c0_25 = arith.constant 0 : index
    %39 = vector.load %arg9[%c0_23, %c0_24, %c0_25] : memref<2x32x32xf32, #tpu.memory_space<vmem>>, vector<1x32x32xf32>
    %40 = vector.shape_cast %39 : vector<1x32x32xf32> to vector<32x32xf32>
    %c0_26 = arith.constant 0 : index
    %c0_27 = arith.constant 0 : index
    %c0_28 = arith.constant 0 : index
    %41 = vector.load %arg10[%c0_26, %c0_27, %c0_28] : memref<2x1x32xf32, #tpu.memory_space<vmem>>, vector<1x1x32xf32>
    %42 = vector.shape_cast %41 : vector<1x1x32xf32> to vector<1x32xf32>
    %c0_29 = arith.constant 0 : index
    %c0_30 = arith.constant 0 : index
    %c0_31 = arith.constant 0 : index
    %43 = vector.load %arg11[%c0_29, %c0_30, %c0_31] : memref<2x1x32xf32, #tpu.memory_space<vmem>>, vector<1x1x32xf32>
    %44 = vector.shape_cast %43 : vector<1x1x32xf32> to vector<1x32xf32>
    %c0_32 = arith.constant 0 : index
    %c0_33 = arith.constant 0 : index
    %c0_34 = arith.constant 0 : index
    %45 = vector.load %arg12[%c0_32, %c0_33, %c0_34] : memref<2x1x32xf32, #tpu.memory_space<vmem>>, vector<1x1x32xf32>
    %46 = vector.shape_cast %45 : vector<1x1x32xf32> to vector<1x32xf32>
    %c0_35 = arith.constant 0 : index
    %c0_36 = arith.constant 0 : index
    %c0_37 = arith.constant 0 : index
    %47 = vector.load %arg13[%c0_35, %c0_36, %c0_37] : memref<2x32x64xf32, #tpu.memory_space<vmem>>, vector<1x32x64xf32>
    %48 = vector.shape_cast %47 : vector<1x32x64xf32> to vector<32x64xf32>
    %c0_38 = arith.constant 0 : index
    %c0_39 = arith.constant 0 : index
    %c0_40 = arith.constant 0 : index
    %49 = vector.load %arg14[%c0_38, %c0_39, %c0_40] : memref<2x1x64xf32, #tpu.memory_space<vmem>>, vector<1x1x64xf32>
    %50 = vector.shape_cast %49 : vector<1x1x64xf32> to vector<1x64xf32>
    %c0_41 = arith.constant 0 : index
    %c0_42 = arith.constant 0 : index
    %c0_43 = arith.constant 0 : index
    %51 = vector.load %arg15[%c0_41, %c0_42, %c0_43] : memref<2x64x32xf32, #tpu.memory_space<vmem>>, vector<1x64x32xf32>
    %52 = vector.shape_cast %51 : vector<1x64x32xf32> to vector<64x32xf32>
    %c0_44 = arith.constant 0 : index
    %c0_45 = arith.constant 0 : index
    %c0_46 = arith.constant 0 : index
    %53 = vector.load %arg16[%c0_44, %c0_45, %c0_46] : memref<2x1x32xf32, #tpu.memory_space<vmem>>, vector<1x1x32xf32>
    %54 = vector.shape_cast %53 : vector<1x1x32xf32> to vector<1x32xf32>
    %c0_47 = arith.constant 0 : index
    %c0_48 = arith.constant 0 : index
    %c0_49 = arith.constant 0 : index
    %55 = vector.load %arg17[%c0_47, %c0_48, %c0_49] : memref<2x1x32xf32, #tpu.memory_space<vmem>>, vector<1x1x32xf32>
    %56 = vector.shape_cast %55 : vector<1x1x32xf32> to vector<1x32xf32>
    %c0_50 = arith.constant 0 : index
    %c0_51 = arith.constant 0 : index
    %c0_52 = arith.constant 0 : index
    %57 = vector.load %arg18[%c0_50, %c0_51, %c0_52] : memref<2x1x32xf32, #tpu.memory_space<vmem>>, vector<1x1x32xf32>
    %58 = vector.shape_cast %57 : vector<1x1x32xf32> to vector<1x32xf32>
    %cst_53 = arith.constant dense<0.000000e+00> : vector<16x96xf32>
    %59 = tpu.matmul %31, %36, %cst_53 {dimension_numbers = #tpu.dot_dimension_numbers<[1], [0], [0], [1], [0, 0, 1, 1], [], []>} : vector<16x32xf32>, vector<32x96xf32>, vector<16x96xf32> -> vector<16x96xf32>
    %60 = vector.broadcast %38 : vector<1x96xf32> to vector<16x96xf32>
    %61 = arith.addf %59, %60 : vector<16x96xf32>
    %62 = vector.extract_strided_slice %61 {offsets = [0, 0], sizes = [16, 32], strides = [1, 1]} : vector<16x96xf32> to vector<16x32xf32>
    %63 = vector.shape_cast %62 : vector<16x32xf32> to vector<2x1x8x32xf32>
    %64 = vector.shape_cast %0 : vector<4x32xf32> to vector<1x4x1x32xf32>
    %65 = vector.broadcast %63 : vector<2x1x8x32xf32> to vector<2x4x8x32xf32>
    %66 = vector.broadcast %64 : vector<1x4x1x32xf32> to vector<2x4x8x32xf32>
    %67 = arith.mulf %65, %66 : vector<2x4x8x32xf32>
    %68 = vector.shape_cast %67 : vector<2x4x8x32xf32> to vector<8x8x32xf32>
    %69 = vector.extract_strided_slice %61 {offsets = [0, 32], sizes = [16, 32], strides = [1, 1]} : vector<16x96xf32> to vector<16x32xf32>
    %70 = vector.shape_cast %69 : vector<16x32xf32> to vector<2x1x8x32xf32>
    %71 = vector.shape_cast %70 : vector<2x1x8x32xf32> to vector<2x1x8x32xf32>
    %72 = vector.broadcast %71 : vector<2x1x8x32xf32> to vector<2x4x8x32xf32>
    %73 = vector.shape_cast %72 : vector<2x4x8x32xf32> to vector<8x8x32xf32>
    %74 = vector.extract_strided_slice %61 {offsets = [0, 64], sizes = [16, 32], strides = [1, 1]} : vector<16x96xf32> to vector<16x32xf32>
    %75 = vector.shape_cast %74 : vector<16x32xf32> to vector<2x1x8x32xf32>
    %76 = vector.shape_cast %0 : vector<4x32xf32> to vector<1x4x1x32xf32>
    %77 = vector.broadcast %75 : vector<2x1x8x32xf32> to vector<2x4x8x32xf32>
    %78 = vector.broadcast %76 : vector<1x4x1x32xf32> to vector<2x4x8x32xf32>
    %79 = arith.mulf %77, %78 : vector<2x4x8x32xf32>
    %80 = vector.shape_cast %79 : vector<2x4x8x32xf32> to vector<8x8x32xf32>
    "tpu.trace_start"() <{level = 10 : i32, message = "nqd,nkd->nqk"}> : () -> ()
    %cst_54 = arith.constant dense<0.000000e+00> : vector<8x8x8xf32>
    %81 = tpu.matmul %68, %73, %cst_54 {dimension_numbers = #tpu.dot_dimension_numbers<[2], [2], [1], [1], [0, 0, 0, 1, 1, 1], [0], [0]>} : vector<8x8x32xf32>, vector<8x8x32xf32>, vector<8x8x8xf32> -> vector<8x8x8xf32>
    "tpu.trace_stop"() : () -> ()
    %cst_55 = arith.constant 0.353553385 : f32
    %82 = vector.broadcast %cst_55 : f32 to vector<8x8x8xf32>
    %83 = arith.mulf %81, %82 : vector<8x8x8xf32>
    %84 = arith.addf %83, %1 : vector<8x8x8xf32>
    %cst_56 = arith.constant dense<0xFF800000> : vector<8x8xf32>
    %85 = vector.multi_reduction <maximumf>, %84, %cst_56 [2] : vector<8x8x8xf32> to vector<8x8xf32>
    %86 = vector.shape_cast %85 : vector<8x8xf32> to vector<8x8x1xf32>
    %87 = vector.broadcast %86 : vector<8x8x1xf32> to vector<8x8x8xf32>
    %88 = arith.subf %84, %87 : vector<8x8x8xf32>
    %89 = math.exp %88 : vector<8x8x8xf32>
    %cst_57 = arith.constant dense<0.000000e+00> : vector<8x8xf32>
    %90 = vector.multi_reduction <add>, %89, %cst_57 [2] : vector<8x8x8xf32> to vector<8x8xf32>
    %91 = vector.shape_cast %90 : vector<8x8xf32> to vector<8x8x1xf32>
    %92 = tpu.reciprocal %91 {approx = true} : vector<8x8x1xf32> -> vector<8x8x1xf32>
    %93 = vector.broadcast %92 : vector<8x8x1xf32> to vector<8x8x8xf32>
    %94 = arith.mulf %89, %93 : vector<8x8x8xf32>
    "tpu.trace_start"() <{level = 10 : i32, message = "nqk,nkd->nqd"}> : () -> ()
    %cst_58 = arith.constant dense<0.000000e+00> : vector<8x8x32xf32>
    %95 = tpu.matmul %94, %80, %cst_58 {dimension_numbers = #tpu.dot_dimension_numbers<[2], [1], [1], [2], [0, 0, 0, 1, 1, 2], [0], [0]>} : vector<8x8x8xf32>, vector<8x8x32xf32>, vector<8x8x32xf32> -> vector<8x8x32xf32>
    "tpu.trace_stop"() : () -> ()
    %96 = vector.shape_cast %95 : vector<8x8x32xf32> to vector<2x4x8x32xf32>
    %cst_59 = arith.constant dense<0.000000e+00> : vector<2x8x32xf32>
    %97 = vector.multi_reduction <add>, %96, %cst_59 [1] : vector<2x4x8x32xf32> to vector<2x8x32xf32>
    %98 = vector.shape_cast %97 : vector<2x8x32xf32> to vector<16x32xf32>
    %cst_60 = arith.constant dense<0.000000e+00> : vector<16x32xf32>
    %99 = tpu.matmul %98, %40, %cst_60 {dimension_numbers = #tpu.dot_dimension_numbers<[1], [0], [0], [1], [0, 0, 1, 1], [], []>} : vector<16x32xf32>, vector<32x32xf32>, vector<16x32xf32> -> vector<16x32xf32>
    %100 = vector.broadcast %42 : vector<1x32xf32> to vector<16x32xf32>
    %101 = arith.addf %99, %100 : vector<16x32xf32>
    %102 = arith.addf %31, %101 : vector<16x32xf32>
    %cst_61 = arith.constant dense<0.000000e+00> : vector<16xf32>
    %103 = vector.multi_reduction <add>, %102, %cst_61 [1] : vector<16x32xf32> to vector<16xf32>
    %104 = vector.shape_cast %103 : vector<16xf32> to vector<16x1xf32>
    %cst_62 = arith.constant 3.200000e+01 : f32
    %105 = vector.broadcast %cst_62 : f32 to vector<16x1xf32>
    %106 = arith.divf %104, %105 : vector<16x1xf32>
    %107 = vector.broadcast %106 : vector<16x1xf32> to vector<16x32xf32>
    %108 = arith.subf %102, %107 : vector<16x32xf32>
    %109 = arith.mulf %108, %108 : vector<16x32xf32>
    %cst_63 = arith.constant dense<0.000000e+00> : vector<16xf32>
    %110 = vector.multi_reduction <add>, %109, %cst_63 [1] : vector<16x32xf32> to vector<16xf32>
    %111 = vector.shape_cast %110 : vector<16xf32> to vector<16x1xf32>
    %cst_64 = arith.constant 3.200000e+01 : f32
    %112 = vector.broadcast %cst_64 : f32 to vector<16x1xf32>
    %113 = arith.divf %111, %112 : vector<16x1xf32>
    %114 = vector.broadcast %106 : vector<16x1xf32> to vector<16x32xf32>
    %115 = arith.subf %102, %114 : vector<16x32xf32>
    %cst_65 = arith.constant 9.99999996E-13 : f32
    %116 = vector.broadcast %cst_65 : f32 to vector<16x1xf32>
    %117 = arith.addf %113, %116 : vector<16x1xf32>
    %118 = math.rsqrt %117 : vector<16x1xf32>
    %119 = vector.broadcast %118 : vector<16x1xf32> to vector<16x32xf32>
    %120 = arith.mulf %115, %119 : vector<16x32xf32>
    %121 = vector.broadcast %44 : vector<1x32xf32> to vector<16x32xf32>
    %122 = arith.mulf %120, %121 : vector<16x32xf32>
    %123 = vector.broadcast %46 : vector<1x32xf32> to vector<16x32xf32>
    %124 = arith.addf %122, %123 : vector<16x32xf32>
    %cst_66 = arith.constant dense<0.000000e+00> : vector<16x64xf32>
    %125 = tpu.matmul %124, %48, %cst_66 {dimension_numbers = #tpu.dot_dimension_numbers<[1], [0], [0], [1], [0, 0, 1, 1], [], []>} : vector<16x32xf32>, vector<32x64xf32>, vector<16x64xf32> -> vector<16x64xf32>
    %126 = vector.broadcast %50 : vector<1x64xf32> to vector<16x64xf32>
    %127 = arith.addf %125, %126 : vector<16x64xf32>
    %128 = arith.mulf %127, %127 : vector<16x64xf32>
    %129 = arith.mulf %127, %128 : vector<16x64xf32>
    %cst_67 = arith.constant 4.471500e-02 : f32
    %130 = vector.broadcast %cst_67 : f32 to vector<16x64xf32>
    %131 = arith.mulf %130, %129 : vector<16x64xf32>
    %132 = arith.addf %127, %131 : vector<16x64xf32>
    %cst_68 = arith.constant 0.797884583 : f32
    %133 = vector.broadcast %cst_68 : f32 to vector<16x64xf32>
    %134 = arith.mulf %133, %132 : vector<16x64xf32>
    %135 = math.tanh %134 : vector<16x64xf32>
    %cst_69 = arith.constant 1.000000e+00 : f32
    %136 = vector.broadcast %cst_69 : f32 to vector<16x64xf32>
    %137 = arith.addf %136, %135 : vector<16x64xf32>
    %cst_70 = arith.constant 5.000000e-01 : f32
    %138 = vector.broadcast %cst_70 : f32 to vector<16x64xf32>
    %139 = arith.mulf %138, %137 : vector<16x64xf32>
    %140 = arith.mulf %127, %139 : vector<16x64xf32>
    %cst_71 = arith.constant dense<0.000000e+00> : vector<16x32xf32>
    %141 = tpu.matmul %140, %52, %cst_71 {dimension_numbers = #tpu.dot_dimension_numbers<[1], [0], [0], [1], [0, 0, 1, 1], [], []>} : vector<16x64xf32>, vector<64x32xf32>, vector<16x32xf32> -> vector<16x32xf32>
    %142 = vector.broadcast %54 : vector<1x32xf32> to vector<16x32xf32>
    %143 = arith.addf %141, %142 : vector<16x32xf32>
    %144 = arith.addf %124, %143 : vector<16x32xf32>
    %cst_72 = arith.constant dense<0.000000e+00> : vector<16xf32>
    %145 = vector.multi_reduction <add>, %144, %cst_72 [1] : vector<16x32xf32> to vector<16xf32>
    %146 = vector.shape_cast %145 : vector<16xf32> to vector<16x1xf32>
    %cst_73 = arith.constant 3.200000e+01 : f32
    %147 = vector.broadcast %cst_73 : f32 to vector<16x1xf32>
    %148 = arith.divf %146, %147 : vector<16x1xf32>
    %149 = vector.broadcast %148 : vector<16x1xf32> to vector<16x32xf32>
    %150 = arith.subf %144, %149 : vector<16x32xf32>
    %151 = arith.mulf %150, %150 : vector<16x32xf32>
    %cst_74 = arith.constant dense<0.000000e+00> : vector<16xf32>
    %152 = vector.multi_reduction <add>, %151, %cst_74 [1] : vector<16x32xf32> to vector<16xf32>
    %153 = vector.shape_cast %152 : vector<16xf32> to vector<16x1xf32>
    %cst_75 = arith.constant 3.200000e+01 : f32
    %154 = vector.broadcast %cst_75 : f32 to vector<16x1xf32>
    %155 = arith.divf %153, %154 : vector<16x1xf32>
    %156 = vector.broadcast %148 : vector<16x1xf32> to vector<16x32xf32>
    %157 = arith.subf %144, %156 : vector<16x32xf32>
    %cst_76 = arith.constant 9.99999996E-13 : f32
    %158 = vector.broadcast %cst_76 : f32 to vector<16x1xf32>
    %159 = arith.addf %155, %158 : vector<16x1xf32>
    %160 = math.rsqrt %159 : vector<16x1xf32>
    %161 = vector.broadcast %160 : vector<16x1xf32> to vector<16x32xf32>
    %162 = arith.mulf %157, %161 : vector<16x32xf32>
    %163 = vector.broadcast %56 : vector<1x32xf32> to vector<16x32xf32>
    %164 = arith.mulf %162, %163 : vector<16x32xf32>
    %165 = vector.broadcast %58 : vector<1x32xf32> to vector<16x32xf32>
    %166 = arith.addf %164, %165 : vector<16x32xf32>
    %167 = vector.shape_cast %166 : vector<16x32xf32> to vector<2x8x32xf32>
    %168 = vector.extract_strided_slice %167 {offsets = [0, 0, 0], sizes = [2, 1, 32], strides = [1, 1, 1]} : vector<2x8x32xf32> to vector<2x1x32xf32>
    %169 = vector.shape_cast %168 : vector<2x1x32xf32> to vector<2x32xf32>
    %c1 = arith.constant 1 : index
    %c0_77 = arith.constant 0 : index
    %c0_78 = arith.constant 0 : index
    %170 = vector.load %arg7[%c1, %c0_77, %c0_78] : memref<2x32x96xf32, #tpu.memory_space<vmem>>, vector<1x32x96xf32>
    %171 = vector.shape_cast %170 : vector<1x32x96xf32> to vector<32x96xf32>
    %c1_79 = arith.constant 1 : index
    %c0_80 = arith.constant 0 : index
    %c0_81 = arith.constant 0 : index
    %172 = vector.load %arg8[%c1_79, %c0_80, %c0_81] : memref<2x1x96xf32, #tpu.memory_space<vmem>>, vector<1x1x96xf32>
    %173 = vector.shape_cast %172 : vector<1x1x96xf32> to vector<1x96xf32>
    %c1_82 = arith.constant 1 : index
    %c0_83 = arith.constant 0 : index
    %c0_84 = arith.constant 0 : index
    %174 = vector.load %arg9[%c1_82, %c0_83, %c0_84] : memref<2x32x32xf32, #tpu.memory_space<vmem>>, vector<1x32x32xf32>
    %175 = vector.shape_cast %174 : vector<1x32x32xf32> to vector<32x32xf32>
    %c1_85 = arith.constant 1 : index
    %c0_86 = arith.constant 0 : index
    %c0_87 = arith.constant 0 : index
    %176 = vector.load %arg10[%c1_85, %c0_86, %c0_87] : memref<2x1x32xf32, #tpu.memory_space<vmem>>, vector<1x1x32xf32>
    %177 = vector.shape_cast %176 : vector<1x1x32xf32> to vector<1x32xf32>
    %c1_88 = arith.constant 1 : index
    %c0_89 = arith.constant 0 : index
    %c0_90 = arith.constant 0 : index
    %178 = vector.load %arg11[%c1_88, %c0_89, %c0_90] : memref<2x1x32xf32, #tpu.memory_space<vmem>>, vector<1x1x32xf32>
    %179 = vector.shape_cast %178 : vector<1x1x32xf32> to vector<1x32xf32>
    %c1_91 = arith.constant 1 : index
    %c0_92 = arith.constant 0 : index
    %c0_93 = arith.constant 0 : index
    %180 = vector.load %arg12[%c1_91, %c0_92, %c0_93] : memref<2x1x32xf32, #tpu.memory_space<vmem>>, vector<1x1x32xf32>
    %181 = vector.shape_cast %180 : vector<1x1x32xf32> to vector<1x32xf32>
    %c1_94 = arith.constant 1 : index
    %c0_95 = arith.constant 0 : index
    %c0_96 = arith.constant 0 : index
    %182 = vector.load %arg13[%c1_94, %c0_95, %c0_96] : memref<2x32x64xf32, #tpu.memory_space<vmem>>, vector<1x32x64xf32>
    %183 = vector.shape_cast %182 : vector<1x32x64xf32> to vector<32x64xf32>
    %c1_97 = arith.constant 1 : index
    %c0_98 = arith.constant 0 : index
    %c0_99 = arith.constant 0 : index
    %184 = vector.load %arg14[%c1_97, %c0_98, %c0_99] : memref<2x1x64xf32, #tpu.memory_space<vmem>>, vector<1x1x64xf32>
    %185 = vector.shape_cast %184 : vector<1x1x64xf32> to vector<1x64xf32>
    %c1_100 = arith.constant 1 : index
    %c0_101 = arith.constant 0 : index
    %c0_102 = arith.constant 0 : index
    %186 = vector.load %arg15[%c1_100, %c0_101, %c0_102] : memref<2x64x32xf32, #tpu.memory_space<vmem>>, vector<1x64x32xf32>
    %187 = vector.shape_cast %186 : vector<1x64x32xf32> to vector<64x32xf32>
    %c1_103 = arith.constant 1 : index
    %c0_104 = arith.constant 0 : index
    %c0_105 = arith.constant 0 : index
    %188 = vector.load %arg16[%c1_103, %c0_104, %c0_105] : memref<2x1x32xf32, #tpu.memory_space<vmem>>, vector<1x1x32xf32>
    %189 = vector.shape_cast %188 : vector<1x1x32xf32> to vector<1x32xf32>
    %c1_106 = arith.constant 1 : index
    %c0_107 = arith.constant 0 : index
    %c0_108 = arith.constant 0 : index
    %190 = vector.load %arg17[%c1_106, %c0_107, %c0_108] : memref<2x1x32xf32, #tpu.memory_space<vmem>>, vector<1x1x32xf32>
    %191 = vector.shape_cast %190 : vector<1x1x32xf32> to vector<1x32xf32>
    %c1_109 = arith.constant 1 : index
    %c0_110 = arith.constant 0 : index
    %c0_111 = arith.constant 0 : index
    %192 = vector.load %arg18[%c1_109, %c0_110, %c0_111] : memref<2x1x32xf32, #tpu.memory_space<vmem>>, vector<1x1x32xf32>
    %193 = vector.shape_cast %192 : vector<1x1x32xf32> to vector<1x32xf32>
    %cst_112 = arith.constant dense<0.000000e+00> : vector<16x96xf32>
    %194 = tpu.matmul %166, %171, %cst_112 {dimension_numbers = #tpu.dot_dimension_numbers<[1], [0], [0], [1], [0, 0, 1, 1], [], []>} : vector<16x32xf32>, vector<32x96xf32>, vector<16x96xf32> -> vector<16x96xf32>
    %195 = vector.broadcast %173 : vector<1x96xf32> to vector<16x96xf32>
    %196 = arith.addf %194, %195 : vector<16x96xf32>
    %197 = vector.extract_strided_slice %196 {offsets = [0, 0], sizes = [16, 32], strides = [1, 1]} : vector<16x96xf32> to vector<16x32xf32>
    %198 = vector.shape_cast %197 : vector<16x32xf32> to vector<2x1x8x32xf32>
    %199 = vector.shape_cast %0 : vector<4x32xf32> to vector<1x4x1x32xf32>
    %200 = vector.broadcast %198 : vector<2x1x8x32xf32> to vector<2x4x8x32xf32>
    %201 = vector.broadcast %199 : vector<1x4x1x32xf32> to vector<2x4x8x32xf32>
    %202 = arith.mulf %200, %201 : vector<2x4x8x32xf32>
    %203 = vector.shape_cast %202 : vector<2x4x8x32xf32> to vector<8x8x32xf32>
    %204 = vector.extract_strided_slice %196 {offsets = [0, 32], sizes = [16, 32], strides = [1, 1]} : vector<16x96xf32> to vector<16x32xf32>
    %205 = vector.shape_cast %204 : vector<16x32xf32> to vector<2x1x8x32xf32>
    %206 = vector.shape_cast %205 : vector<2x1x8x32xf32> to vector<2x1x8x32xf32>
    %207 = vector.broadcast %206 : vector<2x1x8x32xf32> to vector<2x4x8x32xf32>
    %208 = vector.shape_cast %207 : vector<2x4x8x32xf32> to vector<8x8x32xf32>
    %209 = vector.extract_strided_slice %196 {offsets = [0, 64], sizes = [16, 32], strides = [1, 1]} : vector<16x96xf32> to vector<16x32xf32>
    %210 = vector.shape_cast %209 : vector<16x32xf32> to vector<2x1x8x32xf32>
    %211 = vector.shape_cast %0 : vector<4x32xf32> to vector<1x4x1x32xf32>
    %212 = vector.broadcast %210 : vector<2x1x8x32xf32> to vector<2x4x8x32xf32>
    %213 = vector.broadcast %211 : vector<1x4x1x32xf32> to vector<2x4x8x32xf32>
    %214 = arith.mulf %212, %213 : vector<2x4x8x32xf32>
    %215 = vector.shape_cast %214 : vector<2x4x8x32xf32> to vector<8x8x32xf32>
    "tpu.trace_start"() <{level = 10 : i32, message = "nqd,nkd->nqk"}> : () -> ()
    %cst_113 = arith.constant dense<0.000000e+00> : vector<8x8x8xf32>
    %216 = tpu.matmul %203, %208, %cst_113 {dimension_numbers = #tpu.dot_dimension_numbers<[2], [2], [1], [1], [0, 0, 0, 1, 1, 1], [0], [0]>} : vector<8x8x32xf32>, vector<8x8x32xf32>, vector<8x8x8xf32> -> vector<8x8x8xf32>
    "tpu.trace_stop"() : () -> ()
    %cst_114 = arith.constant 0.353553385 : f32
    %217 = vector.broadcast %cst_114 : f32 to vector<8x8x8xf32>
    %218 = arith.mulf %216, %217 : vector<8x8x8xf32>
    %219 = arith.addf %218, %1 : vector<8x8x8xf32>
    %cst_115 = arith.constant dense<0xFF800000> : vector<8x8xf32>
    %220 = vector.multi_reduction <maximumf>, %219, %cst_115 [2] : vector<8x8x8xf32> to vector<8x8xf32>
    %221 = vector.shape_cast %220 : vector<8x8xf32> to vector<8x8x1xf32>
    %222 = vector.broadcast %221 : vector<8x8x1xf32> to vector<8x8x8xf32>
    %223 = arith.subf %219, %222 : vector<8x8x8xf32>
    %224 = math.exp %223 : vector<8x8x8xf32>
    %cst_116 = arith.constant dense<0.000000e+00> : vector<8x8xf32>
    %225 = vector.multi_reduction <add>, %224, %cst_116 [2] : vector<8x8x8xf32> to vector<8x8xf32>
    %226 = vector.shape_cast %225 : vector<8x8xf32> to vector<8x8x1xf32>
    %227 = tpu.reciprocal %226 {approx = true} : vector<8x8x1xf32> -> vector<8x8x1xf32>
    %228 = vector.broadcast %227 : vector<8x8x1xf32> to vector<8x8x8xf32>
    %229 = arith.mulf %224, %228 : vector<8x8x8xf32>
    "tpu.trace_start"() <{level = 10 : i32, message = "nqk,nkd->nqd"}> : () -> ()
    %cst_117 = arith.constant dense<0.000000e+00> : vector<8x8x32xf32>
    %230 = tpu.matmul %229, %215, %cst_117 {dimension_numbers = #tpu.dot_dimension_numbers<[2], [1], [1], [2], [0, 0, 0, 1, 1, 2], [0], [0]>} : vector<8x8x8xf32>, vector<8x8x32xf32>, vector<8x8x32xf32> -> vector<8x8x32xf32>
    "tpu.trace_stop"() : () -> ()
    %231 = vector.shape_cast %230 : vector<8x8x32xf32> to vector<2x4x8x32xf32>
    %cst_118 = arith.constant dense<0.000000e+00> : vector<2x8x32xf32>
    %232 = vector.multi_reduction <add>, %231, %cst_118 [1] : vector<2x4x8x32xf32> to vector<2x8x32xf32>
    %233 = vector.shape_cast %232 : vector<2x8x32xf32> to vector<16x32xf32>
    %cst_119 = arith.constant dense<0.000000e+00> : vector<16x32xf32>
    %234 = tpu.matmul %233, %175, %cst_119 {dimension_numbers = #tpu.dot_dimension_numbers<[1], [0], [0], [1], [0, 0, 1, 1], [], []>} : vector<16x32xf32>, vector<32x32xf32>, vector<16x32xf32> -> vector<16x32xf32>
    %235 = vector.broadcast %177 : vector<1x32xf32> to vector<16x32xf32>
    %236 = arith.addf %234, %235 : vector<16x32xf32>
    %237 = arith.addf %166, %236 : vector<16x32xf32>
    %cst_120 = arith.constant dense<0.000000e+00> : vector<16xf32>
    %238 = vector.multi_reduction <add>, %237, %cst_120 [1] : vector<16x32xf32> to vector<16xf32>
    %239 = vector.shape_cast %238 : vector<16xf32> to vector<16x1xf32>
    %cst_121 = arith.constant 3.200000e+01 : f32
    %240 = vector.broadcast %cst_121 : f32 to vector<16x1xf32>
    %241 = arith.divf %239, %240 : vector<16x1xf32>
    %242 = vector.broadcast %241 : vector<16x1xf32> to vector<16x32xf32>
    %243 = arith.subf %237, %242 : vector<16x32xf32>
    %244 = arith.mulf %243, %243 : vector<16x32xf32>
    %cst_122 = arith.constant dense<0.000000e+00> : vector<16xf32>
    %245 = vector.multi_reduction <add>, %244, %cst_122 [1] : vector<16x32xf32> to vector<16xf32>
    %246 = vector.shape_cast %245 : vector<16xf32> to vector<16x1xf32>
    %cst_123 = arith.constant 3.200000e+01 : f32
    %247 = vector.broadcast %cst_123 : f32 to vector<16x1xf32>
    %248 = arith.divf %246, %247 : vector<16x1xf32>
    %249 = vector.broadcast %241 : vector<16x1xf32> to vector<16x32xf32>
    %250 = arith.subf %237, %249 : vector<16x32xf32>
    %cst_124 = arith.constant 9.99999996E-13 : f32
    %251 = vector.broadcast %cst_124 : f32 to vector<16x1xf32>
    %252 = arith.addf %248, %251 : vector<16x1xf32>
    %253 = math.rsqrt %252 : vector<16x1xf32>
    %254 = vector.broadcast %253 : vector<16x1xf32> to vector<16x32xf32>
    %255 = arith.mulf %250, %254 : vector<16x32xf32>
    %256 = vector.broadcast %179 : vector<1x32xf32> to vector<16x32xf32>
    %257 = arith.mulf %255, %256 : vector<16x32xf32>
    %258 = vector.broadcast %181 : vector<1x32xf32> to vector<16x32xf32>
    %259 = arith.addf %257, %258 : vector<16x32xf32>
    %cst_125 = arith.constant dense<0.000000e+00> : vector<16x64xf32>
    %260 = tpu.matmul %259, %183, %cst_125 {dimension_numbers = #tpu.dot_dimension_numbers<[1], [0], [0], [1], [0, 0, 1, 1], [], []>} : vector<16x32xf32>, vector<32x64xf32>, vector<16x64xf32> -> vector<16x64xf32>
    %261 = vector.broadcast %185 : vector<1x64xf32> to vector<16x64xf32>
    %262 = arith.addf %260, %261 : vector<16x64xf32>
    %263 = arith.mulf %262, %262 : vector<16x64xf32>
    %264 = arith.mulf %262, %263 : vector<16x64xf32>
    %cst_126 = arith.constant 4.471500e-02 : f32
    %265 = vector.broadcast %cst_126 : f32 to vector<16x64xf32>
    %266 = arith.mulf %265, %264 : vector<16x64xf32>
    %267 = arith.addf %262, %266 : vector<16x64xf32>
    %cst_127 = arith.constant 0.797884583 : f32
    %268 = vector.broadcast %cst_127 : f32 to vector<16x64xf32>
    %269 = arith.mulf %268, %267 : vector<16x64xf32>
    %270 = math.tanh %269 : vector<16x64xf32>
    %cst_128 = arith.constant 1.000000e+00 : f32
    %271 = vector.broadcast %cst_128 : f32 to vector<16x64xf32>
    %272 = arith.addf %271, %270 : vector<16x64xf32>
    %cst_129 = arith.constant 5.000000e-01 : f32
    %273 = vector.broadcast %cst_129 : f32 to vector<16x64xf32>
    %274 = arith.mulf %273, %272 : vector<16x64xf32>
    %275 = arith.mulf %262, %274 : vector<16x64xf32>
    %cst_130 = arith.constant dense<0.000000e+00> : vector<16x32xf32>
    %276 = tpu.matmul %275, %187, %cst_130 {dimension_numbers = #tpu.dot_dimension_numbers<[1], [0], [0], [1], [0, 0, 1, 1], [], []>} : vector<16x64xf32>, vector<64x32xf32>, vector<16x32xf32> -> vector<16x32xf32>
    %277 = vector.broadcast %189 : vector<1x32xf32> to vector<16x32xf32>
    %278 = arith.addf %276, %277 : vector<16x32xf32>
    %279 = arith.addf %259, %278 : vector<16x32xf32>
    %cst_131 = arith.constant dense<0.000000e+00> : vector<16xf32>
    %280 = vector.multi_reduction <add>, %279, %cst_131 [1] : vector<16x32xf32> to vector<16xf32>
    %281 = vector.shape_cast %280 : vector<16xf32> to vector<16x1xf32>
    %cst_132 = arith.constant 3.200000e+01 : f32
    %282 = vector.broadcast %cst_132 : f32 to vector<16x1xf32>
    %283 = arith.divf %281, %282 : vector<16x1xf32>
    %284 = vector.broadcast %283 : vector<16x1xf32> to vector<16x32xf32>
    %285 = arith.subf %279, %284 : vector<16x32xf32>
    %286 = arith.mulf %285, %285 : vector<16x32xf32>
    %cst_133 = arith.constant dense<0.000000e+00> : vector<16xf32>
    %287 = vector.multi_reduction <add>, %286, %cst_133 [1] : vector<16x32xf32> to vector<16xf32>
    %288 = vector.shape_cast %287 : vector<16xf32> to vector<16x1xf32>
    %cst_134 = arith.constant 3.200000e+01 : f32
    %289 = vector.broadcast %cst_134 : f32 to vector<16x1xf32>
    %290 = arith.divf %288, %289 : vector<16x1xf32>
    %291 = vector.broadcast %283 : vector<16x1xf32> to vector<16x32xf32>
    %292 = arith.subf %279, %291 : vector<16x32xf32>
    %cst_135 = arith.constant 9.99999996E-13 : f32
    %293 = vector.broadcast %cst_135 : f32 to vector<16x1xf32>
    %294 = arith.addf %290, %293 : vector<16x1xf32>
    %295 = math.rsqrt %294 : vector<16x1xf32>
    %296 = vector.broadcast %295 : vector<16x1xf32> to vector<16x32xf32>
    %297 = arith.mulf %292, %296 : vector<16x32xf32>
    %298 = vector.broadcast %191 : vector<1x32xf32> to vector<16x32xf32>
    %299 = arith.mulf %297, %298 : vector<16x32xf32>
    %300 = vector.broadcast %193 : vector<1x32xf32> to vector<16x32xf32>
    %301 = arith.addf %299, %300 : vector<16x32xf32>
    %302 = vector.shape_cast %301 : vector<16x32xf32> to vector<2x8x32xf32>
    %303 = vector.extract_strided_slice %302 {offsets = [0, 0, 0], sizes = [2, 1, 32], strides = [1, 1, 1]} : vector<2x8x32xf32> to vector<2x1x32xf32>
    %304 = vector.shape_cast %303 : vector<2x1x32xf32> to vector<2x32xf32>
    %c0_136 = arith.constant 0 : index
    %c0_137 = arith.constant 0 : index
    %c0_138 = arith.constant 0 : index
    %305 = vector.load %arg23[%c0_136, %c0_137, %c0_138] : memref<3x2x32xf32, #tpu.memory_space<vmem>>, vector<1x2x32xf32>
    %306 = vector.shape_cast %305 : vector<1x2x32xf32> to vector<2x32xf32>
    %307 = vector.shape_cast %34 : vector<2x32xf32> to vector<1x2x32xf32>
    tpu.vector_store %arg23[%c0_136, %c0_137, %c0_138], %307 {strides = array<i32>} : memref<3x2x32xf32, #tpu.memory_space<vmem>>, vector<1x2x32xf32>,
    %c1_139 = arith.constant 1 : index
    %c0_140 = arith.constant 0 : index
    %c0_141 = arith.constant 0 : index
    %308 = vector.load %arg23[%c1_139, %c0_140, %c0_141] : memref<3x2x32xf32, #tpu.memory_space<vmem>>, vector<1x2x32xf32>
    %309 = vector.shape_cast %308 : vector<1x2x32xf32> to vector<2x32xf32>
    %310 = vector.shape_cast %169 : vector<2x32xf32> to vector<1x2x32xf32>
    tpu.vector_store %arg23[%c1_139, %c0_140, %c0_141], %310 {strides = array<i32>} : memref<3x2x32xf32, #tpu.memory_space<vmem>>, vector<1x2x32xf32>,
    %c2 = arith.constant 2 : index
    %c0_142 = arith.constant 0 : index
    %c0_143 = arith.constant 0 : index
    %311 = vector.load %arg23[%c2, %c0_142, %c0_143] : memref<3x2x32xf32, #tpu.memory_space<vmem>>, vector<1x2x32xf32>
    %312 = vector.shape_cast %311 : vector<1x2x32xf32> to vector<2x32xf32>
    %313 = vector.shape_cast %304 : vector<2x32xf32> to vector<1x2x32xf32>
    tpu.vector_store %arg23[%c2, %c0_142, %c0_143], %313 {strides = array<i32>} : memref<3x2x32xf32, #tpu.memory_space<vmem>>, vector<1x2x32xf32>,
    %c0_144 = arith.constant 0 : index
    %c0_145 = arith.constant 0 : index
    %314 = vector.load %arg19[%c0_144, %c0_145] : memref<32x32xf32, #tpu.memory_space<vmem>>, vector<32x32xf32>
    %cst_146 = arith.constant dense<0.000000e+00> : vector<2x32xf32>
    %315 = tpu.matmul %304, %314, %cst_146 {dimension_numbers = #tpu.dot_dimension_numbers<[1], [0], [0], [1], [0, 0, 1, 1], [], []>} : vector<2x32xf32>, vector<32x32xf32>, vector<2x32xf32> -> vector<2x32xf32>
    %c0_147 = arith.constant 0 : index
    %c0_148 = arith.constant 0 : index
    %316 = vector.load %arg20[%c0_147, %c0_148] : memref<1x32xf32, #tpu.memory_space<vmem>>, vector<1x32xf32>
    %317 = vector.broadcast %316 : vector<1x32xf32> to vector<2x32xf32>
    %318 = arith.addf %315, %317 : vector<2x32xf32>
    %319 = math.tanh %318 : vector<2x32xf32>
    %c0_149 = arith.constant 0 : index
    %c0_150 = arith.constant 0 : index
    %320 = vector.load %arg21[%c0_149, %c0_150] : memref<32x2xf32, #tpu.memory_space<vmem>>, vector<32x2xf32>
    %cst_151 = arith.constant dense<0.000000e+00> : vector<2x2xf32>
    %321 = tpu.matmul %319, %320, %cst_151 {dimension_numbers = #tpu.dot_dimension_numbers<[1], [0], [0], [1], [0, 0, 1, 1], [], []>} : vector<2x32xf32>, vector<32x2xf32>, vector<2x2xf32> -> vector<2x2xf32>
    %c0_152 = arith.constant 0 : index
    %c0_153 = arith.constant 0 : index
    %322 = vector.load %arg22[%c0_152, %c0_153] : memref<1x2xf32, #tpu.memory_space<vmem>>, vector<1x2xf32>
    %323 = vector.broadcast %322 : vector<1x2xf32> to vector<2x2xf32>
    %324 = arith.addf %321, %323 : vector<2x2xf32>
    %c0_154 = arith.constant 0 : index
    %c0_155 = arith.constant 0 : index
    %325 = vector.load %arg24[%c0_154, %c0_155] : memref<2x2xf32, #tpu.memory_space<vmem>>, vector<2x2xf32>
    tpu.vector_store %arg24[%c0_154, %c0_155], %324 {strides = array<i32>} : memref<2x2xf32, #tpu.memory_space<vmem>>, vector<2x2xf32>,
    return
  }
  func.func @transform_0(%arg0: i32) -> (i32, i32, i32) {
    %c0_i32 = arith.constant 0 : i32
    %c0_i32_0 = arith.constant 0 : i32
    %c0_i32_1 = arith.constant 0 : i32
    %c0_i32_2 = arith.constant 0 : i32
    return %c0_i32, %c0_i32_0, %c0_i32_1 : i32, i32, i32
  }
  func.func @transform_1(%arg0: i32) -> (i32, i32) {
    %c0_i32 = arith.constant 0 : i32
    %c0_i32_0 = arith.constant 0 : i32
    %c0_i32_1 = arith.constant 0 : i32
    return %c0_i32, %c0_i32_0 : i32, i32
  }
  func.func @transform_2(%arg0: i32) -> (i32, i32) {
    %c0_i32 = arith.constant 0 : i32
    %c0_i32_0 = arith.constant 0 : i32
    %c0_i32_1 = arith.constant 0 : i32
    return %c0_i32, %c0_i32_0 : i32, i32
  }
  func.func @transform_3(%arg0: i32) -> (i32, i32) {
    %c0_i32 = arith.constant 0 : i32
    %c0_i32_0 = arith.constant 0 : i32
    %c0_i32_1 = arith.constant 0 : i32
    return %c0_i32, %c0_i32_0 : i32, i32
  }
  func.func @transform_4(%arg0: i32) -> (i32, i32, i32) {
    %c0_i32 = arith.constant 0 : i32
    %c0_i32_0 = arith.constant 0 : i32
    %c0_i32_1 = arith.constant 0 : i32
    %c0_i32_2 = arith.constant 0 : i32
    return %c0_i32, %c0_i32_0, %c0_i32_1 : i32, i32, i32
  }
  func.func @transform_5(%arg0: i32) -> (i32, i32) {
    %c0_i32 = arith.constant 0 : i32
    %c0_i32_0 = arith.constant 0 : i32
    %c0_i32_1 = arith.constant 0 : i32
    return %c0_i32, %c0_i32_0 : i32, i32
  }
  func.func @transform_6(%arg0: i32) -> (i32, i32, i32) {
    %c0_i32 = arith.constant 0 : i32
    %c0_i32_0 = arith.constant 0 : i32
    %c0_i32_1 = arith.constant 0 : i32
    %c0_i32_2 = arith.constant 0 : i32
    return %c0_i32, %c0_i32_0, %c0_i32_1 : i32, i32, i32
  }
  func.func @transform_7(%arg0: i32) -> (i32, i32, i32) {
    %c0_i32 = arith.constant 0 : i32
    %c0_i32_0 = arith.constant 0 : i32
    %c0_i32_1 = arith.constant 0 : i32
    %c0_i32_2 = arith.constant 0 : i32
    return %c0_i32, %c0_i32_0, %c0_i32_1 : i32, i32, i32
  }
  func.func @transform_8(%arg0: i32) -> (i32, i32, i32) {
    %c0_i32 = arith.constant 0 : i32
    %c0_i32_0 = arith.constant 0 : i32
    %c0_i32_1 = arith.constant 0 : i32
    %c0_i32_2 = arith.constant 0 : i32
    return %c0_i32, %c0_i32_0, %c0_i32_1 : i32, i32, i32
  }
  func.func @transform_9(%arg0: i32) -> (i32, i32, i32) {
    %c0_i32 = arith.constant 0 : i32
    %c0_i32_0 = arith.constant 0 : i32
    %c0_i32_1 = arith.constant 0 : i32
    %c0_i32_2 = arith.constant 0 : i32
    return %c0_i32, %c0_i32_0, %c0_i32_1 : i32, i32, i32
  }
  func.func @transform_10(%arg0: i32) -> (i32, i32, i32) {
    %c0_i32 = arith.constant 0 : i32
    %c0_i32_0 = arith.constant 0 : i32
    %c0_i32_1 = arith.constant 0 : i32
    %c0_i32_2 = arith.constant 0 : i32
    return %c0_i32, %c0_i32_0, %c0_i32_1 : i32, i32, i32
  }
  func.func @transform_11(%arg0: i32) -> (i32, i32, i32) {
    %c0_i32 = arith.constant 0 : i32
    %c0_i32_0 = arith.constant 0 : i32
    %c0_i32_1 = arith.constant 0 : i32
    %c0_i32_2 = arith.constant 0 : i32
    return %c0_i32, %c0_i32_0, %c0_i32_1 : i32, i32, i32
  }
  func.func @transform_12(%arg0: i32) -> (i32, i32, i32) {
    %c0_i32 = arith.constant 0 : i32
    %c0_i32_0 = arith.constant 0 : i32
    %c0_i32_1 = arith.constant 0 : i32
    %c0_i32_2 = arith.constant 0 : i32
    return %c0_i32, %c0_i32_0, %c0_i32_1 : i32, i32, i32
  }
  func.func @transform_13(%arg0: i32) -> (i32, i32, i32) {
    %c0_i32 = arith.constant 0 : i32
    %c0_i32_0 = arith.constant 0 : i32
    %c0_i32_1 = arith.constant 0 : i32
    %c0_i32_2 = arith.constant 0 : i32
    return %c0_i32, %c0_i32_0, %c0_i32_1 : i32, i32, i32
  }
  func.func @transform_14(%arg0: i32) -> (i32, i32, i32) {
    %c0_i32 = arith.constant 0 : i32
    %c0_i32_0 = arith.constant 0 : i32
    %c0_i32_1 = arith.constant 0 : i32
    %c0_i32_2 = arith.constant 0 : i32
    return %c0_i32, %c0_i32_0, %c0_i32_1 : i32, i32, i32
  }
  func.func @transform_15(%arg0: i32) -> (i32, i32, i32) {
    %c0_i32 = arith.constant 0 : i32
    %c0_i32_0 = arith.constant 0 : i32
    %c0_i32_1 = arith.constant 0 : i32
    %c0_i32_2 = arith.constant 0 : i32
    return %c0_i32, %c0_i32_0, %c0_i32_1 : i32, i32, i32
  }
  func.func @transform_16(%arg0: i32) -> (i32, i32, i32) {
    %c0_i32 = arith.constant 0 : i32
    %c0_i32_0 = arith.constant 0 : i32
    %c0_i32_1 = arith.constant 0 : i32
    %c0_i32_2 = arith.constant 0 : i32
    return %c0_i32, %c0_i32_0, %c0_i32_1 : i32, i32, i32
  }
  func.func @transform_17(%arg0: i32) -> (i32, i32, i32) {
    %c0_i32 = arith.constant 0 : i32
    %c0_i32_0 = arith.constant 0 : i32
    %c0_i32_1 = arith.constant 0 : i32
    %c0_i32_2 = arith.constant 0 : i32
    return %c0_i32, %c0_i32_0, %c0_i32_1 : i32, i32, i32
  }
  func.func @transform_18(%arg0: i32) -> (i32, i32) {
    %c0_i32 = arith.constant 0 : i32
    %c0_i32_0 = arith.constant 0 : i32
    %c0_i32_1 = arith.constant 0 : i32
    return %c0_i32, %c0_i32_0 : i32, i32
  }
  func.func @transform_19(%arg0: i32) -> (i32, i32) {
    %c0_i32 = arith.constant 0 : i32
    %c0_i32_0 = arith.constant 0 : i32
    %c0_i32_1 = arith.constant 0 : i32
    return %c0_i32, %c0_i32_0 : i32, i32
  }
  func.func @transform_20(%arg0: i32) -> (i32, i32) {
    %c0_i32 = arith.constant 0 : i32
    %c0_i32_0 = arith.constant 0 : i32
    %c0_i32_1 = arith.constant 0 : i32
    return %c0_i32, %c0_i32_0 : i32, i32
  }
  func.func @transform_21(%arg0: i32) -> (i32, i32) {
    %c0_i32 = arith.constant 0 : i32
    %c0_i32_0 = arith.constant 0 : i32
    %c0_i32_1 = arith.constant 0 : i32
    return %c0_i32, %c0_i32_0 : i32, i32
  }
  func.func @transform_22(%arg0: i32) -> (i32, i32, i32) {
    %c0_i32 = arith.constant 0 : i32
    %c0_i32_0 = arith.constant 0 : i32
    %c0_i32_1 = arith.constant 0 : i32
    %c0_i32_2 = arith.constant 0 : i32
    return %c0_i32, %c0_i32_0, %c0_i32_1 : i32, i32, i32
  }
  func.func @transform_23(%arg0: i32) -> (i32, i32) {
    %c0_i32 = arith.constant 0 : i32
    %c0_i32_0 = arith.constant 0 : i32
    %c0_i32_1 = arith.constant 0 : i32
    return %c0_i32, %c0_i32_0 : i32, i32
  }
}

module attributes {stable_mosaic.version = 11 : i64} {
  func.func @_heads_kernel(%arg0: i32, %arg1: memref<2x2x32xf32, #tpu.memory_space<vmem>>, %arg2: memref<2x32xf32, #tpu.memory_space<vmem>>, %arg3: memref<2x32xf32, #tpu.memory_space<vmem>>, %arg4: memref<2x2xf32, #tpu.memory_space<vmem>>, %arg5: memref<32x32xf32, #tpu.memory_space<vmem>>, %arg6: memref<32x32xf32, #tpu.memory_space<vmem>>, %arg7: memref<32x3xf32, #tpu.memory_space<vmem>>, %arg8: memref<1x3xf32, #tpu.memory_space<vmem>>, %arg9: memref<2x32x2xf32, #tpu.memory_space<vmem>>, %arg10: memref<2x1x2xf32, #tpu.memory_space<vmem>>, %arg11: memref<2x2xf32, #tpu.memory_space<vmem>>, %arg12: memref<2x3xf32, #tpu.memory_space<vmem>>, %arg13: memref<2x3xf32, #tpu.memory_space<vmem>>, %arg14: memref<2x2x2xf32, #tpu.memory_space<vmem>>) attributes {dimension_semantics = [#tpu.dimension_semantics<arbitrary>], iteration_bounds = array<i64: 1>, scalar_prefetch = 0 : i64, scratch_operands = 0 : i64, tpu.core_type = #tpu.core_type<tc>, window_params = [{pipeline_mode = #tpu.pipeline_mode<synchronous>, transform_indices = @transform_0, window_bounds = array<i64: 2, 2, 32>}, {pipeline_mode = #tpu.pipeline_mode<synchronous>, transform_indices = @transform_1, window_bounds = array<i64: 2, 32>}, {pipeline_mode = #tpu.pipeline_mode<synchronous>, transform_indices = @transform_2, window_bounds = array<i64: 2, 32>}, {pipeline_mode = #tpu.pipeline_mode<synchronous>, transform_indices = @transform_3, window_bounds = array<i64: 2, 2>}, {pipeline_mode = #tpu.pipeline_mode<synchronous>, transform_indices = @transform_4, window_bounds = array<i64: 32, 32>}, {pipeline_mode = #tpu.pipeline_mode<synchronous>, transform_indices = @transform_5, window_bounds = array<i64: 32, 32>}, {pipeline_mode = #tpu.pipeline_mode<synchronous>, transform_indices = @transform_6, window_bounds = array<i64: 32, 3>}, {pipeline_mode = #tpu.pipeline_mode<synchronous>, transform_indices = @transform_7, window_bounds = array<i64: 1, 3>}, {pipeline_mode = #tpu.pipeline_mode<synchronous>, transform_indices = @transform_8, window_bounds = array<i64: 2, 32, 2>}, {pipeline_mode = #tpu.pipeline_mode<synchronous>, transform_indices = @transform_9, window_bounds = array<i64: 2, 1, 2>}, {pipeline_mode = #tpu.pipeline_mode<synchronous>, transform_indices = @transform_10, window_bounds = array<i64: 2, 2>}, {pipeline_mode = #tpu.pipeline_mode<synchronous>, transform_indices = @transform_11, window_bounds = array<i64: 2, 3>}, {pipeline_mode = #tpu.pipeline_mode<synchronous>, transform_indices = @transform_12, window_bounds = array<i64: 2, 3>}, {pipeline_mode = #tpu.pipeline_mode<synchronous>, transform_indices = @transform_13, window_bounds = array<i64: 2, 2, 2>}]} {
    %c0 = arith.constant 0 : index
    %c0_0 = arith.constant 0 : index
    %0 = vector.load %arg2[%c0, %c0_0] : memref<2x32xf32, #tpu.memory_space<vmem>>, vector<2x32xf32>
    %c0_1 = arith.constant 0 : index
    %c0_2 = arith.constant 0 : index
    %1 = vector.load %arg5[%c0_1, %c0_2] : memref<32x32xf32, #tpu.memory_space<vmem>>, vector<32x32xf32>
    %cst = arith.constant dense<0.000000e+00> : vector<2x32xf32>
    %2 = tpu.matmul %0, %1, %cst {dimension_numbers = #tpu.dot_dimension_numbers<[1], [0], [0], [1], [0, 0, 1, 1], [], []>} : vector<2x32xf32>, vector<32x32xf32>, vector<2x32xf32> -> vector<2x32xf32>
    %3 = tpu.iota {dimensions = array<i32: 1>} : vector<1x3xi32>
    %cst_3 = arith.constant 0.000000e+00 : f32
    %4 = vector.broadcast %cst_3 : f32 to vector<2x3xf32>
    %c0_4 = arith.constant 0 : index
    %c0_5 = arith.constant 0 : index
    %c0_6 = arith.constant 0 : index
    %5 = vector.load %arg1[%c0_4, %c0_5, %c0_6] : memref<2x2x32xf32, #tpu.memory_space<vmem>>, vector<1x2x32xf32>
    %6 = vector.shape_cast %5 : vector<1x2x32xf32> to vector<2x32xf32>
    %c0_7 = arith.constant 0 : index
    %c0_8 = arith.constant 0 : index
    %c0_9 = arith.constant 0 : index
    %7 = vector.load %arg9[%c0_7, %c0_8, %c0_9] : memref<2x32x2xf32, #tpu.memory_space<vmem>>, vector<1x32x2xf32>
    %8 = vector.shape_cast %7 : vector<1x32x2xf32> to vector<32x2xf32>
    %cst_10 = arith.constant dense<0.000000e+00> : vector<2x2xf32>
    %9 = tpu.matmul %6, %8, %cst_10 {dimension_numbers = #tpu.dot_dimension_numbers<[1], [0], [0], [1], [0, 0, 1, 1], [], []>} : vector<2x32xf32>, vector<32x2xf32>, vector<2x2xf32> -> vector<2x2xf32>
    %c0_11 = arith.constant 0 : index
    %c0_12 = arith.constant 0 : index
    %c0_13 = arith.constant 0 : index
    %10 = vector.load %arg10[%c0_11, %c0_12, %c0_13] : memref<2x1x2xf32, #tpu.memory_space<vmem>>, vector<1x1x2xf32>
    %11 = vector.shape_cast %10 : vector<1x1x2xf32> to vector<1x2xf32>
    %12 = vector.broadcast %11 : vector<1x2xf32> to vector<2x2xf32>
    %13 = arith.addf %9, %12 : vector<2x2xf32>
    %c0_14 = arith.constant 0 : index
    %c0_15 = arith.constant 0 : index
    %c0_16 = arith.constant 0 : index
    %14 = vector.load %arg14[%c0_14, %c0_15, %c0_16] : memref<2x2x2xf32, #tpu.memory_space<vmem>>, vector<1x2x2xf32>
    %15 = vector.shape_cast %14 : vector<1x2x2xf32> to vector<2x2xf32>
    %16 = vector.shape_cast %13 : vector<2x2xf32> to vector<1x2x2xf32>
    tpu.vector_store %arg14[%c0_14, %c0_15, %c0_16], %16 {strides = array<i32>} : memref<2x2x2xf32, #tpu.memory_space<vmem>>, vector<1x2x2xf32>,
    %c0_17 = arith.constant 0 : index
    %c0_18 = arith.constant 0 : index
    %17 = vector.load %arg6[%c0_17, %c0_18] : memref<32x32xf32, #tpu.memory_space<vmem>>, vector<32x32xf32>
    %cst_19 = arith.constant dense<0.000000e+00> : vector<2x32xf32>
    %18 = tpu.matmul %6, %17, %cst_19 {dimension_numbers = #tpu.dot_dimension_numbers<[1], [0], [0], [1], [0, 0, 1, 1], [], []>} : vector<2x32xf32>, vector<32x32xf32>, vector<2x32xf32> -> vector<2x32xf32>
    %19 = arith.mulf %18, %2 : vector<2x32xf32>
    %cst_20 = arith.constant dense<0.000000e+00> : vector<2xf32>
    %20 = vector.multi_reduction <add>, %19, %cst_20 [1] : vector<2x32xf32> to vector<2xf32>
    %21 = vector.shape_cast %20 : vector<2xf32> to vector<2x1xf32>
    %cst_21 = arith.constant 0.176776692 : f32
    %22 = vector.broadcast %cst_21 : f32 to vector<2x1xf32>
    %23 = arith.mulf %21, %22 : vector<2x1xf32>
    %c0_i32 = arith.constant 0 : i32
    %24 = vector.broadcast %c0_i32 : i32 to vector<1x3xi32>
    %25 = arith.cmpi eq, %3, %24 : vector<1x3xi32>
    %cst_22 = arith.constant 0.000000e+00 : f32
    %26 = vector.shape_cast %25 : vector<1x3xi1> to vector<1x3xi1>
    %27 = vector.broadcast %26 : vector<1x3xi1> to vector<2x3xi1>
    %28 = vector.shape_cast %23 : vector<2x1xf32> to vector<2x1xf32>
    %29 = vector.broadcast %28 : vector<2x1xf32> to vector<2x3xf32>
    %30 = vector.broadcast %cst_22 : f32 to vector<2x3xf32>
    %31 = arith.select %27, %29, %30 : vector<2x3xi1>, vector<2x3xf32>
    %32 = arith.addf %4, %31 : vector<2x3xf32>
    %cst_23 = arith.constant dense<0xFF800000> : vector<2xf32>
    %33 = vector.multi_reduction <maximumf>, %13, %cst_23 [1] : vector<2x2xf32> to vector<2xf32>
    %34 = vector.shape_cast %33 : vector<2xf32> to vector<2x1xf32>
    %35 = vector.broadcast %34 : vector<2x1xf32> to vector<2x2xf32>
    %36 = arith.subf %13, %35 : vector<2x2xf32>
    %37 = math.exp %36 : vector<2x2xf32>
    %cst_24 = arith.constant dense<0.000000e+00> : vector<2xf32>
    %38 = vector.multi_reduction <add>, %37, %cst_24 [1] : vector<2x2xf32> to vector<2xf32>
    %39 = vector.shape_cast %38 : vector<2xf32> to vector<2x1xf32>
    %40 = vector.broadcast %39 : vector<2x1xf32> to vector<2x2xf32>
    %41 = arith.divf %37, %40 : vector<2x2xf32>
    %c1 = arith.constant 1 : index
    %c0_25 = arith.constant 0 : index
    %c0_26 = arith.constant 0 : index
    %42 = vector.load %arg1[%c1, %c0_25, %c0_26] : memref<2x2x32xf32, #tpu.memory_space<vmem>>, vector<1x2x32xf32>
    %43 = vector.shape_cast %42 : vector<1x2x32xf32> to vector<2x32xf32>
    %c1_27 = arith.constant 1 : index
    %c0_28 = arith.constant 0 : index
    %c0_29 = arith.constant 0 : index
    %44 = vector.load %arg9[%c1_27, %c0_28, %c0_29] : memref<2x32x2xf32, #tpu.memory_space<vmem>>, vector<1x32x2xf32>
    %45 = vector.shape_cast %44 : vector<1x32x2xf32> to vector<32x2xf32>
    %cst_30 = arith.constant dense<0.000000e+00> : vector<2x2xf32>
    %46 = tpu.matmul %43, %45, %cst_30 {dimension_numbers = #tpu.dot_dimension_numbers<[1], [0], [0], [1], [0, 0, 1, 1], [], []>} : vector<2x32xf32>, vector<32x2xf32>, vector<2x2xf32> -> vector<2x2xf32>
    %c1_31 = arith.constant 1 : index
    %c0_32 = arith.constant 0 : index
    %c0_33 = arith.constant 0 : index
    %47 = vector.load %arg10[%c1_31, %c0_32, %c0_33] : memref<2x1x2xf32, #tpu.memory_space<vmem>>, vector<1x1x2xf32>
    %48 = vector.shape_cast %47 : vector<1x1x2xf32> to vector<1x2xf32>
    %49 = vector.broadcast %48 : vector<1x2xf32> to vector<2x2xf32>
    %50 = arith.addf %46, %49 : vector<2x2xf32>
    %c1_34 = arith.constant 1 : index
    %c0_35 = arith.constant 0 : index
    %c0_36 = arith.constant 0 : index
    %51 = vector.load %arg14[%c1_34, %c0_35, %c0_36] : memref<2x2x2xf32, #tpu.memory_space<vmem>>, vector<1x2x2xf32>
    %52 = vector.shape_cast %51 : vector<1x2x2xf32> to vector<2x2xf32>
    %53 = vector.shape_cast %50 : vector<2x2xf32> to vector<1x2x2xf32>
    tpu.vector_store %arg14[%c1_34, %c0_35, %c0_36], %53 {strides = array<i32>} : memref<2x2x2xf32, #tpu.memory_space<vmem>>, vector<1x2x2xf32>,
    %c0_37 = arith.constant 0 : index
    %c0_38 = arith.constant 0 : index
    %54 = vector.load %arg6[%c0_37, %c0_38] : memref<32x32xf32, #tpu.memory_space<vmem>>, vector<32x32xf32>
    %cst_39 = arith.constant dense<0.000000e+00> : vector<2x32xf32>
    %55 = tpu.matmul %43, %54, %cst_39 {dimension_numbers = #tpu.dot_dimension_numbers<[1], [0], [0], [1], [0, 0, 1, 1], [], []>} : vector<2x32xf32>, vector<32x32xf32>, vector<2x32xf32> -> vector<2x32xf32>
    %56 = arith.mulf %55, %2 : vector<2x32xf32>
    %cst_40 = arith.constant dense<0.000000e+00> : vector<2xf32>
    %57 = vector.multi_reduction <add>, %56, %cst_40 [1] : vector<2x32xf32> to vector<2xf32>
    %58 = vector.shape_cast %57 : vector<2xf32> to vector<2x1xf32>
    %cst_41 = arith.constant 0.176776692 : f32
    %59 = vector.broadcast %cst_41 : f32 to vector<2x1xf32>
    %60 = arith.mulf %58, %59 : vector<2x1xf32>
    %c1_i32 = arith.constant 1 : i32
    %61 = vector.broadcast %c1_i32 : i32 to vector<1x3xi32>
    %62 = arith.cmpi eq, %3, %61 : vector<1x3xi32>
    %cst_42 = arith.constant 0.000000e+00 : f32
    %63 = vector.shape_cast %62 : vector<1x3xi1> to vector<1x3xi1>
    %64 = vector.broadcast %63 : vector<1x3xi1> to vector<2x3xi1>
    %65 = vector.shape_cast %60 : vector<2x1xf32> to vector<2x1xf32>
    %66 = vector.broadcast %65 : vector<2x1xf32> to vector<2x3xf32>
    %67 = vector.broadcast %cst_42 : f32 to vector<2x3xf32>
    %68 = arith.select %64, %66, %67 : vector<2x3xi1>, vector<2x3xf32>
    %69 = arith.addf %32, %68 : vector<2x3xf32>
    %cst_43 = arith.constant dense<0xFF800000> : vector<2xf32>
    %70 = vector.multi_reduction <maximumf>, %50, %cst_43 [1] : vector<2x2xf32> to vector<2xf32>
    %71 = vector.shape_cast %70 : vector<2xf32> to vector<2x1xf32>
    %72 = vector.broadcast %71 : vector<2x1xf32> to vector<2x2xf32>
    %73 = arith.subf %50, %72 : vector<2x2xf32>
    %74 = math.exp %73 : vector<2x2xf32>
    %cst_44 = arith.constant dense<0.000000e+00> : vector<2xf32>
    %75 = vector.multi_reduction <add>, %74, %cst_44 [1] : vector<2x2xf32> to vector<2xf32>
    %76 = vector.shape_cast %75 : vector<2xf32> to vector<2x1xf32>
    %77 = vector.broadcast %76 : vector<2x1xf32> to vector<2x2xf32>
    %78 = arith.divf %74, %77 : vector<2x2xf32>
    %c0_45 = arith.constant 0 : index
    %c0_46 = arith.constant 0 : index
    %79 = vector.load %arg4[%c0_45, %c0_46] : memref<2x2xf32, #tpu.memory_space<vmem>>, vector<2x2xf32>
    %c0_47 = arith.constant 0 : index
    %c0_48 = arith.constant 0 : index
    %80 = vector.load %arg6[%c0_47, %c0_48] : memref<32x32xf32, #tpu.memory_space<vmem>>, vector<32x32xf32>
    %cst_49 = arith.constant dense<0.000000e+00> : vector<2x32xf32>
    %81 = tpu.matmul %0, %80, %cst_49 {dimension_numbers = #tpu.dot_dimension_numbers<[1], [0], [0], [1], [0, 0, 1, 1], [], []>} : vector<2x32xf32>, vector<32x32xf32>, vector<2x32xf32> -> vector<2x32xf32>
    %82 = arith.mulf %81, %2 : vector<2x32xf32>
    %cst_50 = arith.constant dense<0.000000e+00> : vector<2xf32>
    %83 = vector.multi_reduction <add>, %82, %cst_50 [1] : vector<2x32xf32> to vector<2xf32>
    %84 = vector.shape_cast %83 : vector<2xf32> to vector<2x1xf32>
    %cst_51 = arith.constant 0.176776692 : f32
    %85 = vector.broadcast %cst_51 : f32 to vector<2x1xf32>
    %86 = arith.mulf %84, %85 : vector<2x1xf32>
    %c2_i32 = arith.constant 2 : i32
    %87 = vector.broadcast %c2_i32 : i32 to vector<1x3xi32>
    %88 = arith.cmpi eq, %3, %87 : vector<1x3xi32>
    %cst_52 = arith.constant 0.000000e+00 : f32
    %89 = vector.shape_cast %88 : vector<1x3xi1> to vector<1x3xi1>
    %90 = vector.broadcast %89 : vector<1x3xi1> to vector<2x3xi1>
    %91 = vector.shape_cast %86 : vector<2x1xf32> to vector<2x1xf32>
    %92 = vector.broadcast %91 : vector<2x1xf32> to vector<2x3xf32>
    %93 = vector.broadcast %cst_52 : f32 to vector<2x3xf32>
    %94 = arith.select %90, %92, %93 : vector<2x3xi1>, vector<2x3xf32>
    %95 = arith.addf %69, %94 : vector<2x3xf32>
    %cst_53 = arith.constant dense<0xFF800000> : vector<2xf32>
    %96 = vector.multi_reduction <maximumf>, %79, %cst_53 [1] : vector<2x2xf32> to vector<2xf32>
    %97 = vector.shape_cast %96 : vector<2xf32> to vector<2x1xf32>
    %98 = vector.broadcast %97 : vector<2x1xf32> to vector<2x2xf32>
    %99 = arith.subf %79, %98 : vector<2x2xf32>
    %100 = math.exp %99 : vector<2x2xf32>
    %cst_54 = arith.constant dense<0.000000e+00> : vector<2xf32>
    %101 = vector.multi_reduction <add>, %100, %cst_54 [1] : vector<2x2xf32> to vector<2xf32>
    %102 = vector.shape_cast %101 : vector<2xf32> to vector<2x1xf32>
    %103 = vector.broadcast %102 : vector<2x1xf32> to vector<2x2xf32>
    %104 = arith.divf %100, %103 : vector<2x2xf32>
    %cst_55 = arith.constant dense<0xFF800000> : vector<2xf32>
    %105 = vector.multi_reduction <maximumf>, %95, %cst_55 [1] : vector<2x3xf32> to vector<2xf32>
    %106 = vector.shape_cast %105 : vector<2xf32> to vector<2x1xf32>
    %107 = vector.broadcast %106 : vector<2x1xf32> to vector<2x3xf32>
    %108 = arith.subf %95, %107 : vector<2x3xf32>
    %109 = math.exp %108 : vector<2x3xf32>
    %cst_56 = arith.constant dense<0.000000e+00> : vector<2xf32>
    %110 = vector.multi_reduction <add>, %109, %cst_56 [1] : vector<2x3xf32> to vector<2xf32>
    %111 = vector.shape_cast %110 : vector<2xf32> to vector<2x1xf32>
    %112 = vector.broadcast %111 : vector<2x1xf32> to vector<2x3xf32>
    %113 = arith.divf %109, %112 : vector<2x3xf32>
    %c0_57 = arith.constant 0 : index
    %c0_58 = arith.constant 0 : index
    %114 = vector.load %arg12[%c0_57, %c0_58] : memref<2x3xf32, #tpu.memory_space<vmem>>, vector<2x3xf32>
    tpu.vector_store %arg12[%c0_57, %c0_58], %113 {strides = array<i32>} : memref<2x3xf32, #tpu.memory_space<vmem>>, vector<2x3xf32>,
    %cst_59 = arith.constant 0.000000e+00 : f32
    %115 = vector.broadcast %cst_59 : f32 to vector<2x2xf32>
    %116 = vector.extract_strided_slice %113 {offsets = [0, 0], sizes = [2, 1], strides = [1, 1]} : vector<2x3xf32> to vector<2x1xf32>
    %117 = vector.broadcast %116 : vector<2x1xf32> to vector<2x2xf32>
    %118 = arith.mulf %41, %117 : vector<2x2xf32>
    %119 = arith.addf %115, %118 : vector<2x2xf32>
    %120 = vector.extract_strided_slice %113 {offsets = [0, 1], sizes = [2, 1], strides = [1, 1]} : vector<2x3xf32> to vector<2x1xf32>
    %121 = vector.broadcast %120 : vector<2x1xf32> to vector<2x2xf32>
    %122 = arith.mulf %78, %121 : vector<2x2xf32>
    %123 = arith.addf %119, %122 : vector<2x2xf32>
    %124 = vector.extract_strided_slice %113 {offsets = [0, 2], sizes = [2, 1], strides = [1, 1]} : vector<2x3xf32> to vector<2x1xf32>
    %125 = vector.broadcast %124 : vector<2x1xf32> to vector<2x2xf32>
    %126 = arith.mulf %104, %125 : vector<2x2xf32>
    %127 = arith.addf %123, %126 : vector<2x2xf32>
    %c0_60 = arith.constant 0 : index
    %c0_61 = arith.constant 0 : index
    %128 = vector.load %arg11[%c0_60, %c0_61] : memref<2x2xf32, #tpu.memory_space<vmem>>, vector<2x2xf32>
    tpu.vector_store %arg11[%c0_60, %c0_61], %127 {strides = array<i32>} : memref<2x2xf32, #tpu.memory_space<vmem>>, vector<2x2xf32>,
    %c0_62 = arith.constant 0 : index
    %c0_63 = arith.constant 0 : index
    %129 = vector.load %arg3[%c0_62, %c0_63] : memref<2x32xf32, #tpu.memory_space<vmem>>, vector<2x32xf32>
    %c0_64 = arith.constant 0 : index
    %c0_65 = arith.constant 0 : index
    %130 = vector.load %arg7[%c0_64, %c0_65] : memref<32x3xf32, #tpu.memory_space<vmem>>, vector<32x3xf32>
    %cst_66 = arith.constant dense<0.000000e+00> : vector<2x3xf32>
    %131 = tpu.matmul %129, %130, %cst_66 {dimension_numbers = #tpu.dot_dimension_numbers<[1], [0], [0], [1], [0, 0, 1, 1], [], []>} : vector<2x32xf32>, vector<32x3xf32>, vector<2x3xf32> -> vector<2x3xf32>
    %c0_67 = arith.constant 0 : index
    %c0_68 = arith.constant 0 : index
    %132 = vector.load %arg8[%c0_67, %c0_68] : memref<1x3xf32, #tpu.memory_space<vmem>>, vector<1x3xf32>
    %133 = vector.broadcast %132 : vector<1x3xf32> to vector<2x3xf32>
    %134 = arith.addf %131, %133 : vector<2x3xf32>
    %c0_69 = arith.constant 0 : index
    %c0_70 = arith.constant 0 : index
    %135 = vector.load %arg13[%c0_69, %c0_70] : memref<2x3xf32, #tpu.memory_space<vmem>>, vector<2x3xf32>
    tpu.vector_store %arg13[%c0_69, %c0_70], %134 {strides = array<i32>} : memref<2x3xf32, #tpu.memory_space<vmem>>, vector<2x3xf32>,
    return
  }
  func.func @transform_0(%arg0: i32) -> (i32, i32, i32) {
    %c0_i32 = arith.constant 0 : i32
    %c0_i32_0 = arith.constant 0 : i32
    %c0_i32_1 = arith.constant 0 : i32
    %c0_i32_2 = arith.constant 0 : i32
    return %c0_i32, %c0_i32_0, %c0_i32_1 : i32, i32, i32
  }
  func.func @transform_1(%arg0: i32) -> (i32, i32) {
    %c0_i32 = arith.constant 0 : i32
    %c0_i32_0 = arith.constant 0 : i32
    %c0_i32_1 = arith.constant 0 : i32
    return %c0_i32, %c0_i32_0 : i32, i32
  }
  func.func @transform_2(%arg0: i32) -> (i32, i32) {
    %c0_i32 = arith.constant 0 : i32
    %c0_i32_0 = arith.constant 0 : i32
    %c0_i32_1 = arith.constant 0 : i32
    return %c0_i32, %c0_i32_0 : i32, i32
  }
  func.func @transform_3(%arg0: i32) -> (i32, i32) {
    %c0_i32 = arith.constant 0 : i32
    %c0_i32_0 = arith.constant 0 : i32
    %c0_i32_1 = arith.constant 0 : i32
    return %c0_i32, %c0_i32_0 : i32, i32
  }
  func.func @transform_4(%arg0: i32) -> (i32, i32) {
    %c0_i32 = arith.constant 0 : i32
    %c0_i32_0 = arith.constant 0 : i32
    %c0_i32_1 = arith.constant 0 : i32
    return %c0_i32, %c0_i32_0 : i32, i32
  }
  func.func @transform_5(%arg0: i32) -> (i32, i32) {
    %c0_i32 = arith.constant 0 : i32
    %c0_i32_0 = arith.constant 0 : i32
    %c0_i32_1 = arith.constant 0 : i32
    return %c0_i32, %c0_i32_0 : i32, i32
  }
  func.func @transform_6(%arg0: i32) -> (i32, i32) {
    %c0_i32 = arith.constant 0 : i32
    %c0_i32_0 = arith.constant 0 : i32
    %c0_i32_1 = arith.constant 0 : i32
    return %c0_i32, %c0_i32_0 : i32, i32
  }
  func.func @transform_7(%arg0: i32) -> (i32, i32) {
    %c0_i32 = arith.constant 0 : i32
    %c0_i32_0 = arith.constant 0 : i32
    %c0_i32_1 = arith.constant 0 : i32
    return %c0_i32, %c0_i32_0 : i32, i32
  }
  func.func @transform_8(%arg0: i32) -> (i32, i32, i32) {
    %c0_i32 = arith.constant 0 : i32
    %c0_i32_0 = arith.constant 0 : i32
    %c0_i32_1 = arith.constant 0 : i32
    %c0_i32_2 = arith.constant 0 : i32
    return %c0_i32, %c0_i32_0, %c0_i32_1 : i32, i32, i32
  }
  func.func @transform_9(%arg0: i32) -> (i32, i32, i32) {
    %c0_i32 = arith.constant 0 : i32
    %c0_i32_0 = arith.constant 0 : i32
    %c0_i32_1 = arith.constant 0 : i32
    %c0_i32_2 = arith.constant 0 : i32
    return %c0_i32, %c0_i32_0, %c0_i32_1 : i32, i32, i32
  }
  func.func @transform_10(%arg0: i32) -> (i32, i32) {
    %c0_i32 = arith.constant 0 : i32
    %c0_i32_0 = arith.constant 0 : i32
    %c0_i32_1 = arith.constant 0 : i32
    return %c0_i32, %c0_i32_0 : i32, i32
  }
  func.func @transform_11(%arg0: i32) -> (i32, i32) {
    %c0_i32 = arith.constant 0 : i32
    %c0_i32_0 = arith.constant 0 : i32
    %c0_i32_1 = arith.constant 0 : i32
    return %c0_i32, %c0_i32_0 : i32, i32
  }
  func.func @transform_12(%arg0: i32) -> (i32, i32) {
    %c0_i32 = arith.constant 0 : i32
    %c0_i32_0 = arith.constant 0 : i32
    %c0_i32_1 = arith.constant 0 : i32
    return %c0_i32, %c0_i32_0 : i32, i32
  }
  func.func @transform_13(%arg0: i32) -> (i32, i32, i32) {
    %c0_i32 = arith.constant 0 : i32
    %c0_i32_0 = arith.constant 0 : i32
    %c0_i32_1 = arith.constant 0 : i32
    %c0_i32_2 = arith.constant 0 : i32
    return %c0_i32, %c0_i32_0, %c0_i32_1 : i32, i32, i32
  }
}

module attributes {stable_mosaic.version = 11 : i64} {
  func.func @_multi_encoder_kernel(%arg0: i32, %arg1: memref<2x8x32xf32, #tpu.memory_space<vmem>>, %arg2: memref<8x32xf32, #tpu.memory_space<vmem>>, %arg3: memref<1x32xf32, #tpu.memory_space<vmem>>, %arg4: memref<1x32xf32, #tpu.memory_space<vmem>>, %arg5: memref<8x8x8xf32, #tpu.memory_space<vmem>>, %arg6: memref<4x32xf32, #tpu.memory_space<vmem>>, %arg7: memref<1x2x32x96xf32, #tpu.memory_space<vmem>>, %arg8: memref<1x2x1x96xf32, #tpu.memory_space<vmem>>, %arg9: memref<1x2x32x32xf32, #tpu.memory_space<vmem>>, %arg10: memref<1x2x1x32xf32, #tpu.memory_space<vmem>>, %arg11: memref<1x2x1x32xf32, #tpu.memory_space<vmem>>, %arg12: memref<1x2x1x32xf32, #tpu.memory_space<vmem>>, %arg13: memref<1x2x32x64xf32, #tpu.memory_space<vmem>>, %arg14: memref<1x2x1x64xf32, #tpu.memory_space<vmem>>, %arg15: memref<1x2x64x32xf32, #tpu.memory_space<vmem>>, %arg16: memref<1x2x1x32xf32, #tpu.memory_space<vmem>>, %arg17: memref<1x2x1x32xf32, #tpu.memory_space<vmem>>, %arg18: memref<1x2x1x32xf32, #tpu.memory_space<vmem>>, %arg19: memref<1x2x32xf32, #tpu.memory_space<vmem>>) attributes {dimension_semantics = [#tpu.dimension_semantics<parallel>], iteration_bounds = array<i64: 2>, scalar_prefetch = 0 : i64, scratch_operands = 0 : i64, tpu.core_type = #tpu.core_type<tc>, window_params = [{pipeline_mode = #tpu.pipeline_mode<synchronous>, transform_indices = @transform_0, window_bounds = array<i64: 2, 8, 32>}, {pipeline_mode = #tpu.pipeline_mode<synchronous>, transform_indices = @transform_1, window_bounds = array<i64: 8, 32>}, {pipeline_mode = #tpu.pipeline_mode<synchronous>, transform_indices = @transform_2, window_bounds = array<i64: 1, 32>}, {pipeline_mode = #tpu.pipeline_mode<synchronous>, transform_indices = @transform_3, window_bounds = array<i64: 1, 32>}, {pipeline_mode = #tpu.pipeline_mode<synchronous>, transform_indices = @transform_4, window_bounds = array<i64: 8, 8, 8>}, {pipeline_mode = #tpu.pipeline_mode<synchronous>, transform_indices = @transform_5, window_bounds = array<i64: 4, 32>}, {transform_indices = @transform_6, window_bounds = array<i64: 1, 2, 32, 96>}, {transform_indices = @transform_7, window_bounds = array<i64: 1, 2, 1, 96>}, {transform_indices = @transform_8, window_bounds = array<i64: 1, 2, 32, 32>}, {transform_indices = @transform_9, window_bounds = array<i64: 1, 2, 1, 32>}, {transform_indices = @transform_10, window_bounds = array<i64: 1, 2, 1, 32>}, {transform_indices = @transform_11, window_bounds = array<i64: 1, 2, 1, 32>}, {transform_indices = @transform_12, window_bounds = array<i64: 1, 2, 32, 64>}, {transform_indices = @transform_13, window_bounds = array<i64: 1, 2, 1, 64>}, {transform_indices = @transform_14, window_bounds = array<i64: 1, 2, 64, 32>}, {transform_indices = @transform_15, window_bounds = array<i64: 1, 2, 1, 32>}, {transform_indices = @transform_16, window_bounds = array<i64: 1, 2, 1, 32>}, {transform_indices = @transform_17, window_bounds = array<i64: 1, 2, 1, 32>}, {transform_indices = @transform_18, window_bounds = array<i64: 1, 2, 32>}]} {
    %c0 = arith.constant 0 : index
    %c0_0 = arith.constant 0 : index
    %0 = vector.load %arg6[%c0, %c0_0] : memref<4x32xf32, #tpu.memory_space<vmem>>, vector<4x32xf32>
    %c0_1 = arith.constant 0 : index
    %c0_2 = arith.constant 0 : index
    %c0_3 = arith.constant 0 : index
    %1 = vector.load %arg5[%c0_1, %c0_2, %c0_3] : memref<8x8x8xf32, #tpu.memory_space<vmem>>, vector<8x8x8xf32>
    %c0_4 = arith.constant 0 : index
    %c0_5 = arith.constant 0 : index
    %c0_6 = arith.constant 0 : index
    %2 = vector.load %arg1[%c0_4, %c0_5, %c0_6] : memref<2x8x32xf32, #tpu.memory_space<vmem>>, vector<2x8x32xf32>
    %c0_7 = arith.constant 0 : index
    %c0_8 = arith.constant 0 : index
    %3 = vector.load %arg2[%c0_7, %c0_8] : memref<8x32xf32, #tpu.memory_space<vmem>>, vector<8x32xf32>
    %4 = vector.shape_cast %3 : vector<8x32xf32> to vector<1x8x32xf32>
    %5 = vector.broadcast %4 : vector<1x8x32xf32> to vector<2x8x32xf32>
    %6 = arith.addf %2, %5 : vector<2x8x32xf32>
    %7 = vector.shape_cast %6 : vector<2x8x32xf32> to vector<16x32xf32>
    %c0_9 = arith.constant 0 : index
    %c0_10 = arith.constant 0 : index
    %8 = vector.load %arg3[%c0_9, %c0_10] : memref<1x32xf32, #tpu.memory_space<vmem>>, vector<1x32xf32>
    %c0_11 = arith.constant 0 : index
    %c0_12 = arith.constant 0 : index
    %9 = vector.load %arg4[%c0_11, %c0_12] : memref<1x32xf32, #tpu.memory_space<vmem>>, vector<1x32xf32>
    %cst = arith.constant dense<0.000000e+00> : vector<16xf32>
    %10 = vector.multi_reduction <add>, %7, %cst [1] : vector<16x32xf32> to vector<16xf32>
    %11 = vector.shape_cast %10 : vector<16xf32> to vector<16x1xf32>
    %cst_13 = arith.constant 3.200000e+01 : f32
    %12 = vector.broadcast %cst_13 : f32 to vector<16x1xf32>
    %13 = arith.divf %11, %12 : vector<16x1xf32>
    %14 = vector.broadcast %13 : vector<16x1xf32> to vector<16x32xf32>
    %15 = arith.subf %7, %14 : vector<16x32xf32>
    %16 = arith.mulf %15, %15 : vector<16x32xf32>
    %cst_14 = arith.constant dense<0.000000e+00> : vector<16xf32>
    %17 = vector.multi_reduction <add>, %16, %cst_14 [1] : vector<16x32xf32> to vector<16xf32>
    %18 = vector.shape_cast %17 : vector<16xf32> to vector<16x1xf32>
    %cst_15 = arith.constant 3.200000e+01 : f32
    %19 = vector.broadcast %cst_15 : f32 to vector<16x1xf32>
    %20 = arith.divf %18, %19 : vector<16x1xf32>
    %21 = vector.broadcast %13 : vector<16x1xf32> to vector<16x32xf32>
    %22 = arith.subf %7, %21 : vector<16x32xf32>
    %cst_16 = arith.constant 9.99999996E-13 : f32
    %23 = vector.broadcast %cst_16 : f32 to vector<16x1xf32>
    %24 = arith.addf %20, %23 : vector<16x1xf32>
    %25 = math.rsqrt %24 : vector<16x1xf32>
    %26 = vector.broadcast %25 : vector<16x1xf32> to vector<16x32xf32>
    %27 = arith.mulf %22, %26 : vector<16x32xf32>
    %28 = vector.broadcast %8 : vector<1x32xf32> to vector<16x32xf32>
    %29 = arith.mulf %27, %28 : vector<16x32xf32>
    %30 = vector.broadcast %9 : vector<1x32xf32> to vector<16x32xf32>
    %31 = arith.addf %29, %30 : vector<16x32xf32>
    %c0_17 = arith.constant 0 : index
    %c0_18 = arith.constant 0 : index
    %c0_19 = arith.constant 0 : index
    %c0_20 = arith.constant 0 : index
    %32 = vector.load %arg7[%c0_17, %c0_18, %c0_19, %c0_20] : memref<1x2x32x96xf32, #tpu.memory_space<vmem>>, vector<1x1x32x96xf32>
    %33 = vector.shape_cast %32 : vector<1x1x32x96xf32> to vector<32x96xf32>
    %c0_21 = arith.constant 0 : index
    %c0_22 = arith.constant 0 : index
    %c0_23 = arith.constant 0 : index
    %c0_24 = arith.constant 0 : index
    %34 = vector.load %arg8[%c0_21, %c0_22, %c0_23, %c0_24] : memref<1x2x1x96xf32, #tpu.memory_space<vmem>>, vector<1x1x1x96xf32>
    %35 = vector.shape_cast %34 : vector<1x1x1x96xf32> to vector<1x96xf32>
    %c0_25 = arith.constant 0 : index
    %c0_26 = arith.constant 0 : index
    %c0_27 = arith.constant 0 : index
    %c0_28 = arith.constant 0 : index
    %36 = vector.load %arg9[%c0_25, %c0_26, %c0_27, %c0_28] : memref<1x2x32x32xf32, #tpu.memory_space<vmem>>, vector<1x1x32x32xf32>
    %37 = vector.shape_cast %36 : vector<1x1x32x32xf32> to vector<32x32xf32>
    %c0_29 = arith.constant 0 : index
    %c0_30 = arith.constant 0 : index
    %c0_31 = arith.constant 0 : index
    %c0_32 = arith.constant 0 : index
    %38 = vector.load %arg10[%c0_29, %c0_30, %c0_31, %c0_32] : memref<1x2x1x32xf32, #tpu.memory_space<vmem>>, vector<1x1x1x32xf32>
    %39 = vector.shape_cast %38 : vector<1x1x1x32xf32> to vector<1x32xf32>
    %c0_33 = arith.constant 0 : index
    %c0_34 = arith.constant 0 : index
    %c0_35 = arith.constant 0 : index
    %c0_36 = arith.constant 0 : index
    %40 = vector.load %arg11[%c0_33, %c0_34, %c0_35, %c0_36] : memref<1x2x1x32xf32, #tpu.memory_space<vmem>>, vector<1x1x1x32xf32>
    %41 = vector.shape_cast %40 : vector<1x1x1x32xf32> to vector<1x32xf32>
    %c0_37 = arith.constant 0 : index
    %c0_38 = arith.constant 0 : index
    %c0_39 = arith.constant 0 : index
    %c0_40 = arith.constant 0 : index
    %42 = vector.load %arg12[%c0_37, %c0_38, %c0_39, %c0_40] : memref<1x2x1x32xf32, #tpu.memory_space<vmem>>, vector<1x1x1x32xf32>
    %43 = vector.shape_cast %42 : vector<1x1x1x32xf32> to vector<1x32xf32>
    %c0_41 = arith.constant 0 : index
    %c0_42 = arith.constant 0 : index
    %c0_43 = arith.constant 0 : index
    %c0_44 = arith.constant 0 : index
    %44 = vector.load %arg13[%c0_41, %c0_42, %c0_43, %c0_44] : memref<1x2x32x64xf32, #tpu.memory_space<vmem>>, vector<1x1x32x64xf32>
    %45 = vector.shape_cast %44 : vector<1x1x32x64xf32> to vector<32x64xf32>
    %c0_45 = arith.constant 0 : index
    %c0_46 = arith.constant 0 : index
    %c0_47 = arith.constant 0 : index
    %c0_48 = arith.constant 0 : index
    %46 = vector.load %arg14[%c0_45, %c0_46, %c0_47, %c0_48] : memref<1x2x1x64xf32, #tpu.memory_space<vmem>>, vector<1x1x1x64xf32>
    %47 = vector.shape_cast %46 : vector<1x1x1x64xf32> to vector<1x64xf32>
    %c0_49 = arith.constant 0 : index
    %c0_50 = arith.constant 0 : index
    %c0_51 = arith.constant 0 : index
    %c0_52 = arith.constant 0 : index
    %48 = vector.load %arg15[%c0_49, %c0_50, %c0_51, %c0_52] : memref<1x2x64x32xf32, #tpu.memory_space<vmem>>, vector<1x1x64x32xf32>
    %49 = vector.shape_cast %48 : vector<1x1x64x32xf32> to vector<64x32xf32>
    %c0_53 = arith.constant 0 : index
    %c0_54 = arith.constant 0 : index
    %c0_55 = arith.constant 0 : index
    %c0_56 = arith.constant 0 : index
    %50 = vector.load %arg16[%c0_53, %c0_54, %c0_55, %c0_56] : memref<1x2x1x32xf32, #tpu.memory_space<vmem>>, vector<1x1x1x32xf32>
    %51 = vector.shape_cast %50 : vector<1x1x1x32xf32> to vector<1x32xf32>
    %c0_57 = arith.constant 0 : index
    %c0_58 = arith.constant 0 : index
    %c0_59 = arith.constant 0 : index
    %c0_60 = arith.constant 0 : index
    %52 = vector.load %arg17[%c0_57, %c0_58, %c0_59, %c0_60] : memref<1x2x1x32xf32, #tpu.memory_space<vmem>>, vector<1x1x1x32xf32>
    %53 = vector.shape_cast %52 : vector<1x1x1x32xf32> to vector<1x32xf32>
    %c0_61 = arith.constant 0 : index
    %c0_62 = arith.constant 0 : index
    %c0_63 = arith.constant 0 : index
    %c0_64 = arith.constant 0 : index
    %54 = vector.load %arg18[%c0_61, %c0_62, %c0_63, %c0_64] : memref<1x2x1x32xf32, #tpu.memory_space<vmem>>, vector<1x1x1x32xf32>
    %55 = vector.shape_cast %54 : vector<1x1x1x32xf32> to vector<1x32xf32>
    %cst_65 = arith.constant dense<0.000000e+00> : vector<16x96xf32>
    %56 = tpu.matmul %31, %33, %cst_65 {dimension_numbers = #tpu.dot_dimension_numbers<[1], [0], [0], [1], [0, 0, 1, 1], [], []>} : vector<16x32xf32>, vector<32x96xf32>, vector<16x96xf32> -> vector<16x96xf32>
    %57 = vector.broadcast %35 : vector<1x96xf32> to vector<16x96xf32>
    %58 = arith.addf %56, %57 : vector<16x96xf32>
    %59 = vector.extract_strided_slice %58 {offsets = [0, 0], sizes = [16, 32], strides = [1, 1]} : vector<16x96xf32> to vector<16x32xf32>
    %60 = vector.shape_cast %59 : vector<16x32xf32> to vector<2x1x8x32xf32>
    %61 = vector.shape_cast %0 : vector<4x32xf32> to vector<1x4x1x32xf32>
    %62 = vector.broadcast %60 : vector<2x1x8x32xf32> to vector<2x4x8x32xf32>
    %63 = vector.broadcast %61 : vector<1x4x1x32xf32> to vector<2x4x8x32xf32>
    %64 = arith.mulf %62, %63 : vector<2x4x8x32xf32>
    %65 = vector.shape_cast %64 : vector<2x4x8x32xf32> to vector<8x8x32xf32>
    %66 = vector.extract_strided_slice %58 {offsets = [0, 32], sizes = [16, 32], strides = [1, 1]} : vector<16x96xf32> to vector<16x32xf32>
    %67 = vector.shape_cast %66 : vector<16x32xf32> to vector<2x1x8x32xf32>
    %68 = vector.shape_cast %67 : vector<2x1x8x32xf32> to vector<2x1x8x32xf32>
    %69 = vector.broadcast %68 : vector<2x1x8x32xf32> to vector<2x4x8x32xf32>
    %70 = vector.shape_cast %69 : vector<2x4x8x32xf32> to vector<8x8x32xf32>
    %71 = vector.extract_strided_slice %58 {offsets = [0, 64], sizes = [16, 32], strides = [1, 1]} : vector<16x96xf32> to vector<16x32xf32>
    %72 = vector.shape_cast %71 : vector<16x32xf32> to vector<2x1x8x32xf32>
    %73 = vector.shape_cast %0 : vector<4x32xf32> to vector<1x4x1x32xf32>
    %74 = vector.broadcast %72 : vector<2x1x8x32xf32> to vector<2x4x8x32xf32>
    %75 = vector.broadcast %73 : vector<1x4x1x32xf32> to vector<2x4x8x32xf32>
    %76 = arith.mulf %74, %75 : vector<2x4x8x32xf32>
    %77 = vector.shape_cast %76 : vector<2x4x8x32xf32> to vector<8x8x32xf32>
    "tpu.trace_start"() <{level = 10 : i32, message = "nqd,nkd->nqk"}> : () -> ()
    %cst_66 = arith.constant dense<0.000000e+00> : vector<8x8x8xf32>
    %78 = tpu.matmul %65, %70, %cst_66 {dimension_numbers = #tpu.dot_dimension_numbers<[2], [2], [1], [1], [0, 0, 0, 1, 1, 1], [0], [0]>} : vector<8x8x32xf32>, vector<8x8x32xf32>, vector<8x8x8xf32> -> vector<8x8x8xf32>
    "tpu.trace_stop"() : () -> ()
    %cst_67 = arith.constant 0.353553385 : f32
    %79 = vector.broadcast %cst_67 : f32 to vector<8x8x8xf32>
    %80 = arith.mulf %78, %79 : vector<8x8x8xf32>
    %81 = arith.addf %80, %1 : vector<8x8x8xf32>
    %cst_68 = arith.constant dense<0xFF800000> : vector<8x8xf32>
    %82 = vector.multi_reduction <maximumf>, %81, %cst_68 [2] : vector<8x8x8xf32> to vector<8x8xf32>
    %83 = vector.shape_cast %82 : vector<8x8xf32> to vector<8x8x1xf32>
    %84 = vector.broadcast %83 : vector<8x8x1xf32> to vector<8x8x8xf32>
    %85 = arith.subf %81, %84 : vector<8x8x8xf32>
    %86 = math.exp %85 : vector<8x8x8xf32>
    %cst_69 = arith.constant dense<0.000000e+00> : vector<8x8xf32>
    %87 = vector.multi_reduction <add>, %86, %cst_69 [2] : vector<8x8x8xf32> to vector<8x8xf32>
    %88 = vector.shape_cast %87 : vector<8x8xf32> to vector<8x8x1xf32>
    %89 = tpu.reciprocal %88 {approx = true} : vector<8x8x1xf32> -> vector<8x8x1xf32>
    %90 = vector.broadcast %89 : vector<8x8x1xf32> to vector<8x8x8xf32>
    %91 = arith.mulf %86, %90 : vector<8x8x8xf32>
    "tpu.trace_start"() <{level = 10 : i32, message = "nqk,nkd->nqd"}> : () -> ()
    %cst_70 = arith.constant dense<0.000000e+00> : vector<8x8x32xf32>
    %92 = tpu.matmul %91, %77, %cst_70 {dimension_numbers = #tpu.dot_dimension_numbers<[2], [1], [1], [2], [0, 0, 0, 1, 1, 2], [0], [0]>} : vector<8x8x8xf32>, vector<8x8x32xf32>, vector<8x8x32xf32> -> vector<8x8x32xf32>
    "tpu.trace_stop"() : () -> ()
    %93 = vector.shape_cast %92 : vector<8x8x32xf32> to vector<2x4x8x32xf32>
    %cst_71 = arith.constant dense<0.000000e+00> : vector<2x8x32xf32>
    %94 = vector.multi_reduction <add>, %93, %cst_71 [1] : vector<2x4x8x32xf32> to vector<2x8x32xf32>
    %95 = vector.shape_cast %94 : vector<2x8x32xf32> to vector<16x32xf32>
    %cst_72 = arith.constant dense<0.000000e+00> : vector<16x32xf32>
    %96 = tpu.matmul %95, %37, %cst_72 {dimension_numbers = #tpu.dot_dimension_numbers<[1], [0], [0], [1], [0, 0, 1, 1], [], []>} : vector<16x32xf32>, vector<32x32xf32>, vector<16x32xf32> -> vector<16x32xf32>
    %97 = vector.broadcast %39 : vector<1x32xf32> to vector<16x32xf32>
    %98 = arith.addf %96, %97 : vector<16x32xf32>
    %99 = arith.addf %31, %98 : vector<16x32xf32>
    %cst_73 = arith.constant dense<0.000000e+00> : vector<16xf32>
    %100 = vector.multi_reduction <add>, %99, %cst_73 [1] : vector<16x32xf32> to vector<16xf32>
    %101 = vector.shape_cast %100 : vector<16xf32> to vector<16x1xf32>
    %cst_74 = arith.constant 3.200000e+01 : f32
    %102 = vector.broadcast %cst_74 : f32 to vector<16x1xf32>
    %103 = arith.divf %101, %102 : vector<16x1xf32>
    %104 = vector.broadcast %103 : vector<16x1xf32> to vector<16x32xf32>
    %105 = arith.subf %99, %104 : vector<16x32xf32>
    %106 = arith.mulf %105, %105 : vector<16x32xf32>
    %cst_75 = arith.constant dense<0.000000e+00> : vector<16xf32>
    %107 = vector.multi_reduction <add>, %106, %cst_75 [1] : vector<16x32xf32> to vector<16xf32>
    %108 = vector.shape_cast %107 : vector<16xf32> to vector<16x1xf32>
    %cst_76 = arith.constant 3.200000e+01 : f32
    %109 = vector.broadcast %cst_76 : f32 to vector<16x1xf32>
    %110 = arith.divf %108, %109 : vector<16x1xf32>
    %111 = vector.broadcast %103 : vector<16x1xf32> to vector<16x32xf32>
    %112 = arith.subf %99, %111 : vector<16x32xf32>
    %cst_77 = arith.constant 9.99999974E-6 : f32
    %113 = vector.broadcast %cst_77 : f32 to vector<16x1xf32>
    %114 = arith.addf %110, %113 : vector<16x1xf32>
    %115 = math.rsqrt %114 : vector<16x1xf32>
    %116 = vector.broadcast %115 : vector<16x1xf32> to vector<16x32xf32>
    %117 = arith.mulf %112, %116 : vector<16x32xf32>
    %118 = vector.broadcast %41 : vector<1x32xf32> to vector<16x32xf32>
    %119 = arith.mulf %117, %118 : vector<16x32xf32>
    %120 = vector.broadcast %43 : vector<1x32xf32> to vector<16x32xf32>
    %121 = arith.addf %119, %120 : vector<16x32xf32>
    %cst_78 = arith.constant dense<0.000000e+00> : vector<16x64xf32>
    %122 = tpu.matmul %121, %45, %cst_78 {dimension_numbers = #tpu.dot_dimension_numbers<[1], [0], [0], [1], [0, 0, 1, 1], [], []>} : vector<16x32xf32>, vector<32x64xf32>, vector<16x64xf32> -> vector<16x64xf32>
    %123 = vector.broadcast %47 : vector<1x64xf32> to vector<16x64xf32>
    %124 = arith.addf %122, %123 : vector<16x64xf32>
    %cst_79 = arith.constant 0.000000e+00 : f32
    %125 = vector.broadcast %cst_79 : f32 to vector<16x64xf32>
    %126 = arith.maximumf %124, %125 : vector<16x64xf32>
    %cst_80 = arith.constant dense<0.000000e+00> : vector<16x32xf32>
    %127 = tpu.matmul %126, %49, %cst_80 {dimension_numbers = #tpu.dot_dimension_numbers<[1], [0], [0], [1], [0, 0, 1, 1], [], []>} : vector<16x64xf32>, vector<64x32xf32>, vector<16x32xf32> -> vector<16x32xf32>
    %128 = vector.broadcast %51 : vector<1x32xf32> to vector<16x32xf32>
    %129 = arith.addf %127, %128 : vector<16x32xf32>
    %130 = arith.addf %121, %129 : vector<16x32xf32>
    %cst_81 = arith.constant dense<0.000000e+00> : vector<16xf32>
    %131 = vector.multi_reduction <add>, %130, %cst_81 [1] : vector<16x32xf32> to vector<16xf32>
    %132 = vector.shape_cast %131 : vector<16xf32> to vector<16x1xf32>
    %cst_82 = arith.constant 3.200000e+01 : f32
    %133 = vector.broadcast %cst_82 : f32 to vector<16x1xf32>
    %134 = arith.divf %132, %133 : vector<16x1xf32>
    %135 = vector.broadcast %134 : vector<16x1xf32> to vector<16x32xf32>
    %136 = arith.subf %130, %135 : vector<16x32xf32>
    %137 = arith.mulf %136, %136 : vector<16x32xf32>
    %cst_83 = arith.constant dense<0.000000e+00> : vector<16xf32>
    %138 = vector.multi_reduction <add>, %137, %cst_83 [1] : vector<16x32xf32> to vector<16xf32>
    %139 = vector.shape_cast %138 : vector<16xf32> to vector<16x1xf32>
    %cst_84 = arith.constant 3.200000e+01 : f32
    %140 = vector.broadcast %cst_84 : f32 to vector<16x1xf32>
    %141 = arith.divf %139, %140 : vector<16x1xf32>
    %142 = vector.broadcast %134 : vector<16x1xf32> to vector<16x32xf32>
    %143 = arith.subf %130, %142 : vector<16x32xf32>
    %cst_85 = arith.constant 9.99999974E-6 : f32
    %144 = vector.broadcast %cst_85 : f32 to vector<16x1xf32>
    %145 = arith.addf %141, %144 : vector<16x1xf32>
    %146 = math.rsqrt %145 : vector<16x1xf32>
    %147 = vector.broadcast %146 : vector<16x1xf32> to vector<16x32xf32>
    %148 = arith.mulf %143, %147 : vector<16x32xf32>
    %149 = vector.broadcast %53 : vector<1x32xf32> to vector<16x32xf32>
    %150 = arith.mulf %148, %149 : vector<16x32xf32>
    %151 = vector.broadcast %55 : vector<1x32xf32> to vector<16x32xf32>
    %152 = arith.addf %150, %151 : vector<16x32xf32>
    %c0_86 = arith.constant 0 : index
    %c1 = arith.constant 1 : index
    %c0_87 = arith.constant 0 : index
    %c0_88 = arith.constant 0 : index
    %153 = vector.load %arg7[%c0_86, %c1, %c0_87, %c0_88] : memref<1x2x32x96xf32, #tpu.memory_space<vmem>>, vector<1x1x32x96xf32>
    %154 = vector.shape_cast %153 : vector<1x1x32x96xf32> to vector<32x96xf32>
    %c0_89 = arith.constant 0 : index
    %c1_90 = arith.constant 1 : index
    %c0_91 = arith.constant 0 : index
    %c0_92 = arith.constant 0 : index
    %155 = vector.load %arg8[%c0_89, %c1_90, %c0_91, %c0_92] : memref<1x2x1x96xf32, #tpu.memory_space<vmem>>, vector<1x1x1x96xf32>
    %156 = vector.shape_cast %155 : vector<1x1x1x96xf32> to vector<1x96xf32>
    %c0_93 = arith.constant 0 : index
    %c1_94 = arith.constant 1 : index
    %c0_95 = arith.constant 0 : index
    %c0_96 = arith.constant 0 : index
    %157 = vector.load %arg9[%c0_93, %c1_94, %c0_95, %c0_96] : memref<1x2x32x32xf32, #tpu.memory_space<vmem>>, vector<1x1x32x32xf32>
    %158 = vector.shape_cast %157 : vector<1x1x32x32xf32> to vector<32x32xf32>
    %c0_97 = arith.constant 0 : index
    %c1_98 = arith.constant 1 : index
    %c0_99 = arith.constant 0 : index
    %c0_100 = arith.constant 0 : index
    %159 = vector.load %arg10[%c0_97, %c1_98, %c0_99, %c0_100] : memref<1x2x1x32xf32, #tpu.memory_space<vmem>>, vector<1x1x1x32xf32>
    %160 = vector.shape_cast %159 : vector<1x1x1x32xf32> to vector<1x32xf32>
    %c0_101 = arith.constant 0 : index
    %c1_102 = arith.constant 1 : index
    %c0_103 = arith.constant 0 : index
    %c0_104 = arith.constant 0 : index
    %161 = vector.load %arg11[%c0_101, %c1_102, %c0_103, %c0_104] : memref<1x2x1x32xf32, #tpu.memory_space<vmem>>, vector<1x1x1x32xf32>
    %162 = vector.shape_cast %161 : vector<1x1x1x32xf32> to vector<1x32xf32>
    %c0_105 = arith.constant 0 : index
    %c1_106 = arith.constant 1 : index
    %c0_107 = arith.constant 0 : index
    %c0_108 = arith.constant 0 : index
    %163 = vector.load %arg12[%c0_105, %c1_106, %c0_107, %c0_108] : memref<1x2x1x32xf32, #tpu.memory_space<vmem>>, vector<1x1x1x32xf32>
    %164 = vector.shape_cast %163 : vector<1x1x1x32xf32> to vector<1x32xf32>
    %c0_109 = arith.constant 0 : index
    %c1_110 = arith.constant 1 : index
    %c0_111 = arith.constant 0 : index
    %c0_112 = arith.constant 0 : index
    %165 = vector.load %arg13[%c0_109, %c1_110, %c0_111, %c0_112] : memref<1x2x32x64xf32, #tpu.memory_space<vmem>>, vector<1x1x32x64xf32>
    %166 = vector.shape_cast %165 : vector<1x1x32x64xf32> to vector<32x64xf32>
    %c0_113 = arith.constant 0 : index
    %c1_114 = arith.constant 1 : index
    %c0_115 = arith.constant 0 : index
    %c0_116 = arith.constant 0 : index
    %167 = vector.load %arg14[%c0_113, %c1_114, %c0_115, %c0_116] : memref<1x2x1x64xf32, #tpu.memory_space<vmem>>, vector<1x1x1x64xf32>
    %168 = vector.shape_cast %167 : vector<1x1x1x64xf32> to vector<1x64xf32>
    %c0_117 = arith.constant 0 : index
    %c1_118 = arith.constant 1 : index
    %c0_119 = arith.constant 0 : index
    %c0_120 = arith.constant 0 : index
    %169 = vector.load %arg15[%c0_117, %c1_118, %c0_119, %c0_120] : memref<1x2x64x32xf32, #tpu.memory_space<vmem>>, vector<1x1x64x32xf32>
    %170 = vector.shape_cast %169 : vector<1x1x64x32xf32> to vector<64x32xf32>
    %c0_121 = arith.constant 0 : index
    %c1_122 = arith.constant 1 : index
    %c0_123 = arith.constant 0 : index
    %c0_124 = arith.constant 0 : index
    %171 = vector.load %arg16[%c0_121, %c1_122, %c0_123, %c0_124] : memref<1x2x1x32xf32, #tpu.memory_space<vmem>>, vector<1x1x1x32xf32>
    %172 = vector.shape_cast %171 : vector<1x1x1x32xf32> to vector<1x32xf32>
    %c0_125 = arith.constant 0 : index
    %c1_126 = arith.constant 1 : index
    %c0_127 = arith.constant 0 : index
    %c0_128 = arith.constant 0 : index
    %173 = vector.load %arg17[%c0_125, %c1_126, %c0_127, %c0_128] : memref<1x2x1x32xf32, #tpu.memory_space<vmem>>, vector<1x1x1x32xf32>
    %174 = vector.shape_cast %173 : vector<1x1x1x32xf32> to vector<1x32xf32>
    %c0_129 = arith.constant 0 : index
    %c1_130 = arith.constant 1 : index
    %c0_131 = arith.constant 0 : index
    %c0_132 = arith.constant 0 : index
    %175 = vector.load %arg18[%c0_129, %c1_130, %c0_131, %c0_132] : memref<1x2x1x32xf32, #tpu.memory_space<vmem>>, vector<1x1x1x32xf32>
    %176 = vector.shape_cast %175 : vector<1x1x1x32xf32> to vector<1x32xf32>
    %cst_133 = arith.constant dense<0.000000e+00> : vector<16x96xf32>
    %177 = tpu.matmul %152, %154, %cst_133 {dimension_numbers = #tpu.dot_dimension_numbers<[1], [0], [0], [1], [0, 0, 1, 1], [], []>} : vector<16x32xf32>, vector<32x96xf32>, vector<16x96xf32> -> vector<16x96xf32>
    %178 = vector.broadcast %156 : vector<1x96xf32> to vector<16x96xf32>
    %179 = arith.addf %177, %178 : vector<16x96xf32>
    %180 = vector.extract_strided_slice %179 {offsets = [0, 0], sizes = [16, 32], strides = [1, 1]} : vector<16x96xf32> to vector<16x32xf32>
    %181 = vector.shape_cast %180 : vector<16x32xf32> to vector<2x1x8x32xf32>
    %182 = vector.shape_cast %0 : vector<4x32xf32> to vector<1x4x1x32xf32>
    %183 = vector.broadcast %181 : vector<2x1x8x32xf32> to vector<2x4x8x32xf32>
    %184 = vector.broadcast %182 : vector<1x4x1x32xf32> to vector<2x4x8x32xf32>
    %185 = arith.mulf %183, %184 : vector<2x4x8x32xf32>
    %186 = vector.shape_cast %185 : vector<2x4x8x32xf32> to vector<8x8x32xf32>
    %187 = vector.extract_strided_slice %179 {offsets = [0, 32], sizes = [16, 32], strides = [1, 1]} : vector<16x96xf32> to vector<16x32xf32>
    %188 = vector.shape_cast %187 : vector<16x32xf32> to vector<2x1x8x32xf32>
    %189 = vector.shape_cast %188 : vector<2x1x8x32xf32> to vector<2x1x8x32xf32>
    %190 = vector.broadcast %189 : vector<2x1x8x32xf32> to vector<2x4x8x32xf32>
    %191 = vector.shape_cast %190 : vector<2x4x8x32xf32> to vector<8x8x32xf32>
    %192 = vector.extract_strided_slice %179 {offsets = [0, 64], sizes = [16, 32], strides = [1, 1]} : vector<16x96xf32> to vector<16x32xf32>
    %193 = vector.shape_cast %192 : vector<16x32xf32> to vector<2x1x8x32xf32>
    %194 = vector.shape_cast %0 : vector<4x32xf32> to vector<1x4x1x32xf32>
    %195 = vector.broadcast %193 : vector<2x1x8x32xf32> to vector<2x4x8x32xf32>
    %196 = vector.broadcast %194 : vector<1x4x1x32xf32> to vector<2x4x8x32xf32>
    %197 = arith.mulf %195, %196 : vector<2x4x8x32xf32>
    %198 = vector.shape_cast %197 : vector<2x4x8x32xf32> to vector<8x8x32xf32>
    "tpu.trace_start"() <{level = 10 : i32, message = "nqd,nkd->nqk"}> : () -> ()
    %cst_134 = arith.constant dense<0.000000e+00> : vector<8x8x8xf32>
    %199 = tpu.matmul %186, %191, %cst_134 {dimension_numbers = #tpu.dot_dimension_numbers<[2], [2], [1], [1], [0, 0, 0, 1, 1, 1], [0], [0]>} : vector<8x8x32xf32>, vector<8x8x32xf32>, vector<8x8x8xf32> -> vector<8x8x8xf32>
    "tpu.trace_stop"() : () -> ()
    %cst_135 = arith.constant 0.353553385 : f32
    %200 = vector.broadcast %cst_135 : f32 to vector<8x8x8xf32>
    %201 = arith.mulf %199, %200 : vector<8x8x8xf32>
    %202 = arith.addf %201, %1 : vector<8x8x8xf32>
    %cst_136 = arith.constant dense<0xFF800000> : vector<8x8xf32>
    %203 = vector.multi_reduction <maximumf>, %202, %cst_136 [2] : vector<8x8x8xf32> to vector<8x8xf32>
    %204 = vector.shape_cast %203 : vector<8x8xf32> to vector<8x8x1xf32>
    %205 = vector.broadcast %204 : vector<8x8x1xf32> to vector<8x8x8xf32>
    %206 = arith.subf %202, %205 : vector<8x8x8xf32>
    %207 = math.exp %206 : vector<8x8x8xf32>
    %cst_137 = arith.constant dense<0.000000e+00> : vector<8x8xf32>
    %208 = vector.multi_reduction <add>, %207, %cst_137 [2] : vector<8x8x8xf32> to vector<8x8xf32>
    %209 = vector.shape_cast %208 : vector<8x8xf32> to vector<8x8x1xf32>
    %210 = tpu.reciprocal %209 {approx = true} : vector<8x8x1xf32> -> vector<8x8x1xf32>
    %211 = vector.broadcast %210 : vector<8x8x1xf32> to vector<8x8x8xf32>
    %212 = arith.mulf %207, %211 : vector<8x8x8xf32>
    "tpu.trace_start"() <{level = 10 : i32, message = "nqk,nkd->nqd"}> : () -> ()
    %cst_138 = arith.constant dense<0.000000e+00> : vector<8x8x32xf32>
    %213 = tpu.matmul %212, %198, %cst_138 {dimension_numbers = #tpu.dot_dimension_numbers<[2], [1], [1], [2], [0, 0, 0, 1, 1, 2], [0], [0]>} : vector<8x8x8xf32>, vector<8x8x32xf32>, vector<8x8x32xf32> -> vector<8x8x32xf32>
    "tpu.trace_stop"() : () -> ()
    %214 = vector.shape_cast %213 : vector<8x8x32xf32> to vector<2x4x8x32xf32>
    %cst_139 = arith.constant dense<0.000000e+00> : vector<2x8x32xf32>
    %215 = vector.multi_reduction <add>, %214, %cst_139 [1] : vector<2x4x8x32xf32> to vector<2x8x32xf32>
    %216 = vector.shape_cast %215 : vector<2x8x32xf32> to vector<16x32xf32>
    %cst_140 = arith.constant dense<0.000000e+00> : vector<16x32xf32>
    %217 = tpu.matmul %216, %158, %cst_140 {dimension_numbers = #tpu.dot_dimension_numbers<[1], [0], [0], [1], [0, 0, 1, 1], [], []>} : vector<16x32xf32>, vector<32x32xf32>, vector<16x32xf32> -> vector<16x32xf32>
    %218 = vector.broadcast %160 : vector<1x32xf32> to vector<16x32xf32>
    %219 = arith.addf %217, %218 : vector<16x32xf32>
    %220 = arith.addf %152, %219 : vector<16x32xf32>
    %cst_141 = arith.constant dense<0.000000e+00> : vector<16xf32>
    %221 = vector.multi_reduction <add>, %220, %cst_141 [1] : vector<16x32xf32> to vector<16xf32>
    %222 = vector.shape_cast %221 : vector<16xf32> to vector<16x1xf32>
    %cst_142 = arith.constant 3.200000e+01 : f32
    %223 = vector.broadcast %cst_142 : f32 to vector<16x1xf32>
    %224 = arith.divf %222, %223 : vector<16x1xf32>
    %225 = vector.broadcast %224 : vector<16x1xf32> to vector<16x32xf32>
    %226 = arith.subf %220, %225 : vector<16x32xf32>
    %227 = arith.mulf %226, %226 : vector<16x32xf32>
    %cst_143 = arith.constant dense<0.000000e+00> : vector<16xf32>
    %228 = vector.multi_reduction <add>, %227, %cst_143 [1] : vector<16x32xf32> to vector<16xf32>
    %229 = vector.shape_cast %228 : vector<16xf32> to vector<16x1xf32>
    %cst_144 = arith.constant 3.200000e+01 : f32
    %230 = vector.broadcast %cst_144 : f32 to vector<16x1xf32>
    %231 = arith.divf %229, %230 : vector<16x1xf32>
    %232 = vector.broadcast %224 : vector<16x1xf32> to vector<16x32xf32>
    %233 = arith.subf %220, %232 : vector<16x32xf32>
    %cst_145 = arith.constant 9.99999974E-6 : f32
    %234 = vector.broadcast %cst_145 : f32 to vector<16x1xf32>
    %235 = arith.addf %231, %234 : vector<16x1xf32>
    %236 = math.rsqrt %235 : vector<16x1xf32>
    %237 = vector.broadcast %236 : vector<16x1xf32> to vector<16x32xf32>
    %238 = arith.mulf %233, %237 : vector<16x32xf32>
    %239 = vector.broadcast %162 : vector<1x32xf32> to vector<16x32xf32>
    %240 = arith.mulf %238, %239 : vector<16x32xf32>
    %241 = vector.broadcast %164 : vector<1x32xf32> to vector<16x32xf32>
    %242 = arith.addf %240, %241 : vector<16x32xf32>
    %cst_146 = arith.constant dense<0.000000e+00> : vector<16x64xf32>
    %243 = tpu.matmul %242, %166, %cst_146 {dimension_numbers = #tpu.dot_dimension_numbers<[1], [0], [0], [1], [0, 0, 1, 1], [], []>} : vector<16x32xf32>, vector<32x64xf32>, vector<16x64xf32> -> vector<16x64xf32>
    %244 = vector.broadcast %168 : vector<1x64xf32> to vector<16x64xf32>
    %245 = arith.addf %243, %244 : vector<16x64xf32>
    %cst_147 = arith.constant 0.000000e+00 : f32
    %246 = vector.broadcast %cst_147 : f32 to vector<16x64xf32>
    %247 = arith.maximumf %245, %246 : vector<16x64xf32>
    %cst_148 = arith.constant dense<0.000000e+00> : vector<16x32xf32>
    %248 = tpu.matmul %247, %170, %cst_148 {dimension_numbers = #tpu.dot_dimension_numbers<[1], [0], [0], [1], [0, 0, 1, 1], [], []>} : vector<16x64xf32>, vector<64x32xf32>, vector<16x32xf32> -> vector<16x32xf32>
    %249 = vector.broadcast %172 : vector<1x32xf32> to vector<16x32xf32>
    %250 = arith.addf %248, %249 : vector<16x32xf32>
    %251 = arith.addf %242, %250 : vector<16x32xf32>
    %cst_149 = arith.constant dense<0.000000e+00> : vector<16xf32>
    %252 = vector.multi_reduction <add>, %251, %cst_149 [1] : vector<16x32xf32> to vector<16xf32>
    %253 = vector.shape_cast %252 : vector<16xf32> to vector<16x1xf32>
    %cst_150 = arith.constant 3.200000e+01 : f32
    %254 = vector.broadcast %cst_150 : f32 to vector<16x1xf32>
    %255 = arith.divf %253, %254 : vector<16x1xf32>
    %256 = vector.broadcast %255 : vector<16x1xf32> to vector<16x32xf32>
    %257 = arith.subf %251, %256 : vector<16x32xf32>
    %258 = arith.mulf %257, %257 : vector<16x32xf32>
    %cst_151 = arith.constant dense<0.000000e+00> : vector<16xf32>
    %259 = vector.multi_reduction <add>, %258, %cst_151 [1] : vector<16x32xf32> to vector<16xf32>
    %260 = vector.shape_cast %259 : vector<16xf32> to vector<16x1xf32>
    %cst_152 = arith.constant 3.200000e+01 : f32
    %261 = vector.broadcast %cst_152 : f32 to vector<16x1xf32>
    %262 = arith.divf %260, %261 : vector<16x1xf32>
    %263 = vector.broadcast %255 : vector<16x1xf32> to vector<16x32xf32>
    %264 = arith.subf %251, %263 : vector<16x32xf32>
    %cst_153 = arith.constant 9.99999974E-6 : f32
    %265 = vector.broadcast %cst_153 : f32 to vector<16x1xf32>
    %266 = arith.addf %262, %265 : vector<16x1xf32>
    %267 = math.rsqrt %266 : vector<16x1xf32>
    %268 = vector.broadcast %267 : vector<16x1xf32> to vector<16x32xf32>
    %269 = arith.mulf %264, %268 : vector<16x32xf32>
    %270 = vector.broadcast %174 : vector<1x32xf32> to vector<16x32xf32>
    %271 = arith.mulf %269, %270 : vector<16x32xf32>
    %272 = vector.broadcast %176 : vector<1x32xf32> to vector<16x32xf32>
    %273 = arith.addf %271, %272 : vector<16x32xf32>
    %274 = vector.shape_cast %273 : vector<16x32xf32> to vector<2x8x32xf32>
    %275 = vector.extract_strided_slice %274 {offsets = [0, 0, 0], sizes = [2, 1, 32], strides = [1, 1, 1]} : vector<2x8x32xf32> to vector<2x1x32xf32>
    %276 = vector.shape_cast %275 : vector<2x1x32xf32> to vector<2x32xf32>
    %c0_154 = arith.constant 0 : index
    %c0_155 = arith.constant 0 : index
    %c0_156 = arith.constant 0 : index
    %277 = vector.load %arg19[%c0_154, %c0_155, %c0_156] : memref<1x2x32xf32, #tpu.memory_space<vmem>>, vector<1x2x32xf32>
    %278 = vector.shape_cast %277 : vector<1x2x32xf32> to vector<2x32xf32>
    %279 = vector.shape_cast %276 : vector<2x32xf32> to vector<1x2x32xf32>
    tpu.vector_store %arg19[%c0_154, %c0_155, %c0_156], %279 {strides = array<i32>} : memref<1x2x32xf32, #tpu.memory_space<vmem>>, vector<1x2x32xf32>,
    return
  }
  func.func @transform_0(%arg0: i32) -> (i32, i32, i32) {
    %c0_i32 = arith.constant 0 : i32
    %c0_i32_0 = arith.constant 0 : i32
    %c0_i32_1 = arith.constant 0 : i32
    %c0_i32_2 = arith.constant 0 : i32
    return %c0_i32, %c0_i32_0, %c0_i32_1 : i32, i32, i32
  }
  func.func @transform_1(%arg0: i32) -> (i32, i32) {
    %c0_i32 = arith.constant 0 : i32
    %c0_i32_0 = arith.constant 0 : i32
    %c0_i32_1 = arith.constant 0 : i32
    return %c0_i32, %c0_i32_0 : i32, i32
  }
  func.func @transform_2(%arg0: i32) -> (i32, i32) {
    %c0_i32 = arith.constant 0 : i32
    %c0_i32_0 = arith.constant 0 : i32
    %c0_i32_1 = arith.constant 0 : i32
    return %c0_i32, %c0_i32_0 : i32, i32
  }
  func.func @transform_3(%arg0: i32) -> (i32, i32) {
    %c0_i32 = arith.constant 0 : i32
    %c0_i32_0 = arith.constant 0 : i32
    %c0_i32_1 = arith.constant 0 : i32
    return %c0_i32, %c0_i32_0 : i32, i32
  }
  func.func @transform_4(%arg0: i32) -> (i32, i32, i32) {
    %c0_i32 = arith.constant 0 : i32
    %c0_i32_0 = arith.constant 0 : i32
    %c0_i32_1 = arith.constant 0 : i32
    %c0_i32_2 = arith.constant 0 : i32
    return %c0_i32, %c0_i32_0, %c0_i32_1 : i32, i32, i32
  }
  func.func @transform_5(%arg0: i32) -> (i32, i32) {
    %c0_i32 = arith.constant 0 : i32
    %c0_i32_0 = arith.constant 0 : i32
    %c0_i32_1 = arith.constant 0 : i32
    return %c0_i32, %c0_i32_0 : i32, i32
  }
  func.func @transform_6(%arg0: i32) -> (i32, i32, i32, i32) {
    %c0_i32 = arith.constant 0 : i32
    %c0_i32_0 = arith.constant 0 : i32
    %c0_i32_1 = arith.constant 0 : i32
    %c0_i32_2 = arith.constant 0 : i32
    return %arg0, %c0_i32, %c0_i32_0, %c0_i32_1 : i32, i32, i32, i32
  }
  func.func @transform_7(%arg0: i32) -> (i32, i32, i32, i32) {
    %c0_i32 = arith.constant 0 : i32
    %c0_i32_0 = arith.constant 0 : i32
    %c0_i32_1 = arith.constant 0 : i32
    %c0_i32_2 = arith.constant 0 : i32
    return %arg0, %c0_i32, %c0_i32_0, %c0_i32_1 : i32, i32, i32, i32
  }
  func.func @transform_8(%arg0: i32) -> (i32, i32, i32, i32) {
    %c0_i32 = arith.constant 0 : i32
    %c0_i32_0 = arith.constant 0 : i32
    %c0_i32_1 = arith.constant 0 : i32
    %c0_i32_2 = arith.constant 0 : i32
    return %arg0, %c0_i32, %c0_i32_0, %c0_i32_1 : i32, i32, i32, i32
  }
  func.func @transform_9(%arg0: i32) -> (i32, i32, i32, i32) {
    %c0_i32 = arith.constant 0 : i32
    %c0_i32_0 = arith.constant 0 : i32
    %c0_i32_1 = arith.constant 0 : i32
    %c0_i32_2 = arith.constant 0 : i32
    return %arg0, %c0_i32, %c0_i32_0, %c0_i32_1 : i32, i32, i32, i32
  }
  func.func @transform_10(%arg0: i32) -> (i32, i32, i32, i32) {
    %c0_i32 = arith.constant 0 : i32
    %c0_i32_0 = arith.constant 0 : i32
    %c0_i32_1 = arith.constant 0 : i32
    %c0_i32_2 = arith.constant 0 : i32
    return %arg0, %c0_i32, %c0_i32_0, %c0_i32_1 : i32, i32, i32, i32
  }
  func.func @transform_11(%arg0: i32) -> (i32, i32, i32, i32) {
    %c0_i32 = arith.constant 0 : i32
    %c0_i32_0 = arith.constant 0 : i32
    %c0_i32_1 = arith.constant 0 : i32
    %c0_i32_2 = arith.constant 0 : i32
    return %arg0, %c0_i32, %c0_i32_0, %c0_i32_1 : i32, i32, i32, i32
  }
  func.func @transform_12(%arg0: i32) -> (i32, i32, i32, i32) {
    %c0_i32 = arith.constant 0 : i32
    %c0_i32_0 = arith.constant 0 : i32
    %c0_i32_1 = arith.constant 0 : i32
    %c0_i32_2 = arith.constant 0 : i32
    return %arg0, %c0_i32, %c0_i32_0, %c0_i32_1 : i32, i32, i32, i32
  }
  func.func @transform_13(%arg0: i32) -> (i32, i32, i32, i32) {
    %c0_i32 = arith.constant 0 : i32
    %c0_i32_0 = arith.constant 0 : i32
    %c0_i32_1 = arith.constant 0 : i32
    %c0_i32_2 = arith.constant 0 : i32
    return %arg0, %c0_i32, %c0_i32_0, %c0_i32_1 : i32, i32, i32, i32
  }
  func.func @transform_14(%arg0: i32) -> (i32, i32, i32, i32) {
    %c0_i32 = arith.constant 0 : i32
    %c0_i32_0 = arith.constant 0 : i32
    %c0_i32_1 = arith.constant 0 : i32
    %c0_i32_2 = arith.constant 0 : i32
    return %arg0, %c0_i32, %c0_i32_0, %c0_i32_1 : i32, i32, i32, i32
  }
  func.func @transform_15(%arg0: i32) -> (i32, i32, i32, i32) {
    %c0_i32 = arith.constant 0 : i32
    %c0_i32_0 = arith.constant 0 : i32
    %c0_i32_1 = arith.constant 0 : i32
    %c0_i32_2 = arith.constant 0 : i32
    return %arg0, %c0_i32, %c0_i32_0, %c0_i32_1 : i32, i32, i32, i32
  }
  func.func @transform_16(%arg0: i32) -> (i32, i32, i32, i32) {
    %c0_i32 = arith.constant 0 : i32
    %c0_i32_0 = arith.constant 0 : i32
    %c0_i32_1 = arith.constant 0 : i32
    %c0_i32_2 = arith.constant 0 : i32
    return %arg0, %c0_i32, %c0_i32_0, %c0_i32_1 : i32, i32, i32, i32
  }
  func.func @transform_17(%arg0: i32) -> (i32, i32, i32, i32) {
    %c0_i32 = arith.constant 0 : i32
    %c0_i32_0 = arith.constant 0 : i32
    %c0_i32_1 = arith.constant 0 : i32
    %c0_i32_2 = arith.constant 0 : i32
    return %arg0, %c0_i32, %c0_i32_0, %c0_i32_1 : i32, i32, i32, i32
  }
  func.func @transform_18(%arg0: i32) -> (i32, i32, i32) {
    %c0_i32 = arith.constant 0 : i32
    %c0_i32_0 = arith.constant 0 : i32
    %c0_i32_1 = arith.constant 0 : i32
    return %arg0, %c0_i32, %c0_i32_0 : i32, i32, i32
  }
}

</mosaic_0001>

<bundles_post_ra>
// kernel: _forward.5
= control target key start
LH: loop header
LB: loop body
LE: loop exit
PB: predicated region body
PF: predicated region fallthrough
CT: control target
= control target key end

     0   :  { %19 = vsyncpa [#allocation3], 0  ;;  %s1330_s0 = inlined_call_operand.vmem [shape: f32[2,2,32], index: 0, kind: input, shape index: {}]   ;;  %s1331_s1 = inlined_call_operand.vmem [shape: f32[2,32], index: 1, kind: input, shape index: {}]   ;;  %s1332_s2 = inlined_call_operand.vmem [shape: f32[2,32], index: 2, kind: input, shape index: {}]   ;;  %s1333_s3 = inlined_call_operand.vmem [shape: f32[2,2], index: 3, kind: input, shape index: {}]   ;;  %s1334_s4 = inlined_call_operand.vmem [shape: f32[32,32], index: 4, kind: input, shape index: {}]   ;;  %s1335_s5 = inlined_call_operand.vmem [shape: f32[32,32], index: 5, kind: input, shape index: {}]   ;;  %s1336_s6 = inlined_call_operand.vmem [shape: f32[32,3], index: 6, kind: input, shape index: {}]   ;;  %s1337_s7 = inlined_call_operand.vmem [shape: f32[1,3], index: 7, kind: input, shape index: {}]   ;;  %s1338_s8 = inlined_call_operand.vmem [shape: f32[2,32,2], index: 8, kind: input, shape index: {}]   ;;  %s1339_s9 = inlined_call_operand.vmem [shape: f32[2,1,2], index: 9, kind: input, shape index: {}]   ;;  %s1340_s10 = inlined_call_operand.hbm [shape: f32[2,2], index: 10, kind: output, shape index: {0}]   ;;  %s1341_s11 = inlined_call_operand.hbm [shape: f32[2,3], index: 11, kind: output, shape index: {1}]   ;;  %s1342_s12 = inlined_call_operand.hbm [shape: f32[2,3], index: 12, kind: output, shape index: {2}]   ;;  %s1343_s13 = inlined_call_operand.hbm [shape: f32[2,2,2], index: 13, kind: output, shape index: {3}]  }
   0x1   :  { %20 = vsyncpa [#allocation5], 0  ;;  %v43_v0 = vld [vmem:[%s1334_s4] sm:$0xff]  ;;  %v44_v1 = vld [vmem:[%s1334_s4 + $0x8] sm:$0xff]  ;;  %v1055_v3 = vmov 0.0|0.0   ;;  %vm1056_vm0 = vmmov 0  }
   0x2   :  { %v124_v2 = vld [vmem:[%s1338_s8] sm:$0xff]  ;;  %887 = vmatprep.subr.bf16.mxu0 %v1055_v3  ;;  %893 = vmatprep.subr.bf16.mxu1 %v1055_v3  ;;  %v888_v4 = vpack.c.bf16 %v44_v1, %v43_v0  ;;  %v125_v5 = vld [vmem:[%s1338_s8 + $0x8] sm:$0xff]  ;;  %v45_v6 = vld [vmem:[%s1334_s4 + $0x10] sm:$0xff]  ;;  %v1057_v11 = vmov 0.0  }
   0x3   :  { %v46_v7 = vld [vmem:[%s1334_s4 + $0x18] sm:$0xff]  ;;  %v894_v8 = vpack.c.bf16 %v125_v5, %v124_v2  ;;  %v126_v9 = vld [vmem:[%s1338_s8 + $0x10] sm:$0xff]  ;;  %818 = vmatprep.mubr.msk.f32.mxu0 %vm1056_vm0, %v1057_v11  ;;  %829 = vmatprep.mubr.msk.f32.mxu1 %vm1056_vm0, %v1057_v11  ;;  %v210_v14 = vld [vmem:[%s1335_s5] sm:$0xff] }
   0x4   :  { %v127_v10 = vld [vmem:[%s1338_s8 + $0x18] sm:$0xff]  ;;  %889 = vmatpush3.bf16.msra.mxu0 %v888_v4  ;;  %v891_v12 = vpack.c.bf16 %v46_v7, %v45_v6  ;;  %v211_v15 = vld [vmem:[%s1335_s5 + $0x8] sm:$0xff]  ;;  %v764_v16 = vld [vmem:[%s1338_s8 + $0x20] sm:$0xff] }
   0x5   :  { %895 = vmatpush3.bf16.msra.mxu1 %v894_v8  ;;  %890 = vmatprep.subr.bf16.mxu0 %v1055_v3  ;;  %v897_v13 = vpack.c.bf16 %v127_v10, %v126_v9  ;;  %v765_v17 = vld [vmem:[%s1338_s8 + $0x28] sm:$0xff] }
   0x6   :  { %896 = vmatprep.subr.bf16.mxu1 %v1055_v3 }
   0x7   :  { %21 = vsyncpa [#allocation8], 0  ;;  %v42_v18 = vld [vmem:[%s1331_s1] sm:$0x3]  ;;  %vm47_vm1 = vcmask 261120   ;;  %v900_v19 = vpack.c.bf16 %v211_v15, %v210_v14  ;;  %v906_v21 = vpack.c.bf16 %v765_v17, %v764_v16  ;;  %v212_v22 = vld [vmem:[%s1335_s5 + $0x10] sm:$0xff]  ;;  %v121_v54 = vlaneseq }
   0x8   :  { %892 = vmatpush3.bf16.msra.mxu0 %v891_v12  ;;  %v123_v20 = vld [vmem:[%s1330_s0] sm:$0x3]  ;;  %v213_v23 = vld [vmem:[%s1335_s5 + $0x18] sm:$0xff]  ;;  %v766_v24 = vld [vmem:[%s1338_s8 + $0x30] sm:$0xff]  ;;  %vm208_vm2 = vcmask 9216   ;;  %vm285_vm3 = vcmask 254976  }
   0x9   :  { %898 = vmatpush3.bf16.msra.mxu1 %v897_v13  ;;  %899 = vmatprep.subr.bf16.mxu0 %v1055_v3  ;;  %v767_v25 = vld [vmem:[%s1338_s8 + $0x38] sm:$0xff]  ;;  %v903_v26 = vpack.c.bf16 %v213_v23, %v212_v22  ;;  %v763_v28 = vld [vmem:[%s1330_s0 + $0x2] sm:$0x3]  ;;  %v760_v29 = vld [vmem:[%s1339_s9] ss:$0 sm:$0xff]  ;;  %v122_v55 = vand.u32 127, %v121_v54 }
   0xa   :  { %905 = vmatprep.subr.bf16.mxu1 %v1055_v3  ;;  %v909_v27 = vpack.c.bf16 %v767_v25, %v766_v24  ;;  %v769_v35 = vld [vmem:[%s1339_s9 + $0x1] ss:$0 sm:$0xff]  ;;  %vm583_vm7 = vcmask 17408   ;;  %v618_v17 = vld [vmem:[%s1336_s6 + $0x8] sm:$0xff]  ;;  %s1061_s20 = smov [#allocation4]  }
   0xb   :  { %819 = vmatmul.mubr.msk.f32.vlgmr.msra.gmra.mrb[0].mxu0 %vm47_vm1, %v42_v18  ;;  %v491_v51 = vld [vmem:[%s1333_s3] sm:$0x3]  ;;  %vm290_vm4 = vcmp.eq.s32.totalorder %v122_v55, 0  ;;  %vm475_vm5 = vcmp.eq.s32.totalorder %v122_v55, 1  ;;  %vm567_vm6 = vcmp.eq.s32.totalorder %v122_v55, 2  ;;  %s718_s21 = sshll.u32 %s1061_s20, 4  ;;  %s719_s21 = int_to_ptr.vmem [resolvable:$true] %s718_s21 }
   0xc   :  { %830 = vmatmul.mubr.msk.f32.vlgmr.msra.gmra.mrb[0].mxu1 %vm47_vm1, %v123_v20  ;;  %901 = vmatpush3.bf16.msra.mxu0 %v900_v19  ;;  %v572_v53 = vsel %vm208_vm2, %v491_v51, -inf  ;;  %v617_v16 = vld [vmem:[%s1336_s6] sm:$0xff]  ;;  %s961_s1 = scalar_lea.vmem %s719_s21, 32  ;;  %p966_p1 = scmp.lt.s32.totalorder %s719_s21, %s719_s21 }
   0xd   :  { %907 = vmatpush3.bf16.msra.mxu1 %v906_v21  ;;  %902 = vmatprep.subr.bf16.mxu0 %v1055_v3  ;;  %v616_v22 = vld [vmem:[%s1332_s2] sm:$0x3]  ;;  %p962_p0 = scmp.ne.s32.totalorder %s719_s21, %s961_s1  ;;  %p967_p2 = scmp.lt.s32.totalorder %s961_s1, %s961_s1 }
   0xe   :  { %908 = vmatprep.subr.bf16.mxu1 %v1055_v3  ;;  %840 = vmatprep.mubr.msk.f32.mxu0 %vm1056_vm0, %v1057_v11 }
   0xf   :  { %851 = vmatprep.mubr.msk.f32.mxu1 %vm1056_vm0, %v1057_v11  ;;  %p968_p3 = por %p967_p2, %p966_p1 }
  0x10   :  { %904 = vmatpush3.bf16.msra.mxu0 %v903_v26 }
  0x11   :  { %910 = vmatpush3.bf16.msra.mxu1 %v909_v27  ;;  %911 = vmatprep.subr.bf16.mxu0 %v1055_v3  ;;  %p969_p4 = pnand %p968_p3, %p962_p0 }
  0x12   :  { %917 = vmatprep.subr.bf16.mxu1 %v1055_v3 }
  0x13   :  { %841 = vmatmul.mubr.msk.f32.vlgmr.msra.gmra.mrb[2].mxu0 %vm47_vm1, %v123_v20  ;;  %v620_v20 = vld [vmem:[%s1336_s6 + $0x18] sm:$0xff] }
  0x14   :  { %852 = vmatmul.mubr.msk.f32.vlgmr.msra.gmra.mrb[2].mxu1 %vm47_vm1, %v763_v28  ;;  %913 = vmatpush3.bf16.msra.mxu0 %v900_v19 }
  0x15   :  { %919 = vmatpush3.bf16.msra.mxu1 %v900_v19  ;;  %914 = vmatprep.subr.bf16.mxu0 %v1055_v3  ;;  %v924_v19 = vpack.c.bf16 %v618_v17, %v617_v16 }
  0x16   :  { %920 = vmatprep.subr.bf16.mxu1 %v1055_v3  ;;  %862 = vmatprep.mubr.msk.f32.mxu0 %vm1056_vm0, %v1057_v11 }
  0x17   :  { %873 = vmatprep.mubr.msk.f32.mxu1 %vm1056_vm0, %v1057_v11 }
  0x18   :  { %916 = vmatpush3.bf16.msra.mxu0 %v903_v26 }
  0x19   :  { %922 = vmatpush3.bf16.msra.mxu1 %v903_v26  ;;  %923 = vmatprep.subr.bf16.mxu0 %v1055_v3 }
  0x1b   :  { %863 = vmatmul.mubr.msk.f32.vlgmr.msra.gmra.mrb[4].mxu0 %vm47_vm1, %v763_v28 }
  0x1c   :  { %874 = vmatmul.mubr.msk.f32.vlgmr.msra.gmra.mrb[4].mxu1 %vm47_vm1, %v42_v18  ;;  %884 = vmatprep.mubr.msk.f32.mxu0 %vm1056_vm0, %v1057_v11  ;;  %v619_v18 = vld [vmem:[%s1336_s6 + $0x10] sm:$0xff] }
  0x1d   :  { %925 = vmatpush3.bf16.msra.mxu0 %v924_v19  ;;  %v927_v21 = vpack.c.bf16 %v620_v20, %v619_v18 }
  0x1e   :  { %926 = vmatprep.subr.bf16.mxu0 %v1055_v3 }
  0x21   :  { %928 = vmatpush3.bf16.msra.mxu0 %v927_v21 }
  0x24   :  { %885 = vmatmul.mubr.msk.f32.vlgmr.msra.gmra.mrb[6].mxu0 %vm47_vm1, %v616_v22 }
  0xde   :  { %v117_v30 = vpop.f32.mrb[0].mxu0 }
  0xdf   :  { %v820_v31 = vpop.f32.mrb[1].mxu0  ;;  %v204_v32 = vpop.f32.mrb[0].mxu1 }
  0xe0   :  { %v205_v33 = vadd.f32 %v760_v29, %v204_v32  ;;  %v831_v34 = vpop.f32.mrb[1].mxu1  ;;  %v1058_v32 = vmov 1  }
  0xe1   :  { %942 = vset.pattern.permute.xlu0 %v1058_v32 }
  0xe2   :  { %209 = vst.msk [vmem:[#allocation7] sm:$0x3] %vm208_vm2, %v205_v33  ;;  %v295_v52 = vsel %vm208_vm2, %v205_v33, -inf }
  0xe6   :  { %v280_v36 = vpop.f32.mrb[2].mxu0 }
  0xe7   :  { %v284_v37 = vmul.f32 %v280_v36, %v117_v30  ;;  %v842_v38 = vpop.f32.mrb[3].mxu0  ;;  %v390_v39 = vpop.f32.mrb[2].mxu1 }
  0xe8   :  { %v1227_v40 = vadd.f32 %v769_v35, %v390_v39  ;;  %v853_v41 = vpop.f32.mrb[3].mxu1  ;;  %v773_v38 = vld [vmem:[%s1337_s7] ss:$0 sm:$0xff] }
  0xe9   :  { %v286_v42 = vsel %vm285_vm3, %v284_v37, 0.0  ;;  %v1060_v37 = vmov 2  }
  0xea   :  { %395 = vst.msk [vmem:[#allocation7 + $0x2] sm:$0x3] %vm208_vm2, %v1227_v40  ;;  %287 = vadd.xlane.f32.xlu0 %v286_v42  ;;  %v480_v11 = vsel %vm208_vm2, %v1227_v40, -inf }
  0xee   :  { %v466_v43 = vpop.f32.mrb[4].mxu0 }
  0xef   :  { %v470_v44 = vmul.f32 %v466_v43, %v117_v30  ;;  %v558_v45 = vpop.f32.mrb[4].mxu1  ;;  %v864_v46 = vpop.f32.mrb[5].mxu0 }
  0xf0   :  { %v562_v47 = vmul.f32 %v558_v45, %v117_v30  ;;  %v875_v48 = vpop.f32.mrb[5].mxu1 }
  0xf1   :  { %v471_v49 = vsel %vm285_vm3, %v470_v44, 0.0 }
  0xf2   :  { %v563_v50 = vsel %vm285_vm3, %v562_v47, 0.0  ;;  %472 = vadd.xlane.f32.xlu0 %v471_v49 }
  0xf3   :  { %564 = vadd.xlane.f32.xlu1 %v563_v50 }
  0xf6   :  { %296 = vmax.xlane.f32.xlu0 %v295_v52 }
  0xf7   :  { %v697_v39 = vpop.f32.mrb[6].mxu0 }
  0xf8   :  { %v886_v41 = vpop.f32.mrb[7].mxu0 }
  0xfa   :  { %573 = vmax.xlane.f32.xlu0 %v572_v53 }
 0x177   :  { %v288_v56 = vpop.xlane.xlu0 %287 }
 0x178   :  { %v289_v57 = vmul.f32 0.17677669, %v288_v56 }
 0x17a   :  { %v293_v62 = vsel %vm290_vm4, %v289_v57, 0.0 }
 0x17f   :  { %v473_v58 = vpop.xlane.xlu0 %472 }
 0x180   :  { %v565_v59 = vpop.xlane.xlu1 %564  ;;  %v474_v60 = vmul.f32 0.17677669, %v473_v58 }
 0x181   :  { %v566_v61 = vmul.f32 0.17677669, %v565_v59 }
 0x182   :  { %v478_v63 = vsel %vm475_vm5, %v474_v60, 0.0 }
 0x183   :  { %v479_v0 = vadd.f32 %v478_v63, %v293_v62  ;;  %v297_v1 = vpop.xlane.xlu0 %296  ;;  %v570_v2 = vsel %vm567_vm6, %v566_v61, 0.0 }
 0x184   :  { %v298_v4 = vsub.f32 %v205_v33, %v297_v1  ;;  %v1059_v33 = vmov 0  }
 0x185   :  { %v571_v5 = vadd.f32 %v570_v2, %v479_v0  ;;  %941 = vset.pattern.permute.xlu1 %v1059_v33 }
 0x186   :  { %v299_v6 = vmul.f32 1.442695, %v298_v4 }
 0x187   :  { %v584_v7 = vsel %vm583_vm7, %v571_v5, -inf  ;;  %v574_v8 = vpop.xlane.xlu0 %573 }
 0x188   :  { %945 = vpow2.f32 %v299_v6  ;;  %585 = vmax.xlane.f32.xlu1 %v584_v7  ;;  %v575_v9 = vsub.f32 %v491_v51, %v574_v8 }
 0x18a   :  { %v576_v10 = vmul.f32 1.442695, %v575_v9 }
 0x18c   :  { %481 = vmax.xlane.f32.xlu1 %v480_v11  ;;  %947 = vpow2.f32 %v576_v10 }
 0x192   :  { %v1242_v12 = vpop.eup %945 }
 0x193   :  { %v301_v13 = vsel %vm208_vm2, %v1242_v12, 0.0 }
 0x194   :  { %302 = vadd.xlane.f32.xlu0 %v301_v13 }
 0x196   :  { %v1246_v14 = vpop.eup %947 }
 0x197   :  { %v578_v15 = vsel %vm208_vm2, %v1246_v14, 0.0 }
 0x198   :  { %579 = vadd.xlane.f32.xlu0 %v578_v15 }
 0x215   :  { %v586_v23 = vpop.xlane.xlu1 %585 }
 0x216   :  { %v587_v24 = vsub.f32 %v571_v5, %v586_v23 }
 0x218   :  { %v588_v25 = vmul.f32 1.442695, %v587_v24 }
 0x219   :  { %v482_v26 = vpop.xlane.xlu1 %481 }
 0x21a   :  { %949 = vpow2.f32 %v588_v25  ;;  %v483_v27 = vsub.f32 %v1227_v40, %v482_v26  ;;  %v698_v40 = vadd.f32 %v773_v38, %v697_v39 }
 0x21c   :  { %v484_v28 = vmul.f32 1.442695, %v483_v27  ;;  %701 = vst.msk [vmem:[#allocation6] sm:$0x3] %vm583_vm7, %v698_v40 }
 0x21e   :  { %951 = vpow2.f32 %v484_v28 }
 0x224   :  { %v950_v29 = vpop.eup %949 }
 0x225   :  { %v590_v30 = vsel %vm583_vm7, %v950_v29, 0.0 }
 0x226   :  { %591 = vadd.xlane.f32.xlu1 %v590_v30 }
 0x228   :  { %v1269_v3 = vpop.eup %951 }
 0x229   :  { %v486_v31 = vsel %vm208_vm2, %v1269_v3, 0.0 }
 0x22a   :  { %487 = vadd.xlane.f32.xlu1 %v486_v31 }
 0x2b3   :  { %v592_v34 = vpop.xlane.xlu1 %591 }
 0x2b4   :  { %953 = vrcp.f32 %v592_v34 }
 0x2be   :  { %v954_v35 = vpop.eup %953 }
 0x2bf   :  { %v594_v36 = vmul.f32 %v954_v35, %v950_v29 }
 0x2c1   :  { %598 = vperm.xlu1 %941, %v594_v36   ;;  %595 = vst.msk [vmem:[#allocation4] sm:$0x3] %vm583_vm7, %v594_v36  ;;  %604 = vperm.xlu0 %942, %v594_v36  }
 0x2c5   :  { %943 = vset.pattern.permute.xlu1 %v1060_v37  ;;  %944 = vset.pattern.permute.xlu0 %v1060_v37 }
 0x2c6   :  { %610 = vperm.xlu1 %943, %v594_v36  }
 0x2c7   :  { %972 = shalt.err (!%p969_p4)
}
 0x2c8   :  { %s973_s4 = scalar_lea.hbm %s1341_s11, 32 }
 0x2c9   :  { %p974_p5 = scmp.ne.s32.totalorder %s1341_s11, %s973_s4  ;;  %p977_p6 = scmp.lt.u32.totalorder %s973_s4, %s1341_s11 }
 0x2cb   :  { %p979_p7 = pnand %p977_p6, %p974_p5 }
 0x2cd   :  { %982 = shalt.err (!%p979_p7)
}
 0x2ce   :  { %721 = dma.vmem_to_hbm [thread:$0]  %s719_s21, 32, %s1341_s11, [#allocation5]  }
 0x2cf   :  { %s1062_s26 = smov [#allocation6]  }
 0x2d0   :  { %s728_s9 = sshll.u32 %s1062_s26, 4  ;;  %s729_s9 = int_to_ptr.vmem [resolvable:$true] %s728_s9 }
 0x2d1   :  { %s983_s27 = scalar_lea.vmem %s729_s9, 32  ;;  %p988_p9 = scmp.lt.s32.totalorder %s729_s9, %s729_s9 }
 0x2d2   :  { %p984_p8 = scmp.ne.s32.totalorder %s729_s9, %s983_s27  ;;  %p989_p10 = scmp.lt.s32.totalorder %s983_s27, %s983_s27 }
 0x2d4   :  { %p990_p11 = por %p989_p10, %p988_p9 }
 0x2d6   :  { %p991_p12 = pnand %p990_p11, %p984_p8 }
 0x2d8   :  { %994 = shalt.err (!%p991_p12)
}
 0x2d9   :  { %s995_s29 = scalar_lea.hbm %s1342_s12, 32 }
 0x2da   :  { %p996_p13 = scmp.ne.s32.totalorder %s1342_s12, %s995_s29  ;;  %p999_p0 = scmp.lt.u32.totalorder %s995_s29, %s1342_s12 }
 0x2dc   :  { %p1001_p1 = pnand %p999_p0, %p996_p13 }
 0x2de   :  { %1004 = shalt.err (!%p1001_p1)
}
 0x2df   :  { %731 = dma.vmem_to_hbm [thread:$0]  %s729_s9, 32, %s1342_s12, [#allocation5]  }
 0x2e0   :  { %s1063_s18 = smov [#allocation7]  }
 0x2e1   :  { %s737_s19 = sshll.u32 %s1063_s18, 4  ;;  %s738_s19 = int_to_ptr.vmem [resolvable:$true] %s737_s19 }
 0x2e2   :  { %s1005_s2 = scalar_lea.vmem %s738_s19, 64  ;;  %p1010_p3 = scmp.lt.s32.totalorder %s738_s19, %s738_s19 }
 0x2e3   :  { %p1006_p2 = scmp.ne.s32.totalorder %s738_s19, %s1005_s2  ;;  %p1011_p4 = scmp.lt.s32.totalorder %s1005_s2, %s1005_s2 }
 0x2e5   :  { %p1012_p5 = por %p1011_p4, %p1010_p3 }
 0x2e7   :  { %p1013_p6 = pnand %p1012_p5, %p1006_p2 }
 0x2e9   :  { %1016 = shalt.err (!%p1013_p6)
}
 0x2ea   :  { %s1017_s21 = scalar_lea.hbm %s1343_s13, 64 }
 0x2eb   :  { %p1018_p7 = scmp.ne.s32.totalorder %s1343_s13, %s1017_s21  ;;  %p1021_p8 = scmp.lt.u32.totalorder %s1017_s21, %s1343_s13 }
 0x2ed   :  { %p1023_p9 = pnand %p1021_p8, %p1018_p7 }
 0x2ef   :  { %1026 = shalt.err (!%p1023_p9)
}
 0x2f0   :  { %s1064_s4 = smov 32   ;;  %s1065_s7 = smov 2   ;;  %v303_v42 = vpop.xlane.xlu0 %302  ;;  %v488_v43 = vpop.xlane.xlu1 %487 }
 0x2f1   :  { %743 = dma.vmem_to_hbm [thread:$0]  %s738_s19, 64, %s1343_s13, [#allocation8], %s1064_s4, %s1064_s4, %s1065_s7   ;;  %955 = vrcp.f32 %v303_v42 }
 0x2f2   :  { %957 = vrcp.f32 %v488_v43  ;;  %s1066_s13 = smov [#allocation2]  }
 0x2f3   :  { %s708_s0 = sshll.u32 %s1066_s13, 4  ;;  %s709_s0 = int_to_ptr.vmem [resolvable:$true] %s708_s0 }
 0x2f4   :  { %v580_v44 = vpop.xlane.xlu0 %579  ;;  %s1027_s24 = scalar_lea.vmem %s709_s0, 32  ;;  %p1032_p11 = scmp.lt.s32.totalorder %s709_s0, %s709_s0 }
 0x2f5   :  { %959 = vrcp.f32 %v580_v44  ;;  %p1028_p10 = scmp.ne.s32.totalorder %s709_s0, %s1027_s24  ;;  %p1033_p12 = scmp.lt.s32.totalorder %s1027_s24, %s1027_s24 }
 0x2f7   :  { %p1034_p13 = por %p1033_p12, %p1032_p11 }
 0x2f9   :  { %p1035_p0 = pnand %p1034_p13, %p1028_p10 }
 0x2fb   :  { %v956_v45 = vpop.eup %955 }
 0x2fc   :  { %v958_v46 = vpop.eup %957  ;;  %v305_v48 = vmul.f32 %v956_v45, %v1242_v12 }
 0x2fd   :  { %v490_v49 = vmul.f32 %v958_v46, %v1269_v3 }
 0x2ff   :  { %v960_v51 = vpop.eup %959 }
 0x300   :  { %v582_v54 = vmul.f32 %v960_v51, %v1246_v14 }
 0x340   :  { %v599_v47 = vpop.permute.xlu1 %598  ;;  %v605_v50 = vpop.permute.xlu0 %604 }
 0x341   :  { %v601_v52 = vmul.f32 %v599_v47, %v305_v48  ;;  %v607_v53 = vmul.f32 %v605_v50, %v490_v49 }
 0x343   :  { %v608_v56 = vadd.f32 %v607_v53, %v601_v52 }
 0x345   :  { %v611_v55 = vpop.permute.xlu1 %610 }
 0x346   :  { %v613_v57 = vmul.f32 %v611_v55, %v582_v54 }
 0x348   :  { %v614_v58 = vadd.f32 %v613_v57, %v608_v56 }
 0x34a   :  { %615 = vst.msk [vmem:[#allocation2] sm:$0x3] %vm208_vm2, %v614_v58 }
 0x34b   :  { %1038 = shalt.err (!%p1035_p0)
}
 0x34c   :  { %s1039_s9 = scalar_lea.hbm %s1340_s10, 32 }
 0x34d   :  { %p1040_p1 = scmp.ne.s32.totalorder %s1340_s10, %s1039_s9  ;;  %p1043_p2 = scmp.lt.u32.totalorder %s1039_s9, %s1340_s10 }
 0x34f   :  { %p1045_p3 = pnand %p1043_p2, %p1040_p1 }
 0x351   :  { %1048 = shalt.err (!%p1045_p3)
}
 0x352   :  { %711 = dma.vmem_to_hbm [thread:$0]  %s709_s0, 32, %s1340_s10, [#allocation3]  }
 0x353   :  { %1049 = dma.done.wait [#allocation3], 32  }
 0x354   :  { %1050 = vsyncadd [#allocation3], 4294967264 }
 0x355   :  { %1051 = dma.done.wait [#allocation5], 64  }
 0x356   :  { %1052 = vsyncadd [#allocation5], 4294967232 }
 0x357   :  { %1053 = dma.done.wait [#allocation8], 64  }
 0x358   :  { %1054 = vsyncadd [#allocation8], 4294967232 }
 0x359   :  { %756 = vsyncpa [#allocation3], 1 }
 0x35a   :  { %757 = vsyncpa [#allocation5], 1 }
 0x35b   :  { %758 = vsyncpa [#allocation8], 1 }

// kernel: _forward.4
= control target key start
LH: loop header
LB: loop body
LE: loop exit
PB: predicated region body
PF: predicated region fallthrough
CT: control target
= control target key end

     0   :  { %vm89_vm0 = vcmask 261120   ;;  %vm3857_vm1 = vcmask 1041409   ;;  %vm3860_vm2 = vcmask 254976   ;;  %v4777_v41 = vmov 0.0   ;;  %s4779_s29 = smov 96   ;;  %s4781_s30 = smov 64   ;;  %s5623_s0 = inlined_call_operand.vmem [shape: f32[2,8,32], index: 0, kind: input, shape index: {}]   ;;  %s5624_s1 = inlined_call_operand.vmem [shape: f32[8,32], index: 1, kind: input, shape index: {}]   ;;  %s5625_s6 = inlined_call_operand.vmem [shape: f32[2,32,96], index: 6, kind: input, shape index: {}]   ;;  %s5626_s2 = inlined_call_operand.vmem [shape: f32[1,32], index: 2, kind: input, shape index: {}]   ;;  %s5627_s3 = inlined_call_operand.vmem [shape: f32[1,32], index: 3, kind: input, shape index: {}]   ;;  %s5628_s22 = inlined_call_operand.vmem [shape: f32[3,2,32], index: 22, kind: output, shape index: {0}]   ;;  %s5629_s7 = inlined_call_operand.vmem [shape: f32[2,1,96], index: 7, kind: input, shape index: {}]   ;;  %s5630_s5 = inlined_call_operand.vmem [shape: f32[4,32], index: 5, kind: input, shape index: {}]   ;;  %s5631_s4 = inlined_call_operand.vmem [shape: f32[8,8,8], index: 4, kind: input, shape index: {}]   ;;  %s5632_s8 = inlined_call_operand.vmem [shape: f32[2,32,32], index: 8, kind: input, shape index: {}]   ;;  %s5633_s9 = inlined_call_operand.vmem [shape: f32[2,1,32], index: 9, kind: input, shape index: {}]   ;;  %s5634_s12 = inlined_call_operand.vmem [shape: f32[2,32,64], index: 12, kind: input, shape index: {}]   ;;  %s5635_s10 = inlined_call_operand.vmem [shape: f32[2,1,32], index: 10, kind: input, shape index: {}]   ;;  %s5636_s11 = inlined_call_operand.vmem [shape: f32[2,1,32], index: 11, kind: input, shape index: {}]   ;;  %s5637_s14 = inlined_call_operand.vmem [shape: f32[2,64,32], index: 14, kind: input, shape index: {}]   ;;  %s5638_s13 = inlined_call_operand.vmem [shape: f32[2,1,64], index: 13, kind: input, shape index: {}]   ;;  %s5639_s15 = inlined_call_operand.vmem [shape: f32[2,1,32], index: 15, kind: input, shape index: {}]   ;;  %s5640_s16 = inlined_call_operand.vmem [shape: f32[2,1,32], index: 16, kind: input, shape index: {}]   ;;  %s5641_s17 = inlined_call_operand.vmem [shape: f32[2,1,32], index: 17, kind: input, shape index: {}]   ;;  %s5642_s18 = inlined_call_operand.vmem [shape: f32[32,32], index: 18, kind: input, shape index: {}]   ;;  %s5643_s20 = inlined_call_operand.vmem [shape: f32[32,2], index: 20, kind: input, shape index: {}]   ;;  %s5644_s19 = inlined_call_operand.vmem [shape: f32[1,32], index: 19, kind: input, shape index: {}]   ;;  %s5645_s21 = inlined_call_operand.vmem [shape: f32[1,2], index: 21, kind: input, shape index: {}]   ;;  %s5646_s23 = inlined_call_operand.vmem [shape: f32[2,2], index: 23, kind: output, shape index: {1}]  }
   0x1   :  { %5652 = sst [smem:[#allocation2_spill]] %s5623_s0  ;;  %4310 = vmatprep.subr.mxu1 %v4777_v41  ;;  %vm4778_vm3 = vmmov 0   ;;  %v4780_v47 = vmov 1966171168   ;;  %v260_v49 = vlaneseq  ;;  %vm931_vm4 = vcmask 64512  }
   0x2   :  { %5653 = sst [smem:[#allocation3_spill]] %s5624_s1  ;;  %s5661_s24 = sld [smem:[#allocation2_spill]]  ;;  %4312 = vmatprep.mubr.msk.f32.mxu1 %vm4778_vm3, %v4777_v41  ;;  %v258_v48 = vunpack.c.l.s4 %v4780_v47  ;;  %vm1892_vm5 = vcmask 523264   ;;  %vm4042_vm6 = vcmask 9216  }
   0x3   :  { %5654 = sst [smem:[#allocation4_spill]] %s5625_s6  ;;  %v261_v51 = vshrl.u32 %v260_v49, 7  ;;  %v5076_v49 = vld [vmem:[%s5631_s4 + $0x30] sm:$0xff] }
   0x4   :  { %5655 = sst [smem:[#allocation5_spill]] %s5626_s2  ;;  %v259_v50 = vunpack.c.0.s8 %v258_v48 }
   0x5   :  { %5656 = sst [smem:[#allocation6_spill]] %s5627_s3  ;;  %v275_v57 = vsub.s32 0, %v261_v51 }
   0x6   :  { %5657 = sst [smem:[#allocation7_spill]] %s5628_s22  ;;  %s5665_s1 = sld [smem:[#allocation6_spill]]  ;;  %v262_v52 = vsub.s32 %v259_v50, %v261_v51 }
   0x7   :  { %5658 = sst [smem:[#allocation8_spill]] %s5629_s7  ;;  %s5663_s7 = sld [smem:[#allocation4_spill]] }
   0x8   :  { %5659 = sst [smem:[#allocation9_spill]] %s5630_s5  ;;  %v82_v0 = vld [vmem:[%s5661_s24] sm:$0xff]  ;;  %v83_v2 = vld [vmem:[%s5661_s24 + $0x8] sm:$0xff]  ;;  %s5664_s24 = sld [smem:[#allocation5_spill]] }
   0x9   :  { %5660 = sst [smem:[#allocation10_spill]] %s5641_s17  ;;  %s5662_s17 = sld [smem:[#allocation3_spill]] }
   0xa   :  { %s5666_s6 = sld [smem:[#allocation7_spill]]  ;;  %s5667_s28 = sld [smem:[#allocation8_spill]] }
   0xb   :  { %s5668_s3 = sld [smem:[#allocation9_spill]]  ;;  %s5669_s2 = sld [smem:[#allocation10_spill]] }
   0xc   :  { %v4053_v32 = vld [vmem:[%s5665_s1] ss:$0 sm:$0xff] }
   0xd   :  { %v133_v17 = vld [vmem:[%s5663_s7] sm:$0xff]  ;;  %v134_v18 = vld [vmem:[%s5663_s7 + $0x8] sm:$0xff]  ;;  %v135_v19 = vld [vmem:[%s5663_s7 + $0x10] sm:$0xff] }
   0xe   :  { %v4585_v20 = vpack.c.bf16 %v134_v18, %v133_v17  ;;  %v136_v21 = vld [vmem:[%s5663_s7 + $0x18] sm:$0xff]  ;;  %v4052_v30 = vld [vmem:[%s5664_s24] ss:$0 sm:$0xff] }
   0xf   :  { %v84_v1 = vld [vmem:[%s5662_s17] sm:$0xff]  ;;  %v4589_v22 = vpack.c.bf16 %v136_v21, %v135_v19  ;;  %v5044_v19 = vld [vmem:[%s5631_s4 + $0x8] sm:$0xff] }
  0x10   :  { %v85_v3 = vadd.f32 %v84_v1, %v82_v0  ;;  %v86_v4 = vadd.f32 %v84_v1, %v83_v2  ;;  %4586 = vmatprep.subr.bf16.mxu0 %v4585_v20  ;;  %v4054_v42 = vld [vmem:[%s5667_s28] ss:$0 sm:$0xff] }
  0x11   :  { %4588 = vmatpush3.bf16.msra.mxu0 %v4585_v20  ;;  %v4057_v53 = vld.sshfl [vmem:[%s5668_s3] sm:$0x33 pattern:$0x75316420] }
  0x12   :  { %v90_v5 = vsel %vm89_vm0, %v85_v3, 0.0  ;;  %v93_v6 = vsel %vm89_vm0, %v86_v4, 0.0  ;;  %4590 = vmatprep.subr.bf16.mxu0 %v4589_v22  ;;  %v263_v54 = vrot.slane %v4057_v53, %v262_v52  ;;  %v256_v55 = vcombine.high %v4057_v53, %v4057_v53 }
  0x13   :  { %91 = vadd.xlane.f32.xlu0 %v90_v5 }
  0x14   :  { %v271_v56 = vcombine.high %v263_v54, %v263_v54  ;;  %v270_v58 = vrot.slane %v256_v55, %v262_v52  ;;  %v4969_v59 = vrot.slane %v263_v54, %v275_v57 }
  0x15   :  { %4592 = vmatpush3.bf16.msra.mxu0 %v4589_v22 }
  0x16   :  { %4320 = vmatprep.subr.mxu0 %v4777_v41  ;;  %v4971_v60 = vrot.slane %v271_v56, %v275_v57  ;;  %v272_v62 = vcombine.high %v270_v58, %v270_v58  ;;  %v4981_v1 = vrot.slane %v270_v58, %v275_v57  ;;  %v5088_v56 = vld [vmem:[%s5631_s4 + $0x28] sm:$0xff] }
  0x17   :  { %94 = vadd.xlane.f32.xlu0 %v93_v6 }
  0x18   :  { %v4995_v5 = vrot.slane %v272_v62, %v275_v57 }
  0xa0   :  { %v92_v7 = vpop.xlane.xlu0 %91 }
  0xa1   :  { %v97_v8 = vmul.f32 0.03125, %v92_v7 }
  0xa3   :  { %v99_v9 = vsub.f32 %v85_v3, %v97_v8 }
  0xa4   :  { %v95_v10 = vpop.xlane.xlu0 %94 }
  0xa5   :  { %v98_v11 = vmul.f32 0.03125, %v95_v10  ;;  %v101_v12 = vmul.f32 %v99_v9, %v99_v9 }
  0xa7   :  { %v100_v13 = vsub.f32 %v86_v4, %v98_v11  ;;  %v103_v14 = vsel %vm89_vm0, %v101_v12, 0.0  ;;  %v5036_v12 = vld [vmem:[%s5631_s4] sm:$0xff] }
  0xa8   :  { %104 = vadd.xlane.f32.xlu1 %v103_v14 }
  0xa9   :  { %v102_v15 = vmul.f32 %v100_v13, %v100_v13 }
  0xab   :  { %v106_v16 = vsel %vm89_vm0, %v102_v15, 0.0 }
  0xac   :  { %107 = vadd.xlane.f32.xlu1 %v106_v16 }
 0x135   :  { %v105_v23 = vpop.xlane.xlu1 %104 }
 0x136   :  { %v109_v24 = vmul.f32 0.03125, %v105_v23 }
 0x138   :  { %v111_v25 = vadd.f32 1e-12, %v109_v24 }
 0x139   :  { %v108_v26 = vpop.xlane.xlu1 %107 }
 0x13a   :  { %4683 = vrsqrt.f32 %v111_v25  ;;  %v110_v27 = vmul.f32 0.03125, %v108_v26  ;;  %v5054_v26 = vld [vmem:[%s5631_s4 + $0x10] sm:$0xff] }
 0x13c   :  { %v112_v28 = vadd.f32 1e-12, %v110_v27 }
 0x13e   :  { %4685 = vrsqrt.f32 %v112_v28 }
 0x144   :  { %v4684_v29 = vpop.eup %4683 }
 0x145   :  { %v115_v31 = vmul.f32 %v4684_v29, %v99_v9  ;;  %v5059_v29 = vld [vmem:[%s5631_s4 + $0x18] sm:$0xff] }
 0x147   :  { %v123_v33 = vmul.f32 %v4052_v30, %v115_v31 }
 0x148   :  { %v4686_v34 = vpop.eup %4685 }
 0x149   :  { %v116_v35 = vmul.f32 %v4686_v34, %v100_v13  ;;  %v4934_v36 = vadd.f32 %v4053_v32, %v123_v33 }
 0x14b   :  { %v124_v37 = vmul.f32 %v4052_v30, %v116_v35  ;;  %4307 = vmatprep.mubr.msk.f32.mxu0 %vm89_vm0, %v4934_v36 }
 0x14d   :  { %v4938_v38 = vadd.f32 %v4053_v32, %v124_v37 }
 0x14f   :  { %v3856_v39 = vrot.slane %v4938_v38, 7  ;;  %4308 = vmatmul.mubr.msk.f32.vlgmr.msra.gmra.mrb[0].mxu0 %vm89_vm0, %v4938_v38 }
 0x150   :  { %4322 = vmatprep.mubr.msk.f32.mxu0 %vm4778_vm3, %v4777_v41 }
 0x151   :  { %v3858_v40 = vsel %vm3857_vm1, %v3856_v39, %v4934_v36  ;;  %v5068_v39 = vld [vmem:[%s5631_s4 + $0x20] sm:$0xff] }
 0x152   :  { %3861 = vst.msk [vmem:[%s5666_s6] sm:$0x3] %vm3860_vm2, %v3858_v40 }
 0x222   :  { %v4309_v43 = vpop.f32.mrb[0].mxu0 }
 0x223   :  { %v4958_v44 = vadd.f32 %v4309_v43, %v4054_v42  ;;  %v239_v45 = vpop.f32.mrb[1].mxu0 }
 0x224   :  { %v4960_v46 = vadd.f32 %v4054_v42, %v239_v45 }
 0x225   :  { %619 = vrot.lane.b32.xlu1 %v4958_v44, %s4779_s29  ;;  %v297_v4 = vmul.f32 %v4969_v59, %v4958_v44  ;;  %v299_v7 = vmul.f32 %v4971_v60, %v4958_v44  ;;  %v298_v8 = vmul.f32 %v4981_v1, %v4958_v44  ;;  %v300_v9 = vmul.f32 %v4995_v5, %v4958_v44 }
 0x226   :  { %322 = vrot.lane.b32.xlu0 %v4960_v46, %s4779_s29  ;;  %v293_v63 = vmul.f32 %v4969_v59, %v4960_v46  ;;  %v295_v0 = vmul.f32 %v4971_v60, %v4960_v46  ;;  %v294_v3 = vmul.f32 %v4981_v1, %v4960_v46  ;;  %v296_v6 = vmul.f32 %v4995_v5, %v4960_v46 }
 0x297   :  { %v620_v2 = vpop.permute.xlu1 %619 }
 0x298   :  { %v323_v61 = vpop.permute.xlu0 %322 }
 0x299   :  { %4311 = vmatpush3.xpose.msk.msra.mxu1 %vm89_vm0, %v323_v61  ;;  %4321 = vmatpush3.xpose.msk.msra.mxu0 %vm89_vm0, %v323_v61 }
 0x29a   :  { %4315 = vmatprep.subr.mxu1 %v4777_v41  ;;  %4330 = vmatprep.subr.mxu0 %v4777_v41 }
 0x29c   :  { %4313 = vmatmul.mubr.msk.f32.vlgmr.msra.gmra.mrb[0].mxu1 %vm89_vm0, %v293_v63  ;;  %4323 = vmatmul.mubr.msk.f32.vlgmr.msra.gmra.mrb[2].mxu0 %vm89_vm0, %v295_v0 }
 0x29d   :  { %4316 = vmatpush3.xpose.msk.msra.mxu1 %vm89_vm0, %v323_v61  ;;  %4331 = vmatpush3.xpose.msk.msra.mxu0 %vm89_vm0, %v620_v2 }
 0x29e   :  { %4317 = vmatprep.mubr.msk.f32.mxu1 %vm4778_vm3, %v4777_v41  ;;  %4332 = vmatprep.mubr.msk.f32.mxu0 %vm4778_vm3, %v4777_v41 }
 0x29f   :  { %4325 = vmatprep.subr.mxu1 %v4777_v41  ;;  %4340 = vmatprep.subr.mxu0 %v4777_v41 }
 0x2a0   :  { %4318 = vmatmul.mubr.msk.f32.vlgmr.msra.gmra.mrb[2].mxu1 %vm89_vm0, %v294_v3  ;;  %4333 = vmatmul.mubr.msk.f32.vlgmr.msra.gmra.mrb[4].mxu0 %vm89_vm0, %v297_v4 }
 0x2a1   :  { %4326 = vmatpush3.xpose.msk.msra.mxu1 %vm89_vm0, %v323_v61  ;;  %4341 = vmatpush3.xpose.msk.msra.mxu0 %vm89_vm0, %v620_v2  ;;  %v5096_v61 = vld [vmem:[%s5631_s4 + $0x38] sm:$0xff] }
 0x2a2   :  { %4327 = vmatprep.mubr.msk.f32.mxu1 %vm4778_vm3, %v4777_v41  ;;  %4342 = vmatprep.mubr.msk.f32.mxu0 %vm4778_vm3, %v4777_v41 }
 0x2a3   :  { %4335 = vmatprep.subr.mxu1 %v4777_v41  ;;  %4350 = vmatprep.subr.mxu0 %v4777_v41 }
 0x2a4   :  { %4328 = vmatmul.mubr.msk.f32.vlgmr.msra.gmra.mrb[4].mxu1 %vm89_vm0, %v296_v6  ;;  %4343 = vmatmul.mubr.msk.f32.vlgmr.msra.gmra.mrb[6].mxu0 %vm89_vm0, %v299_v7 }
 0x2a5   :  { %4336 = vmatpush3.xpose.msk.msra.mxu1 %vm89_vm0, %v620_v2  ;;  %4337 = vmatprep.mubr.msk.f32.mxu1 %vm4778_vm3, %v4777_v41 }
 0x2a6   :  { %4345 = vmatprep.subr.mxu1 %v4777_v41  ;;  %4352 = vmatprep.mubr.msk.f32.mxu0 %vm4778_vm3, %v4777_v41 }
 0x2a8   :  { %4338 = vmatmul.mubr.msk.f32.vlgmr.msra.gmra.mrb[6].mxu1 %vm89_vm0, %v298_v8 }
 0x2a9   :  { %4346 = vmatpush3.xpose.msk.msra.mxu1 %vm89_vm0, %v620_v2  ;;  %4347 = vmatprep.mubr.msk.f32.mxu1 %vm4778_vm3, %v4777_v41 }
 0x2aa   :  { %4355 = vmatprep.subr.mxu1 %v4777_v41 }
 0x2ac   :  { %4348 = vmatmul.mubr.msk.f32.vlgmr.msra.gmra.mrb[8].mxu1 %vm89_vm0, %v300_v9 }
 0x2ad   :  { %4357 = vmatprep.mubr.msk.f32.mxu1 %vm4778_vm3, %v4777_v41 }
 0x36f   :  { %v395_v10 = vpop.f32.mrb[0].mxu1  ;;  %v541_v11 = vpop.f32.mrb[2].mxu0 }
 0x370   :  { %v915_v13 = vmul.f32 0.35355338, %v395_v10  ;;  %v4314_v14 = vpop.f32.mrb[1].mxu1  ;;  %v4324_v15 = vpop.f32.mrb[3].mxu0  ;;  %v917_v23 = vmul.f32 0.35355338, %v541_v11 }
 0x372   :  { %v5039_v16 = vadd.f32 %v915_v13, %v5036_v12  ;;  %v925_v35 = vadd.f32 %v917_v23, %v5054_v26 }
 0x373   :  { %v468_v17 = vpop.f32.mrb[2].mxu1  ;;  %v692_v18 = vpop.f32.mrb[4].mxu0 }
 0x374   :  { %v916_v20 = vmul.f32 0.35355338, %v468_v17  ;;  %v4319_v21 = vpop.f32.mrb[3].mxu1  ;;  %v4334_v22 = vpop.f32.mrb[5].mxu0  ;;  %v932_v24 = vsel %vm931_vm4, %v5039_v16, -inf  ;;  %v938_v47 = vsel %vm931_vm4, %v925_v35, -inf }
 0x375   :  { %933 = vmax.xlane.f32.xlu1 %v932_v24  ;;  %v919_v33 = vmul.f32 0.35355338, %v692_v18 }
 0x376   :  { %v5049_v25 = vadd.f32 %v916_v20, %v5044_v19 }
 0x377   :  { %v614_v27 = vpop.f32.mrb[4].mxu1  ;;  %v838_v28 = vpop.f32.mrb[6].mxu0  ;;  %v927_v48 = vadd.f32 %v919_v33, %v5068_v39 }
 0x378   :  { %v918_v30 = vmul.f32 0.35355338, %v614_v27  ;;  %v4329_v31 = vpop.f32.mrb[5].mxu1  ;;  %v4344_v32 = vpop.f32.mrb[7].mxu0  ;;  %v935_v34 = vsel %vm931_vm4, %v5049_v25, -inf }
 0x379   :  { %936 = vmax.xlane.f32.xlu0 %v935_v34  ;;  %v921_v45 = vmul.f32 0.35355338, %v838_v28  ;;  %v944_v52 = vsel %vm931_vm4, %v927_v48, -inf }
 0x37a   :  { %v926_v37 = vadd.f32 %v918_v30, %v5059_v29 }
 0x37b   :  { %v765_v40 = vpop.f32.mrb[6].mxu1  ;;  %v929_v53 = vadd.f32 %v921_v45, %v5076_v49 }
 0x37c   :  { %v4339_v42 = vpop.f32.mrb[7].mxu1  ;;  %v941_v43 = vsel %vm931_vm4, %v926_v37, -inf  ;;  %v920_v55 = vmul.f32 0.35355338, %v765_v40 }
 0x37d   :  { %942 = vmax.xlane.f32.xlu1 %v941_v43  ;;  %939 = vmax.xlane.f32.xlu0 %v938_v47  ;;  %v950_v54 = vsel %vm931_vm4, %v929_v53, -inf }
 0x37e   :  { %v5091_v58 = vadd.f32 %v920_v55, %v5088_v56 }
 0x37f   :  { %v911_v50 = vpop.f32.mrb[8].mxu1 }
 0x380   :  { %v4349_v51 = vpop.f32.mrb[9].mxu1  ;;  %v922_v57 = vmul.f32 0.35355338, %v911_v50  ;;  %v947_v62 = vsel %vm931_vm4, %v5091_v58, -inf }
 0x381   :  { %945 = vmax.xlane.f32.xlu0 %v944_v52 }
 0x382   :  { %v5101_v63 = vadd.f32 %v922_v57, %v5096_v61 }
 0x384   :  { %v953_v0 = vsel %vm931_vm4, %v5101_v63, -inf }
 0x385   :  { %951 = vmax.xlane.f32.xlu0 %v950_v54 }
 0x38e   :  { %303 = vrot.lane.b32.xlu1 %v4981_v1, %s4781_s30 }
 0x39b   :  { %301 = vrot.lane.b32.xlu0 %v4969_v59, %s4781_s30 }
 0x3b2   :  { %948 = vmax.xlane.f32.xlu1 %v947_v62 }
 0x3b6   :  { %954 = vmax.xlane.f32.xlu1 %v953_v0 }
 0x3c7   :  { %305 = vrot.lane.b32.xlu1 %v4971_v60, %s4781_s30 }
 0x3cb   :  { %307 = vrot.lane.b32.xlu1 %v4995_v5, %s4781_s30 }
 0x402   :  { %v934_v2 = vpop.xlane.xlu1 %933 }
 0x403   :  { %v956_v15 = vsub.f32 %v5039_v16, %v934_v2 }
 0x405   :  { %v964_v17 = vmul.f32 1.442695, %v956_v15 }
 0x406   :  { %v937_v3 = vpop.xlane.xlu0 %936 }
 0x407   :  { %4687 = vpow2.f32 %v964_v17 }
 0x40a   :  { %v943_v4 = vpop.xlane.xlu1 %942  ;;  %v940_v6 = vpop.xlane.xlu0 %939 }
 0x40b   :  { %v958_v18 = vsub.f32 %v925_v35, %v940_v6  ;;  %v959_v22 = vsub.f32 %v926_v37, %v943_v4 }
 0x40d   :  { %v968_v20 = vmul.f32 1.442695, %v958_v18  ;;  %v970_v24 = vmul.f32 1.442695, %v959_v22 }
 0x40e   :  { %v5109_v7 = vpop.permute.xlu1 %303  ;;  %v946_v8 = vpop.xlane.xlu0 %945 }
 0x40f   :  { %v314_v9 = vmul.f32 %v5109_v7, %v4960_v46  ;;  %v960_v21 = vsub.f32 %v927_v48, %v946_v8  ;;  %4689 = vpow2.f32 %v968_v20  ;;  %v318_v52 = vmul.f32 %v5109_v7, %v4958_v44 }
 0x411   :  { %1098 = vrot.lane.b32.xlu1 %v314_v9, %s4781_s30  ;;  %v972_v23 = vmul.f32 1.442695, %v960_v21  ;;  %v5123_v28 = vpop.eup %4687 }
 0x412   :  { %v952_v10 = vpop.xlane.xlu0 %951  ;;  %v980_v31 = vsel %vm931_vm4, %v5123_v28, 0.0 }
 0x413   :  { %4691 = vpow2.f32 %v972_v23  ;;  %v962_v27 = vsub.f32 %v929_v53, %v952_v10  ;;  %v957_v53 = vsub.f32 %v5049_v25, %v937_v3 }
 0x414   :  { %4693 = vpow2.f32 %v970_v24 }
 0x415   :  { %v976_v30 = vmul.f32 1.442695, %v962_v27  ;;  %v966_v55 = vmul.f32 1.442695, %v957_v53 }
 0x416   :  { %v5114_v11 = vpop.permute.xlu0 %301 }
 0x417   :  { %v313_v13 = vmul.f32 %v5114_v11, %v4960_v46  ;;  %v317_v14 = vmul.f32 %v5114_v11, %v4958_v44  ;;  %4695 = vpow2.f32 %v976_v30 }
 0x418   :  { %4697 = vpow2.f32 %v966_v55  ;;  %v139_v55 = vld [vmem:[%s5632_s8 + $0x8] sm:$0xff] }
 0x419   :  { %1021 = vrot.lane.b32.xlu0 %v313_v13, %s4781_s30  ;;  %v5127_v32 = vpop.eup %4689 }
 0x41a   :  { %v986_v33 = vsel %vm931_vm4, %v5127_v32, 0.0 }
 0x41d   :  { %1329 = vrot.lane.b32.xlu0 %v317_v14, %s4781_s30  ;;  %v5131_v34 = vpop.eup %4691 }
 0x41e   :  { %v992_v37 = vsel %vm931_vm4, %v5131_v34, 0.0  ;;  %v5135_v40 = vpop.eup %4693 }
 0x41f   :  { %v989_v43 = vsel %vm931_vm4, %v5135_v40, 0.0 }
 0x421   :  { %v5143_v47 = vpop.eup %4695 }
 0x422   :  { %v998_v50 = vsel %vm931_vm4, %v5143_v47, 0.0  ;;  %v4698_v2 = vpop.eup %4697 }
 0x423   :  { %v983_v4 = vsel %vm931_vm4, %v4698_v2, 0.0 }
 0x43c   :  { %981 = vadd.xlane.f32.xlu0 %v980_v31 }
 0x43f   :  { %v949_v16 = vpop.xlane.xlu1 %948 }
 0x440   :  { %987 = vadd.xlane.f32.xlu0 %v986_v33  ;;  %v961_v57 = vsub.f32 %v5091_v58, %v949_v16 }
 0x443   :  { %v955_v35 = vpop.xlane.xlu1 %954 }
 0x444   :  { %993 = vadd.xlane.f32.xlu0 %v992_v37  ;;  %v963_v62 = vsub.f32 %v5101_v63, %v955_v35 }
 0x446   :  { %v978_v0 = vmul.f32 1.442695, %v963_v62  ;;  %v141_v62 = vld [vmem:[%s5632_s8 + $0x18] sm:$0xff] }
 0x447   :  { %v5137_v42 = vpop.permute.xlu1 %305 }
 0x448   :  { %v315_v45 = vmul.f32 %v5137_v42, %v4960_v46  ;;  %990 = vadd.xlane.f32.xlu0 %v989_v43  ;;  %v319_v54 = vmul.f32 %v5137_v42, %v4958_v44 }
 0x44a   :  { %1175 = vrot.lane.b32.xlu1 %v315_v45, %s4781_s30 }
 0x44b   :  { %v5146_v48 = vpop.permute.xlu1 %307 }
 0x44c   :  { %v316_v51 = vmul.f32 %v5146_v48, %v4960_v46  ;;  %999 = vadd.xlane.f32.xlu0 %v998_v50  ;;  %v974_v46 = vmul.f32 1.442695, %v961_v57  ;;  %v320_v9 = vmul.f32 %v5146_v48, %v4958_v44 }
 0x44e   :  { %1252 = vrot.lane.b32.xlu1 %v316_v51, %s4781_s30  ;;  %4699 = vpow2.f32 %v974_v46  ;;  %v140_v46 = vld [vmem:[%s5632_s8 + $0x10] sm:$0xff] }
 0x44f   :  { %4701 = vpow2.f32 %v978_v0  ;;  %v4597_v0 = vpack.c.bf16 %v141_v62, %v140_v46 }
 0x452   :  { %1406 = vrot.lane.b32.xlu1 %v318_v52, %s4781_s30 }
 0x458   :  { %v5163_v6 = vpop.eup %4699 }
 0x459   :  { %v995_v25 = vsel %vm931_vm4, %v5163_v6, 0.0  ;;  %v5167_v3 = vpop.eup %4701 }
 0x45a   :  { %v1001_v58 = vsel %vm931_vm4, %v5167_v3, 0.0 }
 0x462   :  { %1483 = vrot.lane.b32.xlu0 %v319_v54, %s4781_s30  ;;  %v138_v54 = vld [vmem:[%s5632_s8] sm:$0xff] }
 0x463   :  { %v4593_v57 = vpack.c.bf16 %v139_v55, %v138_v54 }
 0x476   :  { %984 = vadd.xlane.f32.xlu1 %v983_v4 }
 0x47a   :  { %996 = vadd.xlane.f32.xlu1 %v995_v25 }
 0x47e   :  { %1002 = vadd.xlane.f32.xlu1 %v1001_v58 }
 0x483   :  { %v1099_v63 = vpop.permute.xlu1 %1098 }
 0x484   :  { %4356 = vmatpush3.msra.mxu1 %v1099_v63 }
 0x485   :  { %4365 = vmatprep.subr.mxu1 %v4777_v41 }
 0x48b   :  { %v1022_v8 = vpop.permute.xlu0 %1021 }
 0x48c   :  { %4351 = vmatpush3.msra.mxu0 %v1022_v8 }
 0x48d   :  { %4360 = vmatprep.subr.mxu0 %v4777_v41 }
 0x48f   :  { %1560 = vrot.lane.b32.xlu1 %v320_v9, %s4781_s30  ;;  %v1330_v10 = vpop.permute.xlu0 %1329 }
 0x4bc   :  { %v1176_v21 = vpop.permute.xlu1 %1175 }
 0x4c9   :  { %v982_v13 = vpop.xlane.xlu0 %981 }
 0x4ca   :  { %4703 = vrcp.f32 %v982_v13 }
 0x4cd   :  { %v988_v14 = vpop.xlane.xlu0 %987 }
 0x4ce   :  { %4705 = vrcp.f32 %v988_v14 }
 0x4d1   :  { %v994_v15 = vpop.xlane.xlu0 %993 }
 0x4d2   :  { %4707 = vrcp.f32 %v994_v15 }
 0x4d4   :  { %v4704_v17 = vpop.eup %4703 }
 0x4d5   :  { %v1012_v18 = vmul.f32 %v4704_v17, %v5123_v28  ;;  %v991_v20 = vpop.xlane.xlu0 %990 }
 0x4d7   :  { %4353 = vmatmul.mubr.msk.f32.vlgmr.msra.gmra.mrb[8].mxu0 %vm931_vm4, %v1012_v18 }
 0x4d8   :  { %v4706_v22 = vpop.eup %4705  ;;  %4361 = vmatpush3.msra.mxu0 %v1176_v21  ;;  %4362 = vmatprep.mubr.msk.f32.mxu0 %vm4778_vm3, %v4777_v41 }
 0x4d9   :  { %v1014_v44 = vmul.f32 %v4706_v22, %v5127_v32  ;;  %v1000_v23 = vpop.xlane.xlu0 %999  ;;  %4370 = vmatprep.subr.mxu0 %v4777_v41  ;;  %v1253_v32 = vpop.permute.xlu1 %1252 }
 0x4da   :  { %4709 = vrcp.f32 %v1000_v23 }
 0x4db   :  { %4363 = vmatmul.mubr.msk.f32.vlgmr.msra.gmra.mrb[10].mxu0 %vm931_vm4, %v1014_v44 }
 0x4dc   :  { %v4708_v24 = vpop.eup %4707  ;;  %4371 = vmatpush3.msra.mxu0 %v1330_v10  ;;  %4372 = vmatprep.mubr.msk.f32.mxu0 %vm4778_vm3, %v4777_v41 }
 0x4dd   :  { %v1016_v27 = vmul.f32 %v4708_v24, %v5131_v34  ;;  %v1484_v28 = vpop.permute.xlu0 %1483  ;;  %4380 = vmatprep.subr.mxu0 %v4777_v41  ;;  %v1407_v16 = vpop.permute.xlu1 %1406 }
 0x4df   :  { %4373 = vmatmul.mubr.msk.f32.vlgmr.msra.gmra.mrb[12].mxu0 %vm931_vm4, %v1016_v27 }
 0x4e0   :  { %4381 = vmatpush3.msra.mxu0 %v1484_v28  ;;  %4382 = vmatprep.mubr.msk.f32.mxu0 %vm4778_vm3, %v4777_v41 }
 0x4e1   :  { %4594 = vmatprep.subr.bf16.mxu0 %v4593_v57 }
 0x4e4   :  { %v4710_v30 = vpop.eup %4709 }
 0x4e5   :  { %v1018_v31 = vmul.f32 %v4710_v30, %v5143_v47 }
 0x4e7   :  { %4383 = vmatmul.mubr.msk.f32.vlgmr.msra.gmra.mrb[14].mxu0 %vm931_vm4, %v1018_v31 }
 0x4e8   :  { %4596 = vmatpush3.bf16.msra.mxu0 %v4593_v57 }
 0x4e9   :  { %4598 = vmatprep.subr.bf16.mxu0 %v4597_v0 }
 0x4ec   :  { %4600 = vmatpush3.bf16.msra.mxu0 %v4597_v0 }
 0x503   :  { %v985_v33 = vpop.xlane.xlu1 %984 }
 0x504   :  { %4711 = vrcp.f32 %v985_v33 }
 0x505   :  { %4713 = vrcp.f32 %v991_v20 }
 0x507   :  { %v997_v34 = vpop.xlane.xlu1 %996 }
 0x508   :  { %4715 = vrcp.f32 %v997_v34 }
 0x50b   :  { %v1003_v35 = vpop.xlane.xlu1 %1002 }
 0x50c   :  { %4717 = vrcp.f32 %v1003_v35 }
 0x50e   :  { %v4712_v37 = vpop.eup %4711 }
 0x50f   :  { %v1013_v43 = vmul.f32 %v4712_v37, %v4698_v2  ;;  %v4714_v45 = vpop.eup %4713  ;;  %v1561_v53 = vpop.permute.xlu1 %1560  ;;  %v4082_v37 = vld [vmem:[%s5633_s9] ss:$0 sm:$0xff] }
 0x510   :  { %v1015_v47 = vmul.f32 %v4714_v45, %v5135_v40 }
 0x511   :  { %4358 = vmatmul.mubr.msk.f32.vlgmr.msra.gmra.mrb[10].mxu1 %vm931_vm4, %v1013_v43 }
 0x512   :  { %4366 = vmatpush3.msra.mxu1 %v1253_v32  ;;  %4367 = vmatprep.mubr.msk.f32.mxu1 %vm4778_vm3, %v4777_v41  ;;  %v4716_v50 = vpop.eup %4715 }
 0x513   :  { %4375 = vmatprep.subr.mxu1 %v4777_v41  ;;  %v1017_v51 = vmul.f32 %v4716_v50, %v5163_v6 }
 0x515   :  { %4368 = vmatmul.mubr.msk.f32.vlgmr.msra.gmra.mrb[12].mxu1 %vm931_vm4, %v1015_v47 }
 0x516   :  { %4376 = vmatpush3.msra.mxu1 %v1407_v16  ;;  %4377 = vmatprep.mubr.msk.f32.mxu1 %vm4778_vm3, %v4777_v41  ;;  %v4718_v52 = vpop.eup %4717 }
 0x517   :  { %4385 = vmatprep.subr.mxu1 %v4777_v41  ;;  %v1019_v40 = vmul.f32 %v4718_v52, %v5167_v3 }
 0x519   :  { %4378 = vmatmul.mubr.msk.f32.vlgmr.msra.gmra.mrb[14].mxu1 %vm931_vm4, %v1017_v51 }
 0x51a   :  { %4386 = vmatpush3.msra.mxu1 %v1561_v53  ;;  %4387 = vmatprep.mubr.msk.f32.mxu1 %vm4778_vm3, %v4777_v41 }
 0x51d   :  { %4388 = vmatmul.mubr.msk.f32.vlgmr.msra.gmra.mrb[16].mxu1 %vm931_vm4, %v1019_v40 }
 0x5aa   :  { %v1093_v2 = vpop.f32.mrb[8].mxu0 }
 0x5ab   :  { %v4354_v4 = vpop.f32.mrb[9].mxu0  ;;  %v1636_v10 = vsel %vm89_vm0, %v1093_v2, 0.0 }
 0x5ae   :  { %v1247_v6 = vpop.f32.mrb[10].mxu0 }
 0x5af   :  { %v4364_v25 = vpop.f32.mrb[11].mxu0  ;;  %v1639_v17 = vsel %vm89_vm0, %v1247_v6, 0.0 }
 0x5b0   :  { %v146_v25 = vld [vmem:[%s5634_s12 + $0x8] sm:$0xff] }
 0x5b2   :  { %v1401_v3 = vpop.f32.mrb[12].mxu0 }
 0x5b3   :  { %v4374_v58 = vpop.f32.mrb[13].mxu0  ;;  %v1643_v24 = vsel %vm89_vm0, %v1401_v3, 0.0 }
 0x5b4   :  { %v147_v58 = vld [vmem:[%s5634_s12 + $0x10] sm:$0xff] }
 0x5ba   :  { %v1555_v63 = vpop.f32.mrb[14].mxu0 }
 0x5bb   :  { %v4384_v8 = vpop.f32.mrb[15].mxu0  ;;  %v1646_v31 = vsel %vm89_vm0, %v1555_v63, 0.0  ;;  %v148_v63 = vld [vmem:[%s5634_s12 + $0x18] sm:$0xff] }
 0x5bc   :  { %v4605_v8 = vpack.c.bf16 %v148_v63, %v147_v58 }
 0x5e4   :  { %v1170_v9 = vpop.f32.mrb[10].mxu1 }
 0x5e5   :  { %v1637_v13 = vsel %vm89_vm0, %v1170_v9, 0.0  ;;  %v4359_v14 = vpop.f32.mrb[11].mxu1 }
 0x5e6   :  { %v1638_v15 = vadd.f32 %v1637_v13, %v1636_v10 }
 0x5e8   :  { %v1324_v18 = vpop.f32.mrb[12].mxu1  ;;  %v1640_v20 = vadd.f32 %v1639_v17, %v1638_v15 }
 0x5e9   :  { %v1641_v21 = vsel %vm89_vm0, %v1324_v18, 0.0  ;;  %v4369_v22 = vpop.f32.mrb[13].mxu1 }
 0x5ea   :  { %v1642_v44 = vadd.f32 %v1641_v21, %v1640_v20  ;;  %v4085_v20 = vld [vmem:[%s5635_s10] ss:$0 sm:$0xff] }
 0x5eb   :  { %v4086_v22 = vld [vmem:[%s5636_s11] ss:$0 sm:$0xff] }
 0x5ec   :  { %v1478_v23 = vpop.f32.mrb[14].mxu1  ;;  %4398 = vmatprep.mubr.msk.f32.mxu0 %vm89_vm0, %v1642_v44 }
 0x5ed   :  { %v1644_v27 = vsel %vm89_vm0, %v1478_v23, 0.0  ;;  %v4379_v28 = vpop.f32.mrb[15].mxu1 }
 0x5ee   :  { %v1645_v30 = vadd.f32 %v1644_v27, %v1643_v24 }
 0x5f0   :  { %v1632_v32 = vpop.f32.mrb[16].mxu1  ;;  %v1647_v16 = vadd.f32 %v1646_v31, %v1645_v30  ;;  %v150_v31 = vld [vmem:[%s5637_s14] sm:$0xff] }
 0x5f1   :  { %v1648_v33 = vsel %vm89_vm0, %v1632_v32, 0.0  ;;  %v4389_v34 = vpop.f32.mrb[17].mxu1  ;;  %v151_v32 = vld [vmem:[%s5637_s14 + $0x8] sm:$0xff] }
 0x5f2   :  { %v1649_v35 = vadd.f32 %v1648_v33, %v1647_v16  ;;  %v4609_v16 = vpack.c.bf16 %v151_v32, %v150_v31  ;;  %v152_v33 = vld [vmem:[%s5637_s14 + $0x10] sm:$0xff]  ;;  %v153_v34 = vld [vmem:[%s5637_s14 + $0x18] sm:$0xff] }
 0x5f4   :  { %4399 = vmatmul.mubr.msk.f32.vlgmr.msra.gmra.mrb[16].mxu0 %vm89_vm0, %v1649_v35  ;;  %4610 = vmatprep.subr.bf16.mxu0 %v4609_v16  ;;  %v4613_v35 = vpack.c.bf16 %v153_v34, %v152_v33 }
 0x5f5   :  { %4612 = vmatpush3.bf16.msra.mxu0 %v4609_v16 }
 0x5f6   :  { %4614 = vmatprep.subr.bf16.mxu0 %v4613_v35 }
 0x5f9   :  { %4616 = vmatpush3.bf16.msra.mxu0 %v4613_v35 }
 0x6c7   :  { %v4400_v43 = vpop.f32.mrb[16].mxu0 }
 0x6c8   :  { %v1734_v45 = vadd.f32 %v4400_v43, %v4082_v37  ;;  %v1728_v47 = vpop.f32.mrb[17].mxu0  ;;  %v155_v43 = vld [vmem:[%s5637_s14 + $0x28] sm:$0xff] }
 0x6c9   :  { %v1729_v50 = vadd.f32 %v4082_v37, %v1728_v47  ;;  %v154_v37 = vld [vmem:[%s5637_s14 + $0x20] sm:$0xff]  ;;  %v156_v47 = vld [vmem:[%s5637_s14 + $0x30] sm:$0xff] }
 0x6ca   :  { %v1738_v51 = vadd.f32 %v1734_v45, %v4938_v38  ;;  %v4617_v45 = vpack.c.bf16 %v155_v43, %v154_v37 }
 0x6cb   :  { %v1737_v52 = vadd.f32 %v1729_v50, %v4934_v36  ;;  %v145_v36 = vld [vmem:[%s5634_s12] sm:$0xff]  ;;  %v157_v50 = vld [vmem:[%s5637_s14 + $0x38] sm:$0xff] }
 0x6cc   :  { %v1742_v53 = vsel %vm89_vm0, %v1738_v51, 0.0  ;;  %v4601_v3 = vpack.c.bf16 %v146_v25, %v145_v36  ;;  %4618 = vmatprep.subr.bf16.mxu0 %v4617_v45 }
 0x6cd   :  { %1743 = vadd.xlane.f32.xlu1 %v1742_v53  ;;  %v1739_v40 = vsel %vm89_vm0, %v1737_v52, 0.0  ;;  %4620 = vmatpush3.bf16.msra.mxu0 %v4617_v45  ;;  %v4096_v45 = vld [vmem:[%s5663_s7 + $0x28] sm:$0xff] }
 0x6ce   :  { %1740 = vadd.xlane.f32.xlu0 %v1739_v40  ;;  %4602 = vmatprep.subr.bf16.mxu1 %v4601_v3 }
 0x6cf   :  { %4604 = vmatpush3.bf16.msra.mxu1 %v4601_v3 }
 0x6d0   :  { %4606 = vmatprep.subr.bf16.mxu1 %v4605_v8 }
 0x6d3   :  { %4608 = vmatpush3.bf16.msra.mxu1 %v4605_v8 }
 0x75a   :  { %v1744_v54 = vpop.xlane.xlu1 %1743 }
 0x75b   :  { %v1746_v55 = vmul.f32 0.03125, %v1744_v54  ;;  %v1741_v57 = vpop.xlane.xlu0 %1740 }
 0x75c   :  { %v1745_v46 = vmul.f32 0.03125, %v1741_v57 }
 0x75d   :  { %v1748_v62 = vsub.f32 %v1738_v51, %v1746_v55  ;;  %v4621_v51 = vpack.c.bf16 %v157_v50, %v156_v47  ;;  %v4097_v50 = vld [vmem:[%s5663_s7 + $0x30] sm:$0xff] }
 0x75e   :  { %v1747_v0 = vsub.f32 %v1737_v52, %v1745_v46  ;;  %v4087_v52 = vld [vmem:[%s5638_s13] ss:$0 sm:$0xff] }
 0x75f   :  { %v1750_v6 = vmul.f32 %v1748_v62, %v1748_v62  ;;  %4622 = vmatprep.subr.bf16.mxu0 %v4621_v51 }
 0x760   :  { %v1749_v2 = vmul.f32 %v1747_v0, %v1747_v0  ;;  %4624 = vmatpush3.bf16.msra.mxu0 %v4621_v51  ;;  %v4098_v51 = vld [vmem:[%s5663_s7 + $0x38] sm:$0xff] }
 0x761   :  { %v1754_v38 = vsel %vm89_vm0, %v1750_v6, 0.0  ;;  %4452 = vmatprep.subr.mxu0 %v4777_v41 }
 0x762   :  { %v1751_v4 = vsel %vm89_vm0, %v1749_v2, 0.0 }
 0x763   :  { %1752 = vadd.xlane.f32.xlu0 %v1751_v4 }
 0x767   :  { %1755 = vadd.xlane.f32.xlu0 %v1754_v38 }
 0x7f0   :  { %v1753_v9 = vpop.xlane.xlu0 %1752 }
 0x7f1   :  { %v1757_v10 = vmul.f32 0.03125, %v1753_v9 }
 0x7f3   :  { %v1759_v13 = vadd.f32 1e-12, %v1757_v10 }
 0x7f4   :  { %v1756_v14 = vpop.xlane.xlu0 %1755 }
 0x7f5   :  { %4719 = vrsqrt.f32 %v1759_v13  ;;  %v1758_v15 = vmul.f32 0.03125, %v1756_v14 }
 0x7f7   :  { %v1760_v17 = vadd.f32 1e-12, %v1758_v15  ;;  %v4090_v15 = vld [vmem:[%s5639_s15] ss:$0 sm:$0xff] }
 0x7f9   :  { %4721 = vrsqrt.f32 %v1760_v17 }
 0x7ff   :  { %v4720_v18 = vpop.eup %4719 }
 0x800   :  { %v1763_v21 = vmul.f32 %v4720_v18, %v1747_v0 }
 0x802   :  { %v1771_v44 = vmul.f32 %v4085_v20, %v1763_v21 }
 0x803   :  { %v4722_v23 = vpop.eup %4721 }
 0x804   :  { %v1764_v24 = vmul.f32 %v4722_v23, %v1748_v62  ;;  %v5256_v27 = vadd.f32 %v4086_v22, %v1771_v44 }
 0x806   :  { %v1772_v28 = vmul.f32 %v4085_v20, %v1764_v24  ;;  %4409 = vmatprep.mubr.msk.f32.mxu1 %vm89_vm0, %v5256_v27 }
 0x808   :  { %v1780_v30 = vadd.f32 %v4086_v22, %v1772_v28 }
 0x80a   :  { %4410 = vmatmul.mubr.msk.f32.vlgmr.msra.gmra.mrb[18].mxu1 %vm89_vm0, %v1780_v30 }
 0x8dd   :  { %v4411_v53 = vpop.f32.mrb[18].mxu1 }
 0x8de   :  { %v1865_v40 = vadd.f32 %v4411_v53, %v4087_v52  ;;  %v1859_v54 = vpop.f32.mrb[19].mxu1 }
 0x8df   :  { %v1860_v55 = vadd.f32 %v4087_v52, %v1859_v54  ;;  %v4629_v52 = vpack.c.bf16 %v4098_v51, %v4097_v50 }
 0x8e0   :  { %v1869_v57 = vmul.f32 %v1865_v40, %v1865_v40 }
 0x8e1   :  { %v1868_v46 = vmul.f32 %v1860_v55, %v1860_v55 }
 0x8e2   :  { %v1871_v62 = vmul.f32 %v1869_v57, %v1865_v40 }
 0x8e3   :  { %v1870_v0 = vmul.f32 %v1868_v46, %v1860_v55 }
 0x8e4   :  { %v1873_v2 = vmul.f32 0.044715, %v1871_v62 }
 0x8e5   :  { %v1872_v4 = vmul.f32 0.044715, %v1870_v0  ;;  %v4093_v0 = vld [vmem:[%s5640_s16] ss:$0 sm:$0xff] }
 0x8e6   :  { %v1875_v6 = vadd.f32 %v1873_v2, %v1865_v40 }
 0x8e7   :  { %v1874_v38 = vadd.f32 %v1872_v4, %v1860_v55 }
 0x8e8   :  { %v1877_v36 = vmul.f32 0.7978846, %v1875_v6  ;;  %v4094_v6 = vld [vmem:[%s5669_s2] ss:$0 sm:$0xff] }
 0x8e9   :  { %v1876_v25 = vmul.f32 0.7978846, %v1874_v38 }
 0x8ea   :  { %4723 = vtanh.f32 %v1877_v36 }
 0x8eb   :  { %4725 = vtanh.f32 %v1876_v25 }
 0x8f4   :  { %v4724_v3 = vpop.eup %4723 }
 0x8f5   :  { %v4726_v58 = vpop.eup %4725  ;;  %v1881_v63 = vadd.f32 1.0, %v4724_v3 }
 0x8f6   :  { %v1880_v8 = vadd.f32 1.0, %v4726_v58 }
 0x8f7   :  { %v1883_v9 = vmul.f32 0.5, %v1881_v63 }
 0x8f8   :  { %v1882_v10 = vmul.f32 0.5, %v1880_v8 }
 0x8f9   :  { %v1885_v14 = vmul.f32 %v1883_v9, %v1865_v40  ;;  %v4123_v9 = vld [vmem:[%s5667_s28 + $0x1] ss:$0 sm:$0xff] }
 0x8fa   :  { %v1884_v13 = vmul.f32 %v1882_v10, %v1860_v55 }
 0x8fc   :  { %4428 = vmatprep.mubr.msk.f32.mxu0 %vm1892_vm5, %v1884_v13 }
 0x8fd   :  { %4429 = vmatmul.mubr.msk.f32.vlgmr.msra.gmra.mrb[18].mxu0 %vm1892_vm5, %v1885_v14 }
 0x8fe   :  { %4454 = vmatprep.mubr.msk.f32.mxu0 %vm4778_vm3, %v4777_v41 }
 0x9d0   :  { %v4430_v17 = vpop.f32.mrb[18].mxu0 }
 0x9d1   :  { %v1971_v18 = vadd.f32 %v4430_v17, %v4090_v15  ;;  %v1965_v20 = vpop.f32.mrb[19].mxu0 }
 0x9d2   :  { %v1966_v21 = vadd.f32 %v4090_v15, %v1965_v20 }
 0x9d3   :  { %v1975_v22 = vadd.f32 %v1971_v18, %v1780_v30 }
 0x9d4   :  { %v1974_v44 = vadd.f32 %v1966_v21, %v5256_v27  ;;  %v4095_v27 = vld [vmem:[%s5663_s7 + $0x20] sm:$0xff] }
 0x9d5   :  { %v1979_v23 = vsel %vm89_vm0, %v1975_v22, 0.0  ;;  %v4625_v47 = vpack.c.bf16 %v4096_v45, %v4095_v27 }
 0x9d6   :  { %1980 = vadd.xlane.f32.xlu1 %v1979_v23  ;;  %v1976_v24 = vsel %vm89_vm0, %v1974_v44, 0.0 }
 0x9d7   :  { %1977 = vadd.xlane.f32.xlu0 %v1976_v24  ;;  %4626 = vmatprep.subr.bf16.mxu1 %v4625_v47 }
 0x9d8   :  { %4628 = vmatpush3.bf16.msra.mxu1 %v4625_v47 }
 0x9d9   :  { %4630 = vmatprep.subr.bf16.mxu1 %v4629_v52 }
 0x9dc   :  { %4632 = vmatpush3.bf16.msra.mxu1 %v4629_v52 }
 0x9dd   :  { %4442 = vmatprep.subr.mxu1 %v4777_v41 }
 0xa63   :  { %v1981_v28 = vpop.xlane.xlu1 %1980 }
 0xa64   :  { %v1983_v31 = vmul.f32 0.03125, %v1981_v28  ;;  %v1978_v32 = vpop.xlane.xlu0 %1977 }
 0xa65   :  { %v1982_v16 = vmul.f32 0.03125, %v1978_v32 }
 0xa66   :  { %v1985_v33 = vsub.f32 %v1975_v22, %v1983_v31 }
 0xa67   :  { %v1984_v34 = vsub.f32 %v1974_v44, %v1982_v16 }
 0xa68   :  { %v1987_v35 = vmul.f32 %v1985_v33, %v1985_v33 }
 0xa69   :  { %v1986_v37 = vmul.f32 %v1984_v34, %v1984_v34 }
 0xa6a   :  { %v1991_v43 = vsel %vm89_vm0, %v1987_v35, 0.0 }
 0xa6b   :  { %1992 = vadd.xlane.f32.xlu1 %v1991_v43  ;;  %v1988_v30 = vsel %vm89_vm0, %v1986_v37, 0.0 }
 0xa6c   :  { %1989 = vadd.xlane.f32.xlu0 %v1988_v30 }
 0xaf8   :  { %v1993_v53 = vpop.xlane.xlu1 %1992 }
 0xaf9   :  { %v1995_v40 = vmul.f32 0.03125, %v1993_v53  ;;  %v1990_v54 = vpop.xlane.xlu0 %1989 }
 0xafa   :  { %v1994_v55 = vmul.f32 0.03125, %v1990_v54 }
 0xafb   :  { %v1997_v57 = vadd.f32 1e-12, %v1995_v40 }
 0xafc   :  { %v1996_v46 = vadd.f32 1e-12, %v1994_v55 }
 0xafd   :  { %4727 = vrsqrt.f32 %v1997_v57 }
 0xafe   :  { %4729 = vrsqrt.f32 %v1996_v46 }
 0xb07   :  { %v4728_v62 = vpop.eup %4727 }
 0xb08   :  { %v4730_v2 = vpop.eup %4729  ;;  %v2001_v4 = vmul.f32 %v4728_v62, %v1985_v33 }
 0xb09   :  { %v2000_v38 = vmul.f32 %v4730_v2, %v1984_v34 }
 0xb0a   :  { %v2009_v36 = vmul.f32 %v4093_v0, %v2001_v4 }
 0xb0b   :  { %v2008_v25 = vmul.f32 %v4093_v0, %v2000_v38 }
 0xb0c   :  { %v5320_v3 = vadd.f32 %v4094_v6, %v2009_v36 }
 0xb0d   :  { %v5322_v58 = vadd.f32 %v4094_v6, %v2008_v25 }
 0xb0e   :  { %v3862_v63 = vrot.slane %v5320_v3, 7 }
 0xb0f   :  { %4439 = vmatprep.mubr.msk.f32.mxu1 %vm89_vm0, %v5322_v58 }
 0xb10   :  { %4440 = vmatmul.mubr.msk.f32.vlgmr.msra.gmra.mrb[20].mxu1 %vm89_vm0, %v5320_v3  ;;  %v3863_v8 = vsel %vm3857_vm1, %v3862_v63, %v5322_v58 }
 0xb11   :  { %4444 = vmatprep.mubr.msk.f32.mxu1 %vm4778_vm3, %v4777_v41  ;;  %4163 = vst.msk [vmem:[%s5666_s6 + $0x2] sm:$0x3] %vm3860_vm2, %v3863_v8 }
 0xbe3   :  { %v4441_v10 = vpop.f32.mrb[20].mxu1 }
 0xbe4   :  { %v5340_v13 = vadd.f32 %v4441_v10, %v4123_v9  ;;  %v2136_v14 = vpop.f32.mrb[21].mxu1 }
 0xbe5   :  { %v5342_v15 = vadd.f32 %v4123_v9, %v2136_v14 }
 0xbe6   :  { %2459 = vrot.lane.b32.xlu1 %v5340_v13, %s4779_s29  ;;  %v2149_v44 = vmul.f32 %v5340_v13, %v4969_v59  ;;  %v2151_v23 = vmul.f32 %v5340_v13, %v4971_v60  ;;  %v2150_v24 = vmul.f32 %v5340_v13, %v4981_v1  ;;  %v2157_v14 = vmul.f32 %v5340_v13, %v5114_v11 }
 0xbe7   :  { %2162 = vrot.lane.b32.xlu0 %v5342_v15, %s4779_s29  ;;  %v2145_v18 = vmul.f32 %v5342_v15, %v4969_v59  ;;  %v2147_v20 = vmul.f32 %v5342_v15, %v4971_v60  ;;  %v2146_v22 = vmul.f32 %v5342_v15, %v4981_v1  ;;  %v2148_v59 = vmul.f32 %v5342_v15, %v4995_v5 }
 0xbe8   :  { %v2152_v60 = vmul.f32 %v5340_v13, %v4995_v5  ;;  %v2155_v10 = vmul.f32 %v5342_v15, %v5137_v42 }
 0xc58   :  { %v2460_v21 = vpop.permute.xlu1 %2459 }
 0xc59   :  { %v2163_v17 = vpop.permute.xlu0 %2162 }
 0xc5a   :  { %4443 = vmatpush3.xpose.msk.msra.mxu1 %vm89_vm0, %v2163_v17  ;;  %4453 = vmatpush3.xpose.msk.msra.mxu0 %vm89_vm0, %v2163_v17 }
 0xc5b   :  { %4447 = vmatprep.subr.mxu1 %v4777_v41  ;;  %4462 = vmatprep.subr.mxu0 %v4777_v41 }
 0xc5d   :  { %4445 = vmatmul.mubr.msk.f32.vlgmr.msra.gmra.mrb[22].mxu1 %vm89_vm0, %v2145_v18  ;;  %4455 = vmatmul.mubr.msk.f32.vlgmr.msra.gmra.mrb[20].mxu0 %vm89_vm0, %v2147_v20 }
 0xc5e   :  { %4448 = vmatpush3.xpose.msk.msra.mxu1 %vm89_vm0, %v2163_v17  ;;  %4463 = vmatpush3.xpose.msk.msra.mxu0 %vm89_vm0, %v2460_v21 }
 0xc5f   :  { %4449 = vmatprep.mubr.msk.f32.mxu1 %vm4778_vm3, %v4777_v41  ;;  %4464 = vmatprep.mubr.msk.f32.mxu0 %vm4778_vm3, %v4777_v41 }
 0xc60   :  { %4457 = vmatprep.subr.mxu1 %v4777_v41  ;;  %4472 = vmatprep.subr.mxu0 %v4777_v41 }
 0xc61   :  { %4450 = vmatmul.mubr.msk.f32.vlgmr.msra.gmra.mrb[24].mxu1 %vm89_vm0, %v2146_v22  ;;  %4465 = vmatmul.mubr.msk.f32.vlgmr.msra.gmra.mrb[22].mxu0 %vm89_vm0, %v2149_v44 }
 0xc62   :  { %4458 = vmatpush3.xpose.msk.msra.mxu1 %vm89_vm0, %v2163_v17  ;;  %4473 = vmatpush3.xpose.msk.msra.mxu0 %vm89_vm0, %v2460_v21  ;;  %v2158_v17 = vmul.f32 %v5340_v13, %v5109_v7 }
 0xc63   :  { %4459 = vmatprep.mubr.msk.f32.mxu1 %vm4778_vm3, %v4777_v41  ;;  %4474 = vmatprep.mubr.msk.f32.mxu0 %vm4778_vm3, %v4777_v41 }
 0xc64   :  { %4467 = vmatprep.subr.mxu1 %v4777_v41  ;;  %4482 = vmatprep.subr.mxu0 %v4777_v41 }
 0xc65   :  { %4460 = vmatmul.mubr.msk.f32.vlgmr.msra.gmra.mrb[26].mxu1 %vm89_vm0, %v2148_v59  ;;  %4475 = vmatmul.mubr.msk.f32.vlgmr.msra.gmra.mrb[24].mxu0 %vm89_vm0, %v2151_v23 }
 0xc66   :  { %4468 = vmatpush3.xpose.msk.msra.mxu1 %vm89_vm0, %v2460_v21  ;;  %4469 = vmatprep.mubr.msk.f32.mxu1 %vm4778_vm3, %v4777_v41 }
 0xc67   :  { %4477 = vmatprep.subr.mxu1 %v4777_v41  ;;  %4484 = vmatprep.mubr.msk.f32.mxu0 %vm4778_vm3, %v4777_v41 }
 0xc69   :  { %4470 = vmatmul.mubr.msk.f32.vlgmr.msra.gmra.mrb[28].mxu1 %vm89_vm0, %v2150_v24 }
 0xc6a   :  { %4478 = vmatpush3.xpose.msk.msra.mxu1 %vm89_vm0, %v2460_v21  ;;  %4479 = vmatprep.mubr.msk.f32.mxu1 %vm4778_vm3, %v4777_v41 }
 0xc6b   :  { %4487 = vmatprep.subr.mxu1 %v4777_v41 }
 0xc6d   :  { %4480 = vmatmul.mubr.msk.f32.vlgmr.msra.gmra.mrb[30].mxu1 %vm89_vm0, %v2152_v60 }
 0xc6e   :  { %4489 = vmatprep.mubr.msk.f32.mxu1 %vm4778_vm3, %v4777_v41 }
 0xd30   :  { %v2235_v1 = vpop.f32.mrb[22].mxu1  ;;  %v2381_v28 = vpop.f32.mrb[20].mxu0 }
 0xd31   :  { %v2755_v31 = vmul.f32 0.35355338, %v2235_v1  ;;  %v4446_v32 = vpop.f32.mrb[23].mxu1  ;;  %v4456_v16 = vpop.f32.mrb[21].mxu0  ;;  %v2757_v5 = vmul.f32 0.35355338, %v2381_v28 }
 0xd33   :  { %v2763_v33 = vadd.f32 %v2755_v31, %v5036_v12  ;;  %v2765_v12 = vadd.f32 %v2757_v5, %v5054_v26 }
 0xd34   :  { %v2308_v34 = vpop.f32.mrb[24].mxu1  ;;  %v2532_v35 = vpop.f32.mrb[22].mxu0 }
 0xd35   :  { %v2756_v37 = vmul.f32 0.35355338, %v2308_v34  ;;  %v4451_v43 = vpop.f32.mrb[25].mxu1  ;;  %v4466_v30 = vpop.f32.mrb[23].mxu0  ;;  %v2771_v27 = vsel %vm931_vm4, %v2763_v33, -inf }
 0xd36   :  { %2772 = vmax.xlane.f32.xlu1 %v2771_v27  ;;  %v2759_v40 = vmul.f32 0.35355338, %v2532_v35 }
 0xd37   :  { %v2764_v45 = vadd.f32 %v2756_v37, %v5044_v19  ;;  %v2777_v19 = vsel %vm931_vm4, %v2765_v12, -inf }
 0xd38   :  { %v2454_v47 = vpop.f32.mrb[26].mxu1  ;;  %v2678_v50 = vpop.f32.mrb[24].mxu0  ;;  %v2767_v4 = vadd.f32 %v2759_v40, %v5068_v39 }
 0xd39   :  { %v2758_v51 = vmul.f32 0.35355338, %v2454_v47  ;;  %v4461_v52 = vpop.f32.mrb[27].mxu1  ;;  %v4476_v53 = vpop.f32.mrb[25].mxu0  ;;  %v2774_v54 = vsel %vm931_vm4, %v2764_v45, -inf }
 0xd3a   :  { %2775 = vmax.xlane.f32.xlu0 %v2774_v54  ;;  %v2761_v2 = vmul.f32 0.35355338, %v2678_v50 }
 0xd3b   :  { %v2766_v55 = vadd.f32 %v2758_v51, %v5059_v29  ;;  %v2783_v29 = vsel %vm931_vm4, %v2767_v4, -inf }
 0xd3c   :  { %v2605_v57 = vpop.f32.mrb[28].mxu1  ;;  %v2769_v63 = vadd.f32 %v2761_v2, %v5076_v49  ;;  %v2153_v49 = vmul.f32 %v5342_v15, %v5114_v11 }
 0xd3d   :  { %v2760_v46 = vmul.f32 0.35355338, %v2605_v57  ;;  %v4471_v62 = vpop.f32.mrb[29].mxu1  ;;  %v2780_v0 = vsel %vm931_vm4, %v2766_v55, -inf }
 0xd3e   :  { %2781 = vmax.xlane.f32.xlu1 %v2780_v0  ;;  %2778 = vmax.xlane.f32.xlu0 %v2777_v19  ;;  %v2789_v39 = vsel %vm931_vm4, %v2769_v63, -inf }
 0xd3f   :  { %v2768_v6 = vadd.f32 %v2760_v46, %v5088_v56  ;;  %v2154_v56 = vmul.f32 %v5342_v15, %v5109_v7 }
 0xd40   :  { %v2751_v38 = vpop.f32.mrb[30].mxu1 }
 0xd41   :  { %v2762_v36 = vmul.f32 0.35355338, %v2751_v38  ;;  %v4481_v26 = vpop.f32.mrb[31].mxu1  ;;  %v2786_v25 = vsel %vm931_vm4, %v2768_v6, -inf  ;;  %v2159_v38 = vmul.f32 %v5340_v13, %v5137_v42 }
 0xd42   :  { %2787 = vmax.xlane.f32.xlu1 %v2786_v25  ;;  %2784 = vmax.xlane.f32.xlu0 %v2783_v29 }
 0xd43   :  { %v2770_v8 = vadd.f32 %v2762_v36, %v5096_v61  ;;  %v2156_v61 = vmul.f32 %v5342_v15, %v5146_v48 }
 0xd45   :  { %v2792_v9 = vsel %vm931_vm4, %v2770_v8, -inf }
 0xd46   :  { %2793 = vmax.xlane.f32.xlu1 %v2792_v9  ;;  %2790 = vmax.xlane.f32.xlu0 %v2789_v39 }
 0xd57   :  { %2937 = vrot.lane.b32.xlu1 %v2154_v56, %s4781_s30 }
 0xd5b   :  { %3014 = vrot.lane.b32.xlu1 %v2155_v10, %s4781_s30 }
 0xd5c   :  { %2860 = vrot.lane.b32.xlu0 %v2153_v49, %s4781_s30 }
 0xd5f   :  { %3091 = vrot.lane.b32.xlu1 %v2156_v61, %s4781_s30 }
 0xd60   :  { %3168 = vrot.lane.b32.xlu0 %v2157_v14, %s4781_s30 }
 0xd63   :  { %3245 = vrot.lane.b32.xlu1 %v2158_v17, %s4781_s30 }
 0xdc3   :  { %v2773_v18 = vpop.xlane.xlu1 %2772 }
 0xdc4   :  { %v2795_v20 = vsub.f32 %v2763_v33, %v2773_v18 }
 0xdc6   :  { %v2803_v21 = vmul.f32 1.442695, %v2795_v20 }
 0xdc7   :  { %v2776_v22 = vpop.xlane.xlu0 %2775 }
 0xdc8   :  { %4731 = vpow2.f32 %v2803_v21  ;;  %v2796_v44 = vsub.f32 %v2764_v45, %v2776_v22 }
 0xdca   :  { %v2805_v59 = vmul.f32 1.442695, %v2796_v44 }
 0xdcb   :  { %v2782_v15 = vpop.xlane.xlu1 %2781  ;;  %v2779_v23 = vpop.xlane.xlu0 %2778 }
 0xdcc   :  { %v2798_v24 = vsub.f32 %v2766_v55, %v2782_v15  ;;  %4733 = vpow2.f32 %v2805_v59  ;;  %v2797_v60 = vsub.f32 %v2765_v12, %v2779_v23 }
 0xdce   :  { %v2809_v11 = vmul.f32 1.442695, %v2798_v24  ;;  %v2807_v1 = vmul.f32 1.442695, %v2797_v60 }
 0xdcf   :  { %v2788_v28 = vpop.xlane.xlu1 %2787  ;;  %v2785_v31 = vpop.xlane.xlu0 %2784 }
 0xdd0   :  { %4735 = vpow2.f32 %v2809_v11  ;;  %v2800_v7 = vsub.f32 %v2768_v6, %v2788_v28  ;;  %v2799_v32 = vsub.f32 %v2767_v4, %v2785_v31  ;;  %v2160_v6 = vmul.f32 %v5340_v13, %v5146_v48  ;;  %v4100_v31 = vld [vmem:[%s5632_s8 + $0x20] sm:$0xff] }
 0xdd1   :  { %4737 = vpow2.f32 %v2807_v1 }
 0xdd2   :  { %v2813_v16 = vmul.f32 1.442695, %v2800_v7  ;;  %v4732_v33 = vpop.eup %4731  ;;  %v2811_v34 = vmul.f32 1.442695, %v2799_v32  ;;  %v4101_v7 = vld [vmem:[%s5632_s8 + $0x28] sm:$0xff] }
 0xdd3   :  { %v2794_v35 = vpop.xlane.xlu1 %2793  ;;  %v2791_v37 = vpop.xlane.xlu0 %2790  ;;  %v2819_v30 = vsel %vm931_vm4, %v4732_v33, 0.0  ;;  %v4633_v32 = vpack.c.bf16 %v4101_v7, %v4100_v31 }
 0xdd4   :  { %4739 = vpow2.f32 %v2813_v16  ;;  %v2802_v43 = vsub.f32 %v2770_v8, %v2794_v35  ;;  %v2801_v5 = vsub.f32 %v2769_v63, %v2791_v37  ;;  %2820 = vadd.xlane.f32.xlu0 %v2819_v30  ;;  %v4102_v16 = vld [vmem:[%s5632_s8 + $0x30] sm:$0xff] }
 0xdd5   :  { %4741 = vpow2.f32 %v2811_v34 }
 0xdd6   :  { %v2817_v27 = vmul.f32 1.442695, %v2802_v43  ;;  %v4734_v45 = vpop.eup %4733  ;;  %v2815_v47 = vmul.f32 1.442695, %v2801_v5 }
 0xdd7   :  { %v2938_v50 = vpop.permute.xlu1 %2937  ;;  %v2861_v51 = vpop.permute.xlu0 %2860  ;;  %v2822_v52 = vsel %vm931_vm4, %v4734_v45, 0.0 }
 0xdd8   :  { %4743 = vpow2.f32 %v2817_v27  ;;  %4488 = vmatpush3.msra.mxu1 %v2938_v50  ;;  %4483 = vmatpush3.msra.mxu0 %v2861_v51 }
 0xdd9   :  { %4745 = vpow2.f32 %v2815_v47  ;;  %2823 = vadd.xlane.f32.xlu1 %v2822_v52  ;;  %4492 = vmatprep.subr.mxu0 %v4777_v41 }
 0xdda   :  { %v4736_v53 = vpop.eup %4735  ;;  %4497 = vmatprep.subr.mxu1 %v4777_v41 }
 0xddb   :  { %v4738_v40 = vpop.eup %4737  ;;  %v2828_v54 = vsel %vm931_vm4, %v4736_v53, 0.0  ;;  %v3015_v36 = vpop.permute.xlu1 %3014 }
 0xddc   :  { %v2825_v12 = vsel %vm931_vm4, %v4738_v40, 0.0  ;;  %v3169_v25 = vpop.permute.xlu0 %3168 }
 0xddd   :  { %2826 = vadd.xlane.f32.xlu0 %v2825_v12  ;;  %2829 = vadd.xlane.f32.xlu1 %v2828_v54 }
 0xdde   :  { %v4740_v55 = vpop.eup %4739 }
 0xddf   :  { %v4742_v57 = vpop.eup %4741  ;;  %v2834_v46 = vsel %vm931_vm4, %v4740_v55, 0.0  ;;  %v3092_v26 = vpop.permute.xlu1 %3091 }
 0xde0   :  { %v2831_v62 = vsel %vm931_vm4, %v4742_v57, 0.0 }
 0xde1   :  { %2832 = vadd.xlane.f32.xlu0 %v2831_v62  ;;  %2835 = vadd.xlane.f32.xlu1 %v2834_v46 }
 0xde2   :  { %v5446_v0 = vpop.eup %4743 }
 0xde3   :  { %v5448_v2 = vpop.eup %4745  ;;  %v2840_v19 = vsel %vm931_vm4, %v5446_v0, 0.0  ;;  %v3246_v29 = vpop.permute.xlu1 %3245 }
 0xde4   :  { %v2837_v4 = vsel %vm931_vm4, %v5448_v2, 0.0 }
 0xde5   :  { %2838 = vadd.xlane.f32.xlu0 %v2837_v4  ;;  %2841 = vadd.xlane.f32.xlu1 %v2840_v19 }
 0xdf6   :  { %3399 = vrot.lane.b32.xlu1 %v2160_v6, %s4781_s30 }
 0xdfb   :  { %3322 = vrot.lane.b32.xlu0 %v2159_v38, %s4781_s30 }
 0xe61   :  { %v2821_v63 = vpop.xlane.xlu0 %2820 }
 0xe62   :  { %4747 = vrcp.f32 %v2821_v63 }
 0xe66   :  { %v2824_v8 = vpop.xlane.xlu1 %2823 }
 0xe67   :  { %4749 = vrcp.f32 %v2824_v8  ;;  %v4150_v8 = vld [vmem:[%s5633_s9 + $0x1] ss:$0 sm:$0xff] }
 0xe6a   :  { %v2827_v9 = vpop.xlane.xlu0 %2826  ;;  %v2830_v39 = vpop.xlane.xlu1 %2829 }
 0xe6b   :  { %4751 = vrcp.f32 %v2827_v9 }
 0xe6c   :  { %4753 = vrcp.f32 %v2830_v39  ;;  %v4748_v48 = vpop.eup %4747 }
 0xe6d   :  { %v2851_v56 = vmul.f32 %v4748_v48, %v4732_v33  ;;  %v4103_v33 = vld [vmem:[%s5632_s8 + $0x38] sm:$0xff] }
 0xe6e   :  { %v2833_v10 = vpop.xlane.xlu0 %2832  ;;  %v2836_v49 = vpop.xlane.xlu1 %2835  ;;  %v4637_v34 = vpack.c.bf16 %v4103_v33, %v4102_v16 }
 0xe6f   :  { %4755 = vrcp.f32 %v2833_v10  ;;  %4485 = vmatmul.mubr.msk.f32.vlgmr.msra.gmra.mrb[26].mxu0 %vm931_vm4, %v2851_v56 }
 0xe70   :  { %4757 = vrcp.f32 %v2836_v49  ;;  %4493 = vmatpush3.msra.mxu0 %v3015_v36  ;;  %4494 = vmatprep.mubr.msk.f32.mxu0 %vm4778_vm3, %v4777_v41 }
 0xe71   :  { %v4750_v42 = vpop.eup %4749  ;;  %4502 = vmatprep.subr.mxu0 %v4777_v41 }
 0xe72   :  { %v2852_v13 = vmul.f32 %v4750_v42, %v4734_v45  ;;  %v2839_v61 = vpop.xlane.xlu0 %2838  ;;  %v2842_v14 = vpop.xlane.xlu1 %2841 }
 0xe73   :  { %4759 = vrcp.f32 %v2839_v61 }
 0xe74   :  { %4761 = vrcp.f32 %v2842_v14  ;;  %4490 = vmatmul.mubr.msk.f32.vlgmr.msra.gmra.mrb[32].mxu1 %vm931_vm4, %v2852_v13 }
 0xe75   :  { %v4752_v17 = vpop.eup %4751  ;;  %4498 = vmatpush3.msra.mxu1 %v3092_v26  ;;  %4499 = vmatprep.mubr.msk.f32.mxu1 %vm4778_vm3, %v4777_v41 }
 0xe76   :  { %v4754_v18 = vpop.eup %4753  ;;  %v2853_v20 = vmul.f32 %v4752_v17, %v4738_v40  ;;  %4507 = vmatprep.subr.mxu1 %v4777_v41  ;;  %v3323_v23 = vpop.permute.xlu0 %3322 }
 0xe77   :  { %v2854_v21 = vmul.f32 %v4754_v18, %v4736_v53  ;;  %v3400_v60 = vpop.permute.xlu1 %3399 }
 0xe78   :  { %4495 = vmatmul.mubr.msk.f32.vlgmr.msra.gmra.mrb[28].mxu0 %vm931_vm4, %v2853_v20 }
 0xe79   :  { %v4756_v22 = vpop.eup %4755  ;;  %4500 = vmatmul.mubr.msk.f32.vlgmr.msra.gmra.mrb[34].mxu1 %vm931_vm4, %v2854_v21  ;;  %4503 = vmatpush3.msra.mxu0 %v3169_v25 }
 0xe7a   :  { %v4758_v44 = vpop.eup %4757  ;;  %v2855_v59 = vmul.f32 %v4756_v22, %v4742_v57  ;;  %4508 = vmatpush3.msra.mxu1 %v3246_v29  ;;  %4504 = vmatprep.mubr.msk.f32.mxu0 %vm4778_vm3, %v4777_v41 }
 0xe7b   :  { %v2856_v15 = vmul.f32 %v4758_v44, %v4740_v55  ;;  %4509 = vmatprep.mubr.msk.f32.mxu1 %vm4778_vm3, %v4777_v41  ;;  %4512 = vmatprep.subr.mxu0 %v4777_v41 }
 0xe7c   :  { %4517 = vmatprep.subr.mxu1 %v4777_v41  ;;  %4505 = vmatmul.mubr.msk.f32.vlgmr.msra.gmra.mrb[30].mxu0 %vm931_vm4, %v2855_v59 }
 0xe7d   :  { %v4760_v24 = vpop.eup %4759  ;;  %4510 = vmatmul.mubr.msk.f32.vlgmr.msra.gmra.mrb[36].mxu1 %vm931_vm4, %v2856_v15  ;;  %4513 = vmatpush3.msra.mxu0 %v3323_v23  ;;  %v4108_v15 = vld [vmem:[%s5634_s12 + $0x28] sm:$0xff] }
 0xe7e   :  { %v4762_v11 = vpop.eup %4761  ;;  %v2857_v1 = vmul.f32 %v4760_v24, %v5448_v2  ;;  %4518 = vmatpush3.msra.mxu1 %v3400_v60  ;;  %4514 = vmatprep.mubr.msk.f32.mxu0 %vm4778_vm3, %v4777_v41  ;;  %v4109_v24 = vld [vmem:[%s5634_s12 + $0x30] sm:$0xff]  ;;  %v4110_v60 = vld [vmem:[%s5634_s12 + $0x38] sm:$0xff] }
 0xe7f   :  { %v2858_v28 = vmul.f32 %v4762_v11, %v5446_v0  ;;  %4519 = vmatprep.mubr.msk.f32.mxu1 %vm4778_vm3, %v4777_v41  ;;  %4634 = vmatprep.subr.bf16.mxu0 %v4633_v32  ;;  %v4645_v11 = vpack.c.bf16 %v4110_v60, %v4109_v24 }
 0xe80   :  { %4515 = vmatmul.mubr.msk.f32.vlgmr.msra.gmra.mrb[32].mxu0 %vm931_vm4, %v2857_v1 }
 0xe81   :  { %4520 = vmatmul.mubr.msk.f32.vlgmr.msra.gmra.mrb[38].mxu1 %vm931_vm4, %v2858_v28  ;;  %4636 = vmatpush3.bf16.msra.mxu0 %v4633_v32 }
 0xe82   :  { %4638 = vmatprep.subr.bf16.mxu0 %v4637_v34 }
 0xe85   :  { %4640 = vmatpush3.bf16.msra.mxu0 %v4637_v34  ;;  %v4153_v34 = vld [vmem:[%s5635_s10 + $0x1] ss:$0 sm:$0xff] }
 0xf42   :  { %v2932_v35 = vpop.f32.mrb[26].mxu0 }
 0xf43   :  { %v4486_v37 = vpop.f32.mrb[27].mxu0  ;;  %v3475_v30 = vsel %vm89_vm0, %v2932_v35, 0.0 }
 0xf44   :  { %v4154_v37 = vld [vmem:[%s5636_s11 + $0x1] ss:$0 sm:$0xff] }
 0xf47   :  { %v3009_v43 = vpop.f32.mrb[32].mxu1 }
 0xf48   :  { %v3476_v5 = vsel %vm89_vm0, %v3009_v43, 0.0  ;;  %v4491_v27 = vpop.f32.mrb[33].mxu1 }
 0xf49   :  { %v3477_v45 = vadd.f32 %v3476_v5, %v3475_v30 }
 0xf4b   :  { %v3086_v47 = vpop.f32.mrb[28].mxu0 }
 0xf4c   :  { %v3478_v50 = vsel %vm89_vm0, %v3086_v47, 0.0  ;;  %v3163_v51 = vpop.f32.mrb[34].mxu1  ;;  %v4496_v52 = vpop.f32.mrb[29].mxu0 }
 0xf4d   :  { %v3479_v53 = vadd.f32 %v3478_v50, %v3477_v45  ;;  %v4501_v40 = vpop.f32.mrb[35].mxu1  ;;  %v3480_v54 = vsel %vm89_vm0, %v3163_v51, 0.0  ;;  %v4112_v50 = vld [vmem:[%s5637_s14 + $0x40] sm:$0xff]  ;;  %v4113_v51 = vld [vmem:[%s5637_s14 + $0x48] sm:$0xff] }
 0xf4e   :  { %v4649_v52 = vpack.c.bf16 %v4113_v51, %v4112_v50  ;;  %v4115_v40 = vld [vmem:[%s5637_s14 + $0x58] sm:$0xff] }
 0xf4f   :  { %v3481_v12 = vadd.f32 %v3480_v54, %v3479_v53  ;;  %v3240_v55 = vpop.f32.mrb[30].mxu0  ;;  %v4114_v53 = vld [vmem:[%s5637_s14 + $0x50] sm:$0xff] }
 0xf50   :  { %v3482_v57 = vsel %vm89_vm0, %v3240_v55, 0.0  ;;  %v3317_v46 = vpop.f32.mrb[36].mxu1  ;;  %v4506_v62 = vpop.f32.mrb[31].mxu0  ;;  %4650 = vmatprep.subr.bf16.mxu0 %v4649_v52  ;;  %v4653_v54 = vpack.c.bf16 %v4115_v40, %v4114_v53  ;;  %v4117_v55 = vld [vmem:[%s5637_s14 + $0x68] sm:$0xff] }
 0xf51   :  { %v3483_v0 = vsel %vm89_vm0, %v3317_v46, 0.0  ;;  %v4511_v2 = vpop.f32.mrb[37].mxu1  ;;  %4530 = vmatprep.mubr.msk.f32.mxu0 %vm89_vm0, %v3481_v12  ;;  %v4116_v12 = vld [vmem:[%s5637_s14 + $0x60] sm:$0xff]  ;;  %v4118_v46 = vld [vmem:[%s5637_s14 + $0x70] sm:$0xff]  ;;  %v4119_v62 = vld [vmem:[%s5637_s14 + $0x78] sm:$0xff] }
 0xf52   :  { %v3484_v19 = vadd.f32 %v3483_v0, %v3482_v57  ;;  %v4657_v57 = vpack.c.bf16 %v4117_v55, %v4116_v12  ;;  %v4661_v0 = vpack.c.bf16 %v4119_v62, %v4118_v46  ;;  %v4155_v2 = vld [vmem:[%s5638_s13 + $0x1] ss:$0 sm:$0xff] }
 0xf53   :  { %v3394_v4 = vpop.f32.mrb[32].mxu0 }
 0xf54   :  { %v3485_v6 = vsel %vm89_vm0, %v3394_v4, 0.0  ;;  %v3471_v38 = vpop.f32.mrb[38].mxu1  ;;  %v4516_v36 = vpop.f32.mrb[33].mxu0 }
 0xf55   :  { %v3486_v26 = vadd.f32 %v3485_v6, %v3484_v19  ;;  %v4521_v25 = vpop.f32.mrb[39].mxu1  ;;  %v3487_v29 = vsel %vm89_vm0, %v3471_v38, 0.0 }
 0xf57   :  { %v3488_v63 = vadd.f32 %v3487_v29, %v3486_v26 }
 0xf59   :  { %4531 = vmatmul.mubr.msk.f32.vlgmr.msra.gmra.mrb[34].mxu0 %vm89_vm0, %v3488_v63 }
 0xf5a   :  { %4652 = vmatpush3.bf16.msra.mxu0 %v4649_v52 }
 0xf5b   :  { %4654 = vmatprep.subr.bf16.mxu0 %v4653_v54 }
 0xf5e   :  { %4656 = vmatpush3.bf16.msra.mxu0 %v4653_v54  ;;  %v4161_v54 = vld [vmem:[%s5640_s16 + $0x1] ss:$0 sm:$0xff] }
 0xf5f   :  { %4658 = vmatprep.subr.bf16.mxu0 %v4657_v57 }
 0xf62   :  { %4660 = vmatpush3.bf16.msra.mxu0 %v4657_v57  ;;  %v4162_v57 = vld [vmem:[%s5669_s2 + $0x1] ss:$0 sm:$0xff] }
 0xf63   :  { %4662 = vmatprep.subr.bf16.mxu0 %v4661_v0 }
 0xf66   :  { %4664 = vmatpush3.bf16.msra.mxu0 %v4661_v0 }
0x102c   :  { %v4532_v9 = vpop.f32.mrb[34].mxu0 }
0x102d   :  { %v3573_v39 = vadd.f32 %v4532_v9, %v4150_v8  ;;  %v3567_v48 = vpop.f32.mrb[35].mxu0 }
0x102e   :  { %v3568_v56 = vadd.f32 %v4150_v8, %v3567_v48 }
0x102f   :  { %v3577_v10 = vadd.f32 %v3573_v39, %v5320_v3 }
0x1030   :  { %v3576_v49 = vadd.f32 %v3568_v56, %v5322_v58  ;;  %v4107_v58 = vld [vmem:[%s5634_s12 + $0x20] sm:$0xff] }
0x1031   :  { %v3581_v42 = vsel %vm89_vm0, %v3577_v10, 0.0  ;;  %v4641_v23 = vpack.c.bf16 %v4108_v15, %v4107_v58 }
0x1032   :  { %3582 = vadd.xlane.f32.xlu1 %v3581_v42  ;;  %v3578_v13 = vsel %vm89_vm0, %v3576_v49, 0.0 }
0x1033   :  { %3579 = vadd.xlane.f32.xlu0 %v3578_v13  ;;  %4642 = vmatprep.subr.bf16.mxu1 %v4641_v23 }
0x1034   :  { %4644 = vmatpush3.bf16.msra.mxu1 %v4641_v23 }
0x1035   :  { %4646 = vmatprep.subr.bf16.mxu1 %v4645_v11 }
0x1038   :  { %4648 = vmatpush3.bf16.msra.mxu1 %v4645_v11 }
0x10bf   :  { %v3583_v61 = vpop.xlane.xlu1 %3582 }
0x10c0   :  { %v3585_v14 = vmul.f32 0.03125, %v3583_v61  ;;  %v3580_v17 = vpop.xlane.xlu0 %3579 }
0x10c1   :  { %v3584_v18 = vmul.f32 0.03125, %v3580_v17 }
0x10c2   :  { %v3587_v20 = vsub.f32 %v3577_v10, %v3585_v14 }
0x10c3   :  { %v3586_v21 = vsub.f32 %v3576_v49, %v3584_v18 }
0x10c4   :  { %v3589_v59 = vmul.f32 %v3587_v20, %v3587_v20 }
0x10c5   :  { %v3588_v22 = vmul.f32 %v3586_v21, %v3586_v21 }
0x10c6   :  { %v3593_v3 = vsel %vm89_vm0, %v3589_v59, 0.0 }
0x10c7   :  { %v3590_v44 = vsel %vm89_vm0, %v3588_v22, 0.0 }
0x10c8   :  { %3591 = vadd.xlane.f32.xlu0 %v3590_v44 }
0x10cc   :  { %3594 = vadd.xlane.f32.xlu0 %v3593_v3 }
0x1155   :  { %v3592_v1 = vpop.xlane.xlu0 %3591 }
0x1156   :  { %v3596_v28 = vmul.f32 0.03125, %v3592_v1 }
0x1158   :  { %v3598_v31 = vadd.f32 1e-12, %v3596_v28 }
0x1159   :  { %v3595_v7 = vpop.xlane.xlu0 %3594 }
0x115a   :  { %4763 = vrsqrt.f32 %v3598_v31  ;;  %v3597_v32 = vmul.f32 0.03125, %v3595_v7 }
0x115c   :  { %v3599_v16 = vadd.f32 1e-12, %v3597_v32 }
0x115e   :  { %4765 = vrsqrt.f32 %v3599_v16 }
0x1164   :  { %v4764_v33 = vpop.eup %4763 }
0x1165   :  { %v3602_v35 = vmul.f32 %v4764_v33, %v3586_v21 }
0x1167   :  { %v3610_v43 = vmul.f32 %v4153_v34, %v3602_v35  ;;  %v3875_v35 = vld [vmem:[%s5642_s18 + $0x8] sm:$0xff] }
0x1168   :  { %v4766_v30 = vpop.eup %4765 }
0x1169   :  { %v3603_v5 = vmul.f32 %v4766_v30, %v3587_v20  ;;  %v3618_v27 = vadd.f32 %v4154_v37, %v3610_v43  ;;  %v4158_v20 = vld [vmem:[%s5639_s15 + $0x1] ss:$0 sm:$0xff]  ;;  %v4782_v43 = vmov 0.0|0.0  }
0x116a   :  { %4665 = vmatprep.subr.bf16.mxu1 %v4782_v43 }
0x116b   :  { %v3611_v45 = vmul.f32 %v4153_v34, %v3603_v5  ;;  %4541 = vmatprep.mubr.msk.f32.mxu1 %vm89_vm0, %v3618_v27  ;;  %v3874_v34 = vld [vmem:[%s5642_s18] sm:$0xff]  ;;  %v3877_v5 = vld [vmem:[%s5642_s18 + $0x18] sm:$0xff] }
0x116c   :  { %v4666_v30 = vpack.c.bf16 %v3875_v35, %v3874_v34 }
0x116d   :  { %v3619_v47 = vadd.f32 %v4154_v37, %v3611_v45  ;;  %v3876_v37 = vld [vmem:[%s5642_s18 + $0x10] sm:$0xff] }
0x116f   :  { %4542 = vmatmul.mubr.msk.f32.vlgmr.msra.gmra.mrb[40].mxu1 %vm89_vm0, %v3619_v47 }
0x1170   :  { %4571 = vmatprep.mubr.msk.f32.mxu1 %vm4778_vm3, %v4777_v41  ;;  %4667 = vmatpush3.bf16.msra.mxu1 %v4666_v30 }
0x1171   :  { %4668 = vmatprep.subr.bf16.mxu1 %v4782_v43 }
0x1242   :  { %v4543_v19 = vpop.f32.mrb[40].mxu1 }
0x1243   :  { %v3704_v4 = vadd.f32 %v4543_v19, %v4155_v2  ;;  %v3698_v6 = vpop.f32.mrb[41].mxu1 }
0x1244   :  { %v3699_v38 = vadd.f32 %v4155_v2, %v3698_v6 }
0x1245   :  { %v3708_v36 = vmul.f32 %v3704_v4, %v3704_v4 }
0x1246   :  { %v3707_v26 = vmul.f32 %v3699_v38, %v3699_v38 }
0x1247   :  { %v3710_v25 = vmul.f32 %v3708_v36, %v3704_v4  ;;  %v3959_v36 = vld [vmem:[%s5643_s20 + $0x8] sm:$0xff] }
0x1248   :  { %v3709_v29 = vmul.f32 %v3707_v26, %v3699_v38  ;;  %v3960_v26 = vld [vmem:[%s5643_s20 + $0x10] sm:$0xff] }
0x1249   :  { %v3712_v63 = vmul.f32 0.044715, %v3710_v25 }
0x124a   :  { %v3711_v8 = vmul.f32 0.044715, %v3709_v29  ;;  %v3961_v29 = vld [vmem:[%s5643_s20 + $0x18] sm:$0xff] }
0x124b   :  { %v3714_v9 = vadd.f32 %v3712_v63, %v3704_v4  ;;  %v4675_v63 = vpack.c.bf16 %v3961_v29, %v3960_v26 }
0x124c   :  { %v3713_v39 = vadd.f32 %v3711_v8, %v3699_v38 }
0x124d   :  { %v3716_v48 = vmul.f32 0.7978846, %v3714_v9 }
0x124e   :  { %v3715_v56 = vmul.f32 0.7978846, %v3713_v39 }
0x124f   :  { %4767 = vtanh.f32 %v3716_v48 }
0x1250   :  { %4769 = vtanh.f32 %v3715_v56  ;;  %v4167_v56 = vld [vmem:[%s5645_s21] ss:$0 sm:$0xff] }
0x1259   :  { %v4768_v10 = vpop.eup %4767 }
0x125a   :  { %v4770_v49 = vpop.eup %4769  ;;  %v3720_v42 = vadd.f32 1.0, %v4768_v10 }
0x125b   :  { %v3719_v13 = vadd.f32 1.0, %v4770_v49 }
0x125c   :  { %v3722_v61 = vmul.f32 0.5, %v3720_v42 }
0x125d   :  { %v3721_v14 = vmul.f32 0.5, %v3719_v13 }
0x125e   :  { %v3724_v18 = vmul.f32 %v3722_v61, %v3704_v4 }
0x125f   :  { %v3723_v17 = vmul.f32 %v3721_v14, %v3699_v38  ;;  %v3958_v38 = vld [vmem:[%s5643_s20] sm:$0xff] }
0x1260   :  { %v4672_v25 = vpack.c.bf16 %v3959_v36, %v3958_v38 }
0x1261   :  { %4560 = vmatprep.mubr.msk.f32.mxu0 %vm1892_vm5, %v3723_v17 }
0x1262   :  { %4561 = vmatmul.mubr.msk.f32.vlgmr.msra.gmra.mrb[36].mxu0 %vm1892_vm5, %v3724_v18 }
0x1335   :  { %v4562_v21 = vpop.f32.mrb[36].mxu0 }
0x1336   :  { %v3809_v22 = vadd.f32 %v4562_v21, %v4158_v20  ;;  %v3803_v44 = vpop.f32.mrb[37].mxu0 }
0x1337   :  { %v3804_v59 = vadd.f32 %v4158_v20, %v3803_v44 }
0x1338   :  { %v3813_v3 = vadd.f32 %v3809_v22, %v3619_v47 }
0x1339   :  { %v3812_v58 = vadd.f32 %v3804_v59, %v3618_v27  ;;  %v4669_v27 = vpack.c.bf16 %v3877_v5, %v3876_v37 }
0x133a   :  { %v3817_v15 = vsel %vm89_vm0, %v3813_v3, 0.0 }
0x133b   :  { %3818 = vadd.xlane.f32.xlu0 %v3817_v15  ;;  %v3814_v23 = vsel %vm89_vm0, %v3812_v58, 0.0  ;;  %4670 = vmatpush3.bf16.msra.mxu1 %v4669_v27 }
0x133c   :  { %3815 = vadd.xlane.f32.xlu1 %v3814_v23  ;;  %4671 = vmatprep.subr.bf16.mxu1 %v4782_v43 }
0x13c8   :  { %v3819_v24 = vpop.xlane.xlu0 %3818 }
0x13c9   :  { %v3821_v60 = vmul.f32 0.03125, %v3819_v24  ;;  %v3816_v11 = vpop.xlane.xlu1 %3815 }
0x13ca   :  { %v3820_v1 = vmul.f32 0.03125, %v3816_v11 }
0x13cb   :  { %v3823_v28 = vsub.f32 %v3813_v3, %v3821_v60 }
0x13cc   :  { %v3822_v31 = vsub.f32 %v3812_v58, %v3820_v1 }
0x13cd   :  { %v3825_v7 = vmul.f32 %v3823_v28, %v3823_v28 }
0x13ce   :  { %v3824_v32 = vmul.f32 %v3822_v31, %v3822_v31 }
0x13cf   :  { %v3829_v16 = vsel %vm89_vm0, %v3825_v7, 0.0 }
0x13d0   :  { %3830 = vadd.xlane.f32.xlu0 %v3829_v16  ;;  %v3826_v33 = vsel %vm89_vm0, %v3824_v32, 0.0 }
0x13d1   :  { %3827 = vadd.xlane.f32.xlu1 %v3826_v33 }
0x145d   :  { %v3831_v45 = vpop.xlane.xlu0 %3830 }
0x145e   :  { %v3833_v47 = vmul.f32 0.03125, %v3831_v45  ;;  %v3828_v50 = vpop.xlane.xlu1 %3827 }
0x145f   :  { %v3832_v51 = vmul.f32 0.03125, %v3828_v50 }
0x1460   :  { %v3835_v52 = vadd.f32 1e-12, %v3833_v47 }
0x1461   :  { %v3834_v53 = vadd.f32 1e-12, %v3832_v51 }
0x1462   :  { %4771 = vrsqrt.f32 %v3835_v52 }
0x1463   :  { %4773 = vrsqrt.f32 %v3834_v53 }
0x146c   :  { %v4772_v40 = vpop.eup %4771 }
0x146d   :  { %v4774_v12 = vpop.eup %4773  ;;  %v3839_v55 = vmul.f32 %v4772_v40, %v3823_v28 }
0x146e   :  { %v3838_v46 = vmul.f32 %v4774_v12, %v3822_v31 }
0x146f   :  { %v3847_v62 = vmul.f32 %v4161_v54, %v3839_v55 }
0x1470   :  { %v3846_v0 = vmul.f32 %v4161_v54, %v3838_v46 }
0x1471   :  { %v3855_v2 = vadd.f32 %v4162_v57, %v3847_v62 }
0x1472   :  { %v3854_v19 = vadd.f32 %v4162_v57, %v3846_v0 }
0x1473   :  { %v3869_v4 = vrot.slane %v3855_v2, 7 }
0x1475   :  { %v3870_v6 = vsel %vm3857_vm1, %v3869_v4, %v3854_v19 }
0x1476   :  { %4164 = vst.msk [vmem:[%s5666_s6 + $0x4] sm:$0x3] %vm3860_vm2, %v3870_v6  ;;  %4572 = vmatmul.mubr.msk.f32.vlgmr.msra.gmra.mrb[42].mxu1 %vm89_vm0, %v3870_v6 }
0x1477   :  { %4582 = vmatprep.mubr.msk.f32.mxu1 %vm4778_vm3, %v4777_v41  ;;  %4673 = vmatpush3.bf16.msra.mxu1 %v4672_v25  ;;  %v4165_v41 = vld [vmem:[%s5644_s19] ss:$0 sm:$0xff] }
0x1478   :  { %4674 = vmatprep.subr.bf16.mxu1 %v4782_v43 }
0x147b   :  { %4676 = vmatpush3.bf16.msra.mxu1 %v4675_v63 }
0x1549   :  { %v3953_v8 = vpop.f32.mrb[42].mxu1 }
0x154a   :  { %v3954_v9 = vadd.f32 %v4165_v41, %v3953_v8  ;;  %v4573_v39 = vpop.f32.mrb[43].mxu1 }
0x154c   :  { %4775 = vtanh.f32 %v3954_v9 }
0x1556   :  { %v4776_v48 = vpop.eup %4775 }
0x1557   :  { %4583 = vmatmul.mubr.msk.f32.vlgmr.msra.gmra.mrb[44].mxu1 %vm89_vm0, %v4776_v48 }
0x162a   :  { %v4038_v10 = vpop.f32.mrb[44].mxu1 }
0x162b   :  { %v4039_v49 = vadd.f32 %v4167_v56, %v4038_v10  ;;  %v4584_v42 = vpop.f32.mrb[45].mxu1 }
0x162d   :  { %4043 = vst.msk [vmem:[%s5646_s23] sm:$0x3] %vm4042_vm6, %v4039_v49 }

// kernel: _forward.3
= control target key start
LH: loop header
LB: loop body
LE: loop exit
PB: predicated region body
PF: predicated region fallthrough
CT: control target
= control target key end

     0   :  { %s5522_s27 = smov 0   ;;  %s6163_s0 = inlined_call_operand.vmem [shape: f32[2,8,32], index: 0, kind: input, shape index: {}]   ;;  %s6164_s1 = inlined_call_operand.vmem [shape: f32[8,32], index: 1, kind: input, shape index: {}]   ;;  %s6165_s2 = inlined_call_operand.vmem [shape: f32[1,32], index: 2, kind: input, shape index: {}]   ;;  %s6166_s3 = inlined_call_operand.vmem [shape: f32[1,32], index: 3, kind: input, shape index: {}]   ;;  %s6167_s4 = inlined_call_operand.vmem [shape: f32[8,8,8], index: 4, kind: input, shape index: {}]   ;;  %s6168_s5 = inlined_call_operand.vmem [shape: f32[4,32], index: 5, kind: input, shape index: {}]   ;;  %s6169_s6 = inlined_call_operand.vmem [shape: f32[2,2,32,96], index: 6, kind: input, shape index: {}]   ;;  %s6170_s7 = inlined_call_operand.vmem [shape: f32[2,2,1,96], index: 7, kind: input, shape index: {}]   ;;  %s6171_s8 = inlined_call_operand.vmem [shape: f32[2,2,32,32], index: 8, kind: input, shape index: {}]   ;;  %s6172_s9 = inlined_call_operand.vmem [shape: f32[2,2,1,32], index: 9, kind: input, shape index: {}]   ;;  %s6173_s10 = inlined_call_operand.vmem [shape: f32[2,2,1,32], index: 10, kind: input, shape index: {}]   ;;  %s6174_s11 = inlined_call_operand.vmem [shape: f32[2,2,1,32], index: 11, kind: input, shape index: {}]   ;;  %s6175_s12 = inlined_call_operand.vmem [shape: f32[2,2,32,64], index: 12, kind: input, shape index: {}]   ;;  %s6176_s13 = inlined_call_operand.vmem [shape: f32[2,2,1,64], index: 13, kind: input, shape index: {}]   ;;  %s6177_s14 = inlined_call_operand.vmem [shape: f32[2,2,64,32], index: 14, kind: input, shape index: {}]   ;;  %s6178_s15 = inlined_call_operand.vmem [shape: f32[2,2,1,32], index: 15, kind: input, shape index: {}]   ;;  %s6179_s16 = inlined_call_operand.vmem [shape: f32[2,2,1,32], index: 16, kind: input, shape index: {}]   ;;  %s6180_s17 = inlined_call_operand.vmem [shape: f32[2,2,1,32], index: 17, kind: input, shape index: {}]   ;;  %s6181_s18 = inlined_call_operand.vmem [shape: f32[2,2,32], index: 18, kind: output, shape index: {}]  }
   0x1   :  { %6188 = sst [smem:[#allocation2_spill]] %s6163_s0 }
   0x2   :  { %6189 = sst [smem:[#allocation3_spill]] %s6164_s1 }
   0x3   :  { %6190 = sst [smem:[#allocation4_spill]] %s6165_s2 }
   0x4   :  { %6191 = sst [smem:[#allocation5_spill]] %s6166_s3 }
   0x5   :  { %6192 = sst [smem:[#allocation6_spill]] %s6167_s4 }
   0x6 LB: > { %s4714_s28 = sadd.s32 4294967295, %s5420_s27   ;;  %p4718_p0 = scmp.ge.s32.totalorder %s5420_s27, 1  ;;  %s5420_s27 = sphi %s5522_s27, %s28_s27  }
   0x7   : > { %p614_p1 = scmp.lt.s32.totalorder %s5420_s27, 3 }
   0x9   : > { %p615_p2 = pnand %p4718_p0, %p614_p1 }
   0xa   : > { %s6193_s0 = sld [smem:[#allocation2_spill]] (!%p615_p2)  ;;  %s6194_s20 = sld [smem:[#allocation3_spill]] (!%p615_p2)  ;;  %vm786_vm0 = vcmask (!%p615_p2), 261120   ;;  %v5422_v39 = vmov (!%p615_p2), 0.0   ;;  %vm5423_vm1 = vmmov (!%p615_p2), 0   ;;  %v957_v47 = vlaneseq (!%p615_p2) }
   0xb   : > { %618 = sbr.rel (%p615_p2) target bundleno = 5191 (0x1447), region = 92  ;;  %p714_p3 = scmp.lt.s32.totalorder (!%p615_p2), %s4714_s28, 1  ;;  %4994 = vmatprep.subr.mxu0 (!%p615_p2), %v5422_v39  ;;  %4996 = vmatprep.mubr.msk.f32.mxu0 (!%p615_p2), %vm5423_vm1, %v5422_v39  ;;  %v5425_v45 = vmov (!%p615_p2), 1966171168   ;;  %vm1628_vm2 = vcmask (!%p615_p2), 64512   ;;  %vm2573_vm3 = vcmask (!%p615_p2), 523264  }
   0xc   : > { %s6195_s30 = sld [smem:[#allocation4_spill]] (!%p615_p2)  ;;  %s6196_s3 = sld [smem:[#allocation5_spill]] (!%p615_p2)  ;;  %v955_v46 = vunpack.c.l.s4 (!%p615_p2), %v5425_v45  ;;  %v958_v49 = vshrl.u32 (!%p615_p2), %v957_v47, 7  ;;  %vm4524_vm4 = vcmask (!%p615_p2), 1041409   ;;  %vm4527_vm5 = vcmask (!%p615_p2), 254976  }
   0xd   : > { %s6185_s24 = smov (!%p615_p2), 96   ;;  %v4741_v51 = vld.sshfl [vmem:[%s6168_s5] sm:$0x33 pattern:$0x75316420] (!%p615_p2)  ;;  %s6197_s4 = sld [smem:[#allocation6_spill]] (!%p615_p2) }
   0xe   : > { %v956_v48 = vunpack.c.0.s8 (!%p615_p2), %v955_v46  ;;  %v953_v53 = vcombine.high (!%p615_p2), %v4741_v51, %v4741_v51  ;;  %v972_v54 = vsub.s32 (!%p615_p2), 0, %v958_v49  ;;  %s6183_s26 = smov (!%p615_p2), 64  }
  0x10   : > { %v779_v0 = vld [vmem:[%s6193_s0] sm:$0xff] (!%p615_p2)  ;;  %v780_v2 = vld [vmem:[%s6193_s0 + $0x8] sm:$0xff] (!%p615_p2)  ;;  %v959_v50 = vsub.s32 (!%p615_p2), %v956_v48, %v958_v49 }
  0x11   : > { %v781_v1 = vld [vmem:[%s6194_s20] sm:$0xff] (!%p615_p2) }
  0x12   : > { %v782_v3 = vadd.f32 %v781_v1, %v779_v0  ;;  %v783_v4 = vadd.f32 %v781_v1, %v780_v2  ;;  %s6201_s28 = smov (!%p714_p3, %s4714_s28), 1  ;;  %v4736_v30 = vld [vmem:[%s6195_s30] ss:$0 sm:$0xff]  ;;  %v960_v52 = vrot.slane %v4741_v51, %v959_v50  ;;  %v967_v56 = vrot.slane %v953_v53, %v959_v50 }
  0x13   : > { %s5546_s2 = sshll.u32 %s6201_s28, 6  ;;  %v4737_v32 = vld [vmem:[%s6196_s3] ss:$0 sm:$0xff]  ;;  %s5575_s20 = sshll.u32 %s6201_s28, 1  ;;  %v5706_v47 = vld [vmem:[%s6197_s4 + $0x30] sm:$0xff] }
  0x14   : > { %v787_v5 = vsel %vm786_vm0, %v782_v3, 0.0  ;;  %v790_v6 = vsel %vm786_vm0, %v783_v4, 0.0  ;;  %s5552_s25 = scalar_lea.vmem %s6169_s6, %s5546_s2  ;;  %s5585_s23 = scalar_lea.vmem %s6170_s7, %s5575_s20  ;;  %v968_v55 = vcombine.high %v960_v52, %v960_v52  ;;  %v5599_v57 = vrot.slane %v960_v52, %v972_v54 }
  0x15   : > { %788 = vadd.xlane.f32.xlu0 %v787_v5  ;;  %v830_v17 = vld [vmem:[%s5552_s25] sm:$0xff]  ;;  %v831_v18 = vld [vmem:[%s5552_s25 + $0x8] sm:$0xff]  ;;  %v832_v19 = vld [vmem:[%s5552_s25 + $0x10] sm:$0xff]  ;;  %v969_v60 = vcombine.high %v967_v56, %v967_v56  ;;  %v5611_v63 = vrot.slane %v967_v56, %v972_v54  ;;  %s5841_s29 = scalar_lea.vmem %s6171_s8, %s5546_s2  ;;  %s5861_s1 = scalar_lea.vmem %s6172_s9, %s5575_s20 }
  0x16   : > { %v5237_v20 = vpack.c.bf16 %v831_v18, %v830_v17  ;;  %v833_v21 = vld [vmem:[%s5552_s25 + $0x18] sm:$0xff]  ;;  %v4738_v40 = vld [vmem:[%s5585_s23] ss:$0 sm:$0xff]  ;;  %v5601_v58 = vrot.slane %v968_v55, %v972_v54  ;;  %v5674_v17 = vld [vmem:[%s6197_s4 + $0x8] sm:$0xff]  ;;  %s5874_s30 = scalar_lea.vmem %s6175_s12, %s5546_s2  ;;  %s4852_s19 = sshll.u32 %s6201_s28, 7 }
  0x17   : > { %v5241_v22 = vpack.c.bf16 %v833_v21, %v832_v19  ;;  %s5884_s0 = scalar_lea.vmem %s6177_s14, %s4852_s19  ;;  %s5902_s22 = scalar_lea.vmem %s6174_s11, %s5575_s20 }
  0x18   : > { %5238 = vmatprep.subr.bf16.mxu1 %v5237_v20  ;;  %s5915_s2 = scalar_lea.vmem %s6176_s13, %s5575_s20  ;;  %s5926_s19 = scalar_lea.vmem %s6178_s15, %s5575_s20 }
  0x19   : > { %791 = vadd.xlane.f32.xlu0 %v790_v6  ;;  %5240 = vmatpush3.bf16.msra.mxu1 %v5237_v20  ;;  %s6198_s3 = smov 96  }
  0x1a   : > { %5242 = vmatprep.subr.bf16.mxu1 %v5241_v22 }
  0x1d   : > { %5244 = vmatpush3.bf16.msra.mxu1 %v5241_v22 }
  0x1e   : > { %4984 = vmatprep.subr.mxu1 %v5422_v39 }
  0xa2   : > { %v789_v7 = vpop.xlane.xlu0 %788 }
  0xa3   : > { %v794_v8 = vmul.f32 0.03125, %v789_v7 }
  0xa5   : > { %v796_v9 = vsub.f32 %v782_v3, %v794_v8  ;;  %v5625_v3 = vrot.slane %v969_v60, %v972_v54  ;;  %v5718_v54 = vld [vmem:[%s6197_s4 + $0x28] sm:$0xff] }
  0xa6   : > { %v792_v10 = vpop.xlane.xlu0 %791 }
  0xa7   : > { %v795_v11 = vmul.f32 0.03125, %v792_v10  ;;  %v798_v12 = vmul.f32 %v796_v9, %v796_v9  ;;  %v5666_v10 = vld [vmem:[%s6197_s4] sm:$0xff] }
  0xa9   : > { %v797_v13 = vsub.f32 %v783_v4, %v795_v11  ;;  %v800_v14 = vsel %vm786_vm0, %v798_v12, 0.0 }
  0xaa   : > { %801 = vadd.xlane.f32.xlu1 %v800_v14 }
  0xab   : > { %v799_v15 = vmul.f32 %v797_v13, %v797_v13 }
  0xad   : > { %v803_v16 = vsel %vm786_vm0, %v799_v15, 0.0 }
  0xae   : > { %804 = vadd.xlane.f32.xlu1 %v803_v16 }
 0x137   : > { %v802_v23 = vpop.xlane.xlu1 %801 }
 0x138   : > { %v806_v24 = vmul.f32 0.03125, %v802_v23 }
 0x13a   : > { %v808_v25 = vadd.f32 1e-12, %v806_v24  ;;  %v5684_v24 = vld [vmem:[%s6197_s4 + $0x10] sm:$0xff] }
 0x13b   : > { %v805_v26 = vpop.xlane.xlu1 %804 }
 0x13c   : > { %5330 = vrsqrt.f32 %v808_v25  ;;  %v807_v27 = vmul.f32 0.03125, %v805_v26 }
 0x13e   : > { %v809_v28 = vadd.f32 1e-12, %v807_v27  ;;  %v5689_v27 = vld [vmem:[%s6197_s4 + $0x18] sm:$0xff] }
 0x140   : > { %5332 = vrsqrt.f32 %v809_v28 }
 0x146   : > { %v5331_v29 = vpop.eup %5330 }
 0x147   : > { %v812_v31 = vmul.f32 %v5331_v29, %v796_v9 }
 0x149   : > { %v820_v33 = vmul.f32 %v4736_v30, %v812_v31 }
 0x14a   : > { %v5333_v34 = vpop.eup %5332 }
 0x14b   : > { %v813_v35 = vmul.f32 %v5333_v34, %v797_v13  ;;  %v5564_v36 = vadd.f32 %v4737_v32, %v820_v33 }
 0x14d   : > { %v821_v37 = vmul.f32 %v4736_v30, %v813_v35  ;;  %4981 = vmatprep.mubr.msk.f32.mxu1 %vm786_vm0, %v5564_v36  ;;  %v5698_v35 = vld [vmem:[%s6197_s4 + $0x20] sm:$0xff] }
 0x14f   : > { %v5568_v38 = vadd.f32 %v4737_v32, %v821_v37 }
 0x151   : > { %4982 = vmatmul.mubr.msk.f32.vlgmr.msra.gmra.mrb[0].mxu1 %vm786_vm0, %v5568_v38 }
 0x152   : > { %4986 = vmatprep.mubr.msk.f32.mxu1 %vm5423_vm1, %v5422_v39 }
 0x224   : > { %v4983_v41 = vpop.f32.mrb[0].mxu1 }
 0x225   : > { %v5588_v42 = vadd.f32 %v4983_v41, %v4738_v40  ;;  %v936_v43 = vpop.f32.mrb[1].mxu1 }
 0x226   : > { %v5590_v44 = vadd.f32 %v4738_v40, %v936_v43 }
 0x227   : > { %1316 = vrot.lane.b32.xlu1 %v5588_v42, %s6185_s24  ;;  %v994_v2 = vmul.f32 %v5599_v57, %v5588_v42  ;;  %v996_v5 = vmul.f32 %v5601_v58, %v5588_v42  ;;  %v995_v6 = vmul.f32 %v5611_v63, %v5588_v42  ;;  %v997_v7 = vmul.f32 %v5625_v3, %v5588_v42 }
 0x228   : > { %1019 = vrot.lane.b32.xlu0 %v5590_v44, %s6185_s24  ;;  %v990_v61 = vmul.f32 %v5599_v57, %v5590_v44  ;;  %v992_v62 = vmul.f32 %v5601_v58, %v5590_v44  ;;  %v991_v1 = vmul.f32 %v5611_v63, %v5590_v44  ;;  %v993_v4 = vmul.f32 %v5625_v3, %v5590_v44  ;;  %s5896_s24 = scalar_lea.vmem %s6173_s10, %s5575_s20 }
 0x299   : > { %v1317_v0 = vpop.permute.xlu1 %1316 }
 0x29a   : > { %v1020_v59 = vpop.permute.xlu0 %1019 }
 0x29b   : > { %4985 = vmatpush3.xpose.msk.msra.mxu1 %vm786_vm0, %v1020_v59  ;;  %4995 = vmatpush3.xpose.msk.msra.mxu0 %vm786_vm0, %v1020_v59 }
 0x29c   : > { %4989 = vmatprep.subr.mxu1 %v5422_v39  ;;  %5004 = vmatprep.subr.mxu0 %v5422_v39 }
 0x29e   : > { %4987 = vmatmul.mubr.msk.f32.vlgmr.msra.gmra.mrb[2].mxu1 %vm786_vm0, %v990_v61  ;;  %4997 = vmatmul.mubr.msk.f32.vlgmr.msra.gmra.mrb[0].mxu0 %vm786_vm0, %v992_v62 }
 0x29f   : > { %4990 = vmatpush3.xpose.msk.msra.mxu1 %vm786_vm0, %v1020_v59  ;;  %5005 = vmatpush3.xpose.msk.msra.mxu0 %vm786_vm0, %v1317_v0 }
 0x2a0   : > { %4991 = vmatprep.mubr.msk.f32.mxu1 %vm5423_vm1, %v5422_v39  ;;  %5006 = vmatprep.mubr.msk.f32.mxu0 %vm5423_vm1, %v5422_v39 }
 0x2a1   : > { %4999 = vmatprep.subr.mxu1 %v5422_v39  ;;  %5014 = vmatprep.subr.mxu0 %v5422_v39 }
 0x2a2   : > { %4992 = vmatmul.mubr.msk.f32.vlgmr.msra.gmra.mrb[4].mxu1 %vm786_vm0, %v991_v1  ;;  %5007 = vmatmul.mubr.msk.f32.vlgmr.msra.gmra.mrb[2].mxu0 %vm786_vm0, %v994_v2 }
 0x2a3   : > { %5000 = vmatpush3.xpose.msk.msra.mxu1 %vm786_vm0, %v1020_v59  ;;  %5015 = vmatpush3.xpose.msk.msra.mxu0 %vm786_vm0, %v1317_v0  ;;  %v5726_v59 = vld [vmem:[%s6197_s4 + $0x38] sm:$0xff]  ;;  %s5948_s4 = scalar_lea.vmem %s6180_s17, %s5575_s20 }
 0x2a4   : > { %5001 = vmatprep.mubr.msk.f32.mxu1 %vm5423_vm1, %v5422_v39  ;;  %5016 = vmatprep.mubr.msk.f32.mxu0 %vm5423_vm1, %v5422_v39 }
 0x2a5   : > { %5009 = vmatprep.subr.mxu1 %v5422_v39  ;;  %5024 = vmatprep.subr.mxu0 %v5422_v39 }
 0x2a6   : > { %5002 = vmatmul.mubr.msk.f32.vlgmr.msra.gmra.mrb[6].mxu1 %vm786_vm0, %v993_v4  ;;  %5017 = vmatmul.mubr.msk.f32.vlgmr.msra.gmra.mrb[4].mxu0 %vm786_vm0, %v996_v5 }
 0x2a7   : > { %5010 = vmatpush3.xpose.msk.msra.mxu1 %vm786_vm0, %v1317_v0  ;;  %5011 = vmatprep.mubr.msk.f32.mxu1 %vm5423_vm1, %v5422_v39 }
 0x2a8   : > { %5019 = vmatprep.subr.mxu1 %v5422_v39  ;;  %5026 = vmatprep.mubr.msk.f32.mxu0 %vm5423_vm1, %v5422_v39 }
 0x2aa   : > { %5012 = vmatmul.mubr.msk.f32.vlgmr.msra.gmra.mrb[8].mxu1 %vm786_vm0, %v995_v6 }
 0x2ab   : > { %5020 = vmatpush3.xpose.msk.msra.mxu1 %vm786_vm0, %v1317_v0  ;;  %5021 = vmatprep.mubr.msk.f32.mxu1 %vm5423_vm1, %v5422_v39 }
 0x2ac   : > { %5029 = vmatprep.subr.mxu1 %v5422_v39 }
 0x2ae   : > { %5022 = vmatmul.mubr.msk.f32.vlgmr.msra.gmra.mrb[10].mxu1 %vm786_vm0, %v997_v7 }
 0x2af   : > { %5031 = vmatprep.mubr.msk.f32.mxu1 %vm5423_vm1, %v5422_v39 }
 0x371   : > { %v1092_v8 = vpop.f32.mrb[2].mxu1  ;;  %v1238_v9 = vpop.f32.mrb[0].mxu0 }
 0x372   : > { %v1612_v11 = vmul.f32 0.35355338, %v1092_v8  ;;  %v4988_v12 = vpop.f32.mrb[3].mxu1  ;;  %v4998_v13 = vpop.f32.mrb[1].mxu0  ;;  %v1614_v21 = vmul.f32 0.35355338, %v1238_v9 }
 0x374   : > { %v5669_v14 = vadd.f32 %v1612_v11, %v5666_v10  ;;  %v1622_v33 = vadd.f32 %v1614_v21, %v5684_v24 }
 0x375   : > { %v1165_v15 = vpop.f32.mrb[4].mxu1  ;;  %v1389_v16 = vpop.f32.mrb[2].mxu0 }
 0x376   : > { %v1613_v18 = vmul.f32 0.35355338, %v1165_v15  ;;  %v4993_v19 = vpop.f32.mrb[5].mxu1  ;;  %v5008_v20 = vpop.f32.mrb[3].mxu0  ;;  %v1629_v22 = vsel %vm1628_vm2, %v5669_v14, -inf  ;;  %v1635_v45 = vsel %vm1628_vm2, %v1622_v33, -inf }
 0x377   : > { %1630 = vmax.xlane.f32.xlu1 %v1629_v22  ;;  %v1616_v31 = vmul.f32 0.35355338, %v1389_v16 }
 0x378   : > { %v5679_v23 = vadd.f32 %v1613_v18, %v5674_v17 }
 0x379   : > { %v1311_v25 = vpop.f32.mrb[6].mxu1  ;;  %v1535_v26 = vpop.f32.mrb[4].mxu0  ;;  %v1624_v46 = vadd.f32 %v1616_v31, %v5698_v35 }
 0x37a   : > { %v1615_v28 = vmul.f32 0.35355338, %v1311_v25  ;;  %v5003_v29 = vpop.f32.mrb[7].mxu1  ;;  %v5018_v30 = vpop.f32.mrb[5].mxu0  ;;  %v1632_v32 = vsel %vm1628_vm2, %v5679_v23, -inf }
 0x37b   : > { %1633 = vmax.xlane.f32.xlu0 %v1632_v32  ;;  %v1618_v43 = vmul.f32 0.35355338, %v1535_v26  ;;  %v1641_v50 = vsel %vm1628_vm2, %v1624_v46, -inf }
 0x37c   : > { %v1623_v34 = vadd.f32 %v1615_v28, %v5689_v27 }
 0x37d   : > { %v1462_v37 = vpop.f32.mrb[8].mxu1  ;;  %v1626_v51 = vadd.f32 %v1618_v43, %v5706_v47 }
 0x37e   : > { %v5013_v40 = vpop.f32.mrb[9].mxu1  ;;  %v1638_v41 = vsel %vm1628_vm2, %v1623_v34, -inf  ;;  %v1617_v53 = vmul.f32 0.35355338, %v1462_v37 }
 0x37f   : > { %1639 = vmax.xlane.f32.xlu1 %v1638_v41  ;;  %1636 = vmax.xlane.f32.xlu0 %v1635_v45  ;;  %v1647_v52 = vsel %vm1628_vm2, %v1626_v51, -inf }
 0x380   : > { %v5721_v56 = vadd.f32 %v1617_v53, %v5718_v54 }
 0x381   : > { %v1608_v48 = vpop.f32.mrb[10].mxu1 }
 0x382   : > { %v5023_v49 = vpop.f32.mrb[11].mxu1  ;;  %v1619_v55 = vmul.f32 0.35355338, %v1608_v48  ;;  %v1644_v60 = vsel %vm1628_vm2, %v5721_v56, -inf }
 0x383   : > { %1642 = vmax.xlane.f32.xlu0 %v1641_v50 }
 0x384   : > { %v5731_v61 = vadd.f32 %v1619_v55, %v5726_v59 }
 0x386   : > { %v1650_v62 = vsel %vm1628_vm2, %v5731_v61, -inf }
 0x387   : > { %1648 = vmax.xlane.f32.xlu0 %v1647_v52 }
 0x390   : > { %1000 = vrot.lane.b32.xlu1 %v5611_v63, %s6183_s26 }
 0x39d   : > { %998 = vrot.lane.b32.xlu0 %v5599_v57, %s6183_s26 }
 0x3b4   : > { %1645 = vmax.xlane.f32.xlu1 %v1644_v60 }
 0x3b8   : > { %1651 = vmax.xlane.f32.xlu1 %v1650_v62 }
 0x3c9   : > { %1002 = vrot.lane.b32.xlu1 %v5601_v58, %s6183_s26 }
 0x3cd   : > { %1004 = vrot.lane.b32.xlu1 %v5625_v3, %s6183_s26 }
 0x404   : > { %v1631_v0 = vpop.xlane.xlu1 %1630 }
 0x405   : > { %v1653_v13 = vsub.f32 %v5669_v14, %v1631_v0 }
 0x407   : > { %v1661_v15 = vmul.f32 1.442695, %v1653_v13 }
 0x408   : > { %v1634_v1 = vpop.xlane.xlu0 %1633 }
 0x409   : > { %5334 = vpow2.f32 %v1661_v15 }
 0x40c   : > { %v1640_v2 = vpop.xlane.xlu1 %1639  ;;  %v1637_v4 = vpop.xlane.xlu0 %1636 }
 0x40d   : > { %v1655_v16 = vsub.f32 %v1622_v33, %v1637_v4  ;;  %v1656_v20 = vsub.f32 %v1623_v34, %v1640_v2 }
 0x40f   : > { %v1665_v18 = vmul.f32 1.442695, %v1655_v16  ;;  %v1667_v22 = vmul.f32 1.442695, %v1656_v20 }
 0x410   : > { %v5739_v5 = vpop.permute.xlu1 %1000  ;;  %v1643_v6 = vpop.xlane.xlu0 %1642 }
 0x411   : > { %v1011_v7 = vmul.f32 %v5739_v5, %v5590_v44  ;;  %v1657_v19 = vsub.f32 %v1624_v46, %v1643_v6  ;;  %5336 = vpow2.f32 %v1665_v18  ;;  %v1015_v50 = vmul.f32 %v5739_v5, %v5588_v42 }
 0x413   : > { %1795 = vrot.lane.b32.xlu1 %v1011_v7, %s6183_s26  ;;  %v1669_v21 = vmul.f32 1.442695, %v1657_v19  ;;  %v5753_v26 = vpop.eup %5334 }
 0x414   : > { %v1649_v8 = vpop.xlane.xlu0 %1648  ;;  %v1677_v29 = vsel %vm1628_vm2, %v5753_v26, 0.0 }
 0x415   : > { %5338 = vpow2.f32 %v1669_v21  ;;  %v1659_v25 = vsub.f32 %v1626_v51, %v1649_v8  ;;  %v1654_v51 = vsub.f32 %v5679_v23, %v1634_v1 }
 0x416   : > { %5340 = vpow2.f32 %v1667_v22 }
 0x417   : > { %v1673_v28 = vmul.f32 1.442695, %v1659_v25  ;;  %v1663_v53 = vmul.f32 1.442695, %v1654_v51 }
 0x418   : > { %v5744_v9 = vpop.permute.xlu0 %998 }
 0x419   : > { %v1010_v11 = vmul.f32 %v5744_v9, %v5590_v44  ;;  %v1014_v12 = vmul.f32 %v5744_v9, %v5588_v42  ;;  %5342 = vpow2.f32 %v1673_v28 }
 0x41a   : > { %5344 = vpow2.f32 %v1663_v53  ;;  %v836_v53 = vld [vmem:[%s5841_s29 + $0x8] sm:$0xff] }
 0x41b   : > { %1718 = vrot.lane.b32.xlu0 %v1010_v11, %s6183_s26  ;;  %v5757_v30 = vpop.eup %5336 }
 0x41c   : > { %v1683_v31 = vsel %vm1628_vm2, %v5757_v30, 0.0 }
 0x41f   : > { %2026 = vrot.lane.b32.xlu0 %v1014_v12, %s6183_s26  ;;  %v5761_v32 = vpop.eup %5338 }
 0x420   : > { %v1689_v34 = vsel %vm1628_vm2, %v5761_v32, 0.0  ;;  %v5765_v37 = vpop.eup %5340 }
 0x421   : > { %v1686_v41 = vsel %vm1628_vm2, %v5765_v37, 0.0 }
 0x423   : > { %v5773_v45 = vpop.eup %5342 }
 0x424   : > { %v1695_v48 = vsel %vm1628_vm2, %v5773_v45, 0.0  ;;  %v5345_v0 = vpop.eup %5344 }
 0x425   : > { %v1680_v2 = vsel %vm1628_vm2, %v5345_v0, 0.0 }
 0x43e   : > { %1678 = vadd.xlane.f32.xlu0 %v1677_v29 }
 0x441   : > { %v1646_v14 = vpop.xlane.xlu1 %1645 }
 0x442   : > { %1684 = vadd.xlane.f32.xlu0 %v1683_v31  ;;  %v1658_v55 = vsub.f32 %v5721_v56, %v1646_v14 }
 0x445   : > { %v1652_v33 = vpop.xlane.xlu1 %1651 }
 0x446   : > { %1690 = vadd.xlane.f32.xlu0 %v1689_v34  ;;  %v1660_v60 = vsub.f32 %v5731_v61, %v1652_v33 }
 0x448   : > { %v1675_v62 = vmul.f32 1.442695, %v1660_v60  ;;  %v838_v60 = vld [vmem:[%s5841_s29 + $0x18] sm:$0xff] }
 0x449   : > { %v5767_v40 = vpop.permute.xlu1 %1002 }
 0x44a   : > { %v1012_v43 = vmul.f32 %v5767_v40, %v5590_v44  ;;  %1687 = vadd.xlane.f32.xlu0 %v1686_v41  ;;  %v1016_v52 = vmul.f32 %v5767_v40, %v5588_v42 }
 0x44c   : > { %1872 = vrot.lane.b32.xlu1 %v1012_v43, %s6183_s26 }
 0x44d   : > { %v5776_v46 = vpop.permute.xlu1 %1004 }
 0x44e   : > { %v1013_v49 = vmul.f32 %v5776_v46, %v5590_v44  ;;  %1696 = vadd.xlane.f32.xlu0 %v1695_v48  ;;  %v1671_v44 = vmul.f32 1.442695, %v1658_v55  ;;  %v1017_v7 = vmul.f32 %v5776_v46, %v5588_v42 }
 0x450   : > { %1949 = vrot.lane.b32.xlu1 %v1013_v49, %s6183_s26  ;;  %5346 = vpow2.f32 %v1671_v44  ;;  %v837_v44 = vld [vmem:[%s5841_s29 + $0x10] sm:$0xff] }
 0x451   : > { %5348 = vpow2.f32 %v1675_v62  ;;  %v5249_v62 = vpack.c.bf16 %v838_v60, %v837_v44 }
 0x454   : > { %2103 = vrot.lane.b32.xlu1 %v1015_v50, %s6183_s26 }
 0x45a   : > { %v5793_v4 = vpop.eup %5346 }
 0x45b   : > { %v1692_v23 = vsel %vm1628_vm2, %v5793_v4, 0.0  ;;  %v5797_v1 = vpop.eup %5348 }
 0x45c   : > { %v1698_v56 = vsel %vm1628_vm2, %v5797_v1, 0.0 }
 0x464   : > { %2180 = vrot.lane.b32.xlu0 %v1016_v52, %s6183_s26  ;;  %v835_v52 = vld [vmem:[%s5841_s29] sm:$0xff] }
 0x465   : > { %v5245_v55 = vpack.c.bf16 %v836_v53, %v835_v52 }
 0x478   : > { %1681 = vadd.xlane.f32.xlu1 %v1680_v2 }
 0x47c   : > { %1693 = vadd.xlane.f32.xlu1 %v1692_v23 }
 0x480   : > { %1699 = vadd.xlane.f32.xlu1 %v1698_v56 }
 0x485   : > { %v1796_v61 = vpop.permute.xlu1 %1795 }
 0x486   : > { %5030 = vmatpush3.msra.mxu1 %v1796_v61 }
 0x487   : > { %5039 = vmatprep.subr.mxu1 %v5422_v39 }
 0x48d   : > { %v1719_v6 = vpop.permute.xlu0 %1718 }
 0x48e   : > { %5025 = vmatpush3.msra.mxu0 %v1719_v6 }
 0x48f   : > { %5034 = vmatprep.subr.mxu0 %v5422_v39 }
 0x491   : > { %2257 = vrot.lane.b32.xlu1 %v1017_v7, %s6183_s26  ;;  %v2027_v8 = vpop.permute.xlu0 %2026 }
 0x4be   : > { %v1873_v19 = vpop.permute.xlu1 %1872 }
 0x4cb   : > { %v1679_v11 = vpop.xlane.xlu0 %1678 }
 0x4cc   : > { %5350 = vrcp.f32 %v1679_v11 }
 0x4cf   : > { %v1685_v12 = vpop.xlane.xlu0 %1684 }
 0x4d0   : > { %5352 = vrcp.f32 %v1685_v12 }
 0x4d3   : > { %v1691_v13 = vpop.xlane.xlu0 %1690 }
 0x4d4   : > { %5354 = vrcp.f32 %v1691_v13 }
 0x4d6   : > { %v5351_v15 = vpop.eup %5350 }
 0x4d7   : > { %v1709_v16 = vmul.f32 %v5351_v15, %v5753_v26  ;;  %v1688_v18 = vpop.xlane.xlu0 %1687 }
 0x4d9   : > { %5027 = vmatmul.mubr.msk.f32.vlgmr.msra.gmra.mrb[6].mxu0 %vm1628_vm2, %v1709_v16 }
 0x4da   : > { %v5353_v20 = vpop.eup %5352  ;;  %5035 = vmatpush3.msra.mxu0 %v1873_v19  ;;  %5036 = vmatprep.mubr.msk.f32.mxu0 %vm5423_vm1, %v5422_v39 }
 0x4db   : > { %v1711_v42 = vmul.f32 %v5353_v20, %v5757_v30  ;;  %v1697_v21 = vpop.xlane.xlu0 %1696  ;;  %5044 = vmatprep.subr.mxu0 %v5422_v39  ;;  %v1950_v30 = vpop.permute.xlu1 %1949 }
 0x4dc   : > { %5356 = vrcp.f32 %v1697_v21 }
 0x4dd   : > { %5037 = vmatmul.mubr.msk.f32.vlgmr.msra.gmra.mrb[8].mxu0 %vm1628_vm2, %v1711_v42 }
 0x4de   : > { %v5355_v22 = vpop.eup %5354  ;;  %5045 = vmatpush3.msra.mxu0 %v2027_v8  ;;  %5046 = vmatprep.mubr.msk.f32.mxu0 %vm5423_vm1, %v5422_v39 }
 0x4df   : > { %v1713_v25 = vmul.f32 %v5355_v22, %v5761_v32  ;;  %v2181_v26 = vpop.permute.xlu0 %2180  ;;  %5054 = vmatprep.subr.mxu0 %v5422_v39  ;;  %v2104_v14 = vpop.permute.xlu1 %2103 }
 0x4e1   : > { %5047 = vmatmul.mubr.msk.f32.vlgmr.msra.gmra.mrb[10].mxu0 %vm1628_vm2, %v1713_v25 }
 0x4e2   : > { %5055 = vmatpush3.msra.mxu0 %v2181_v26  ;;  %5056 = vmatprep.mubr.msk.f32.mxu0 %vm5423_vm1, %v5422_v39 }
 0x4e3   : > { %5246 = vmatprep.subr.bf16.mxu0 %v5245_v55 }
 0x4e6   : > { %v5357_v28 = vpop.eup %5356 }
 0x4e7   : > { %v1715_v29 = vmul.f32 %v5357_v28, %v5773_v45 }
 0x4e9   : > { %5057 = vmatmul.mubr.msk.f32.vlgmr.msra.gmra.mrb[12].mxu0 %vm1628_vm2, %v1715_v29 }
 0x4ea   : > { %5248 = vmatpush3.bf16.msra.mxu0 %v5245_v55 }
 0x4eb   : > { %5250 = vmatprep.subr.bf16.mxu0 %v5249_v62 }
 0x4ee   : > { %5252 = vmatpush3.bf16.msra.mxu0 %v5249_v62 }
 0x505   : > { %v1682_v31 = vpop.xlane.xlu1 %1681 }
 0x506   : > { %5358 = vrcp.f32 %v1682_v31 }
 0x507   : > { %5360 = vrcp.f32 %v1688_v18 }
 0x509   : > { %v1694_v32 = vpop.xlane.xlu1 %1693 }
 0x50a   : > { %5362 = vrcp.f32 %v1694_v32 }
 0x50d   : > { %v1700_v33 = vpop.xlane.xlu1 %1699 }
 0x50e   : > { %5364 = vrcp.f32 %v1700_v33 }
 0x510   : > { %v5359_v34 = vpop.eup %5358 }
 0x511   : > { %v1710_v41 = vmul.f32 %v5359_v34, %v5345_v0  ;;  %v5361_v43 = vpop.eup %5360  ;;  %v2258_v51 = vpop.permute.xlu1 %2257  ;;  %v4766_v34 = vld [vmem:[%s5861_s1] ss:$0 sm:$0xff] }
 0x512   : > { %v1712_v45 = vmul.f32 %v5361_v43, %v5765_v37 }
 0x513   : > { %5032 = vmatmul.mubr.msk.f32.vlgmr.msra.gmra.mrb[12].mxu1 %vm1628_vm2, %v1710_v41 }
 0x514   : > { %5040 = vmatpush3.msra.mxu1 %v1950_v30  ;;  %5041 = vmatprep.mubr.msk.f32.mxu1 %vm5423_vm1, %v5422_v39  ;;  %v5363_v48 = vpop.eup %5362 }
 0x515   : > { %5049 = vmatprep.subr.mxu1 %v5422_v39  ;;  %v1714_v49 = vmul.f32 %v5363_v48, %v5793_v4 }
 0x517   : > { %5042 = vmatmul.mubr.msk.f32.vlgmr.msra.gmra.mrb[14].mxu1 %vm1628_vm2, %v1712_v45 }
 0x518   : > { %5050 = vmatpush3.msra.mxu1 %v2104_v14  ;;  %5051 = vmatprep.mubr.msk.f32.mxu1 %vm5423_vm1, %v5422_v39  ;;  %v5365_v50 = vpop.eup %5364 }
 0x519   : > { %5059 = vmatprep.subr.mxu1 %v5422_v39  ;;  %v1716_v37 = vmul.f32 %v5365_v50, %v5797_v1 }
 0x51b   : > { %5052 = vmatmul.mubr.msk.f32.vlgmr.msra.gmra.mrb[16].mxu1 %vm1628_vm2, %v1714_v49 }
 0x51c   : > { %5060 = vmatpush3.msra.mxu1 %v2258_v51  ;;  %5061 = vmatprep.mubr.msk.f32.mxu1 %vm5423_vm1, %v5422_v39 }
 0x51f   : > { %5062 = vmatmul.mubr.msk.f32.vlgmr.msra.gmra.mrb[18].mxu1 %vm1628_vm2, %v1716_v37 }
 0x5ac   : > { %v1790_v0 = vpop.f32.mrb[6].mxu0 }
 0x5ad   : > { %v5028_v2 = vpop.f32.mrb[7].mxu0  ;;  %v2333_v8 = vsel %vm786_vm0, %v1790_v0, 0.0 }
 0x5b0   : > { %v1944_v4 = vpop.f32.mrb[8].mxu0 }
 0x5b1   : > { %v5038_v23 = vpop.f32.mrb[9].mxu0  ;;  %v2336_v15 = vsel %vm786_vm0, %v1944_v4, 0.0  ;;  %v842_v4 = vld [vmem:[%s5874_s30] sm:$0xff] }
 0x5b2   : > { %v843_v23 = vld [vmem:[%s5874_s30 + $0x8] sm:$0xff] }
 0x5b4   : > { %v2098_v1 = vpop.f32.mrb[10].mxu0 }
 0x5b5   : > { %v5048_v56 = vpop.f32.mrb[11].mxu0  ;;  %v2340_v22 = vsel %vm786_vm0, %v2098_v1, 0.0  ;;  %v5253_v1 = vpack.c.bf16 %v843_v23, %v842_v4 }
 0x5b6   : > { %v844_v56 = vld [vmem:[%s5874_s30 + $0x10] sm:$0xff] }
 0x5b7   : > { %5254 = vmatprep.subr.bf16.mxu1 %v5253_v1 }
 0x5b8   : > { %5256 = vmatpush3.bf16.msra.mxu1 %v5253_v1 }
 0x5bc   : > { %v2252_v61 = vpop.f32.mrb[12].mxu0 }
 0x5bd   : > { %v5058_v6 = vpop.f32.mrb[13].mxu0  ;;  %v2343_v29 = vsel %vm786_vm0, %v2252_v61, 0.0  ;;  %v845_v61 = vld [vmem:[%s5874_s30 + $0x18] sm:$0xff] }
 0x5be   : > { %v5257_v6 = vpack.c.bf16 %v845_v61, %v844_v56 }
 0x5c0   : > { %5258 = vmatprep.subr.bf16.mxu1 %v5257_v6 }
 0x5c1   : > { %5260 = vmatpush3.bf16.msra.mxu1 %v5257_v6 }
 0x5e6   : > { %v1867_v7 = vpop.f32.mrb[12].mxu1 }
 0x5e7   : > { %v2334_v11 = vsel %vm786_vm0, %v1867_v7, 0.0  ;;  %v5033_v12 = vpop.f32.mrb[13].mxu1  ;;  %v847_v7 = vld [vmem:[%s5884_s0] sm:$0xff] }
 0x5e8   : > { %v2335_v13 = vadd.f32 %v2334_v11, %v2333_v8  ;;  %v848_v8 = vld [vmem:[%s5884_s0 + $0x8] sm:$0xff]  ;;  %v849_v11 = vld [vmem:[%s5884_s0 + $0x10] sm:$0xff] }
 0x5e9   : > { %v5261_v12 = vpack.c.bf16 %v848_v8, %v847_v7 }
 0x5ea   : > { %v2021_v16 = vpop.f32.mrb[14].mxu1  ;;  %v2337_v18 = vadd.f32 %v2336_v15, %v2335_v13  ;;  %v850_v13 = vld [vmem:[%s5884_s0 + $0x18] sm:$0xff] }
 0x5eb   : > { %v2338_v19 = vsel %vm786_vm0, %v2021_v16, 0.0  ;;  %v5043_v20 = vpop.f32.mrb[15].mxu1  ;;  %v5265_v15 = vpack.c.bf16 %v850_v13, %v849_v11  ;;  %v851_v16 = vld [vmem:[%s5884_s0 + $0x20] sm:$0xff]  ;;  %5262 = vmatprep.subr.bf16.mxu0 %v5261_v12 }
 0x5ec   : > { %v2339_v42 = vadd.f32 %v2338_v19, %v2337_v18  ;;  %v852_v18 = vld [vmem:[%s5884_s0 + $0x28] sm:$0xff] }
 0x5ed   : > { %v5269_v19 = vpack.c.bf16 %v852_v18, %v851_v16  ;;  %v4779_v18 = vld [vmem:[%s5552_s25 + $0x20] sm:$0xff] }
 0x5ee   : > { %v2175_v21 = vpop.f32.mrb[16].mxu1  ;;  %5072 = vmatprep.mubr.msk.f32.mxu0 %vm786_vm0, %v2339_v42 }
 0x5ef   : > { %v2341_v25 = vsel %vm786_vm0, %v2175_v21, 0.0  ;;  %v5053_v26 = vpop.f32.mrb[17].mxu1 }
 0x5f0   : > { %v2342_v28 = vadd.f32 %v2341_v25, %v2340_v22 }
 0x5f2   : > { %v2329_v30 = vpop.f32.mrb[18].mxu1  ;;  %v2344_v14 = vadd.f32 %v2343_v29, %v2342_v28  ;;  %v4769_v29 = vld [vmem:[%s5896_s24] ss:$0 sm:$0xff] }
 0x5f3   : > { %v2345_v31 = vsel %vm786_vm0, %v2329_v30, 0.0  ;;  %v5063_v32 = vpop.f32.mrb[19].mxu1 }
 0x5f4   : > { %v2346_v33 = vadd.f32 %v2345_v31, %v2344_v14  ;;  %v4770_v14 = vld [vmem:[%s5902_s22] ss:$0 sm:$0xff] }
 0x5f6   : > { %5073 = vmatmul.mubr.msk.f32.vlgmr.msra.gmra.mrb[14].mxu0 %vm786_vm0, %v2346_v33 }
 0x5f7   : > { %5264 = vmatpush3.bf16.msra.mxu0 %v5261_v12 }
 0x5f8   : > { %5266 = vmatprep.subr.bf16.mxu0 %v5265_v15 }
 0x5fb   : > { %5268 = vmatpush3.bf16.msra.mxu0 %v5265_v15 }
 0x5fc   : > { %5270 = vmatprep.subr.bf16.mxu0 %v5269_v19 }
 0x5ff   : > { %5272 = vmatpush3.bf16.msra.mxu0 %v5269_v19  ;;  %v4780_v19 = vld [vmem:[%s5552_s25 + $0x28] sm:$0xff] }
 0x6c9   : > { %v5074_v41 = vpop.f32.mrb[14].mxu0 }
 0x6ca   : > { %v2431_v43 = vadd.f32 %v5074_v41, %v4766_v34  ;;  %v2425_v45 = vpop.f32.mrb[15].mxu0 }
 0x6cb   : > { %v2426_v48 = vadd.f32 %v4766_v34, %v2425_v45  ;;  %v853_v45 = vld [vmem:[%s5884_s0 + $0x30] sm:$0xff] }
 0x6cc   : > { %v2435_v49 = vadd.f32 %v2431_v43, %v5568_v38 }
 0x6cd   : > { %v2434_v50 = vadd.f32 %v2426_v48, %v5564_v36  ;;  %v854_v48 = vld [vmem:[%s5884_s0 + $0x38] sm:$0xff] }
 0x6ce   : > { %v2439_v51 = vsel %vm786_vm0, %v2435_v49, 0.0 }
 0x6cf   : > { %2440 = vadd.xlane.f32.xlu1 %v2439_v51  ;;  %v2436_v37 = vsel %vm786_vm0, %v2434_v50, 0.0 }
 0x6d0   : > { %2437 = vadd.xlane.f32.xlu0 %v2436_v37 }
 0x75c   : > { %v2441_v52 = vpop.xlane.xlu1 %2440 }
 0x75d   : > { %v2443_v53 = vmul.f32 0.03125, %v2441_v52  ;;  %v2438_v55 = vpop.xlane.xlu0 %2437 }
 0x75e   : > { %v2442_v44 = vmul.f32 0.03125, %v2438_v55 }
 0x75f   : > { %v2445_v60 = vsub.f32 %v2435_v49, %v2443_v53  ;;  %v5273_v49 = vpack.c.bf16 %v854_v48, %v853_v45 }
 0x760   : > { %v2444_v62 = vsub.f32 %v2434_v50, %v2442_v44  ;;  %v4771_v50 = vld [vmem:[%s5915_s2] ss:$0 sm:$0xff] }
 0x761   : > { %v2447_v38 = vmul.f32 %v2445_v60, %v2445_v60  ;;  %5274 = vmatprep.subr.bf16.mxu0 %v5273_v49 }
 0x762   : > { %v2446_v0 = vmul.f32 %v2444_v62, %v2444_v62  ;;  %5276 = vmatpush3.bf16.msra.mxu0 %v5273_v49 }
 0x763   : > { %v2451_v36 = vsel %vm786_vm0, %v2447_v38, 0.0  ;;  %5126 = vmatprep.subr.mxu0 %v5422_v39 }
 0x764   : > { %v2448_v2 = vsel %vm786_vm0, %v2446_v0, 0.0 }
 0x765   : > { %2449 = vadd.xlane.f32.xlu0 %v2448_v2 }
 0x769   : > { %2452 = vadd.xlane.f32.xlu0 %v2451_v36 }
 0x7f2   : > { %v2450_v20 = vpop.xlane.xlu0 %2449 }
 0x7f3   : > { %v2454_v42 = vmul.f32 0.03125, %v2450_v20  ;;  %v5277_v20 = vpack.c.bf16 %v4780_v19, %v4779_v18 }
 0x7f5   : > { %v2456_v21 = vadd.f32 1e-05, %v2454_v42  ;;  %v4781_v42 = vld [vmem:[%s5552_s25 + $0x30] sm:$0xff]  ;;  %5278 = vmatprep.subr.bf16.mxu1 %v5277_v20 }
 0x7f6   : > { %v2453_v22 = vpop.xlane.xlu0 %2452 }
 0x7f7   : > { %5366 = vrsqrt.f32 %v2456_v21  ;;  %v2455_v25 = vmul.f32 0.03125, %v2453_v22  ;;  %v4782_v21 = vld [vmem:[%s5552_s25 + $0x38] sm:$0xff]  ;;  %s5942_s25 = scalar_lea.vmem %s6179_s16, %s5575_s20 }
 0x7f8   : > { %v5281_v22 = vpack.c.bf16 %v4782_v21, %v4781_v42 }
 0x7f9   : > { %v2457_v26 = vadd.f32 1e-05, %v2455_v25 }
 0x7fb   : > { %5368 = vrsqrt.f32 %v2457_v26 }
 0x801   : > { %v5367_v28 = vpop.eup %5366 }
 0x802   : > { %v2460_v30 = vmul.f32 %v5367_v28, %v2444_v62 }
 0x804   : > { %v2468_v31 = vmul.f32 %v4769_v29, %v2460_v30 }
 0x805   : > { %v5369_v32 = vpop.eup %5368 }
 0x806   : > { %v2461_v33 = vmul.f32 %v5369_v32, %v2445_v60  ;;  %v2476_v34 = vadd.f32 %v4770_v14, %v2468_v31  ;;  %v4774_v60 = vld [vmem:[%s5926_s19] ss:$0 sm:$0xff] }
 0x807   : > { %v4777_v32 = vld [vmem:[%s5942_s25] ss:$0 sm:$0xff] }
 0x808   : > { %v2469_v41 = vmul.f32 %v4769_v29, %v2461_v33  ;;  %5083 = vmatprep.mubr.msk.f32.mxu1 %vm786_vm0, %v2476_v34 }
 0x80a   : > { %v2477_v43 = vadd.f32 %v4770_v14, %v2469_v41 }
 0x80c   : > { %5084 = vmatmul.mubr.msk.f32.vlgmr.msra.gmra.mrb[20].mxu1 %vm786_vm0, %v2477_v43 }
 0x80d   : > { %5280 = vmatpush3.bf16.msra.mxu1 %v5277_v20 }
 0x80e   : > { %5282 = vmatprep.subr.bf16.mxu1 %v5281_v22 }
 0x811   : > { %5284 = vmatpush3.bf16.msra.mxu1 %v5281_v22 }
 0x812   : > { %5116 = vmatprep.subr.mxu1 %v5422_v39 }
 0x8df   : > { %v5085_v51 = vpop.f32.mrb[20].mxu1 }
 0x8e0   : > { %v2562_v37 = vadd.f32 %v5085_v51, %v4771_v50  ;;  %v2556_v52 = vpop.f32.mrb[21].mxu1  ;;  %v4807_v51 = vld [vmem:[%s5585_s23 + $0x1] ss:$0 sm:$0xff]  ;;  %s6199_s23 = smov 64  }
 0x8e1   : > { %v2557_v53 = vadd.f32 %v4771_v50, %v2556_v52 }
 0x8e2   : > { %v2566_v44 = vmax.f32 %v2562_v37, 0.0 }
 0x8e3   : > { %v2565_v55 = vmax.f32 %v2557_v53, 0.0 }
 0x8e5   : > { %5102 = vmatprep.mubr.msk.f32.mxu0 %vm2573_vm3, %v2565_v55 }
 0x8e6   : > { %5103 = vmatmul.mubr.msk.f32.vlgmr.msra.gmra.mrb[16].mxu0 %vm2573_vm3, %v2566_v44 }
 0x8e7   : > { %5128 = vmatprep.mubr.msk.f32.mxu0 %vm5423_vm1, %v5422_v39 }
 0x9b9   : > { %v5104_v62 = vpop.f32.mrb[16].mxu0 }
 0x9ba   : > { %v2652_v0 = vadd.f32 %v5104_v62, %v4774_v60  ;;  %v2646_v2 = vpop.f32.mrb[17].mxu0 }
 0x9bb   : > { %v2647_v38 = vadd.f32 %v4774_v60, %v2646_v2 }
 0x9bc   : > { %v2656_v36 = vadd.f32 %v2652_v0, %v2477_v43  ;;  %v4778_v43 = vld [vmem:[%s5948_s4] ss:$0 sm:$0xff] }
 0x9bd   : > { %v2655_v4 = vadd.f32 %v2647_v38, %v2476_v34 }
 0x9be   : > { %v2660_v23 = vsel %vm786_vm0, %v2656_v36, 0.0 }
 0x9bf   : > { %2661 = vadd.xlane.f32.xlu1 %v2660_v23  ;;  %v2657_v1 = vsel %vm786_vm0, %v2655_v4, 0.0 }
 0x9c0   : > { %2658 = vadd.xlane.f32.xlu0 %v2657_v1 }
 0xa4c   : > { %v2662_v56 = vpop.xlane.xlu1 %2661 }
 0xa4d   : > { %v2664_v61 = vmul.f32 0.03125, %v2662_v56  ;;  %v2659_v6 = vpop.xlane.xlu0 %2658 }
 0xa4e   : > { %v2663_v7 = vmul.f32 0.03125, %v2659_v6 }
 0xa4f   : > { %v2666_v8 = vsub.f32 %v2656_v36, %v2664_v61 }
 0xa50   : > { %v2665_v11 = vsub.f32 %v2655_v4, %v2663_v7 }
 0xa51   : > { %v2668_v12 = vmul.f32 %v2666_v8, %v2666_v8 }
 0xa52   : > { %v2667_v13 = vmul.f32 %v2665_v11, %v2665_v11 }
 0xa53   : > { %v2672_v15 = vsel %vm786_vm0, %v2668_v12, 0.0 }
 0xa54   : > { %2673 = vadd.xlane.f32.xlu1 %v2672_v15  ;;  %v2669_v16 = vsel %vm786_vm0, %v2667_v13, 0.0 }
 0xa55   : > { %2670 = vadd.xlane.f32.xlu0 %v2669_v16 }
 0xae1   : > { %v2674_v25 = vpop.xlane.xlu1 %2673 }
 0xae2   : > { %v2676_v26 = vmul.f32 0.03125, %v2674_v25  ;;  %v2671_v28 = vpop.xlane.xlu0 %2670 }
 0xae3   : > { %v2675_v29 = vmul.f32 0.03125, %v2671_v28 }
 0xae4   : > { %v2678_v30 = vadd.f32 1e-05, %v2676_v26 }
 0xae5   : > { %v2677_v14 = vadd.f32 1e-05, %v2675_v29 }
 0xae6   : > { %5370 = vrsqrt.f32 %v2678_v30 }
 0xae7   : > { %5372 = vrsqrt.f32 %v2677_v14 }
 0xaf0   : > { %v5371_v31 = vpop.eup %5370 }
 0xaf1   : > { %v5373_v33 = vpop.eup %5372  ;;  %v2682_v34 = vmul.f32 %v5371_v31, %v2666_v8 }
 0xaf2   : > { %v2681_v41 = vmul.f32 %v5373_v33, %v2665_v11 }
 0xaf3   : > { %v2690_v45 = vmul.f32 %v4777_v32, %v2682_v34 }
 0xaf4   : > { %v2689_v48 = vmul.f32 %v4777_v32, %v2681_v41 }
 0xaf5   : > { %v5954_v50 = vadd.f32 %v4778_v43, %v2690_v45 }
 0xaf6   : > { %v5952_v49 = vadd.f32 %v4778_v43, %v2689_v48 }
 0xaf8   : > { %5113 = vmatprep.mubr.msk.f32.mxu1 %vm786_vm0, %v5952_v49 }
 0xaf9   : > { %5114 = vmatmul.mubr.msk.f32.vlgmr.msra.gmra.mrb[22].mxu1 %vm786_vm0, %v5954_v50 }
 0xafa   : > { %5118 = vmatprep.mubr.msk.f32.mxu1 %vm5423_vm1, %v5422_v39 }
 0xbcc   : > { %v5115_v37 = vpop.f32.mrb[22].mxu1 }
 0xbcd   : > { %v5963_v52 = vadd.f32 %v5115_v37, %v4807_v51  ;;  %v2817_v53 = vpop.f32.mrb[23].mxu1 }
 0xbce   : > { %v5965_v55 = vadd.f32 %v4807_v51, %v2817_v53 }
 0xbcf   : > { %3140 = vrot.lane.b32.xlu1 %v5963_v52, %s6198_s3  ;;  %v2830_v38 = vmul.f32 %v5963_v52, %v5599_v57  ;;  %v2832_v36 = vmul.f32 %v5963_v52, %v5601_v58  ;;  %v2831_v4 = vmul.f32 %v5963_v52, %v5611_v63  ;;  %v2838_v53 = vmul.f32 %v5963_v52, %v5744_v9 }
 0xbd0   : > { %2843 = vrot.lane.b32.xlu0 %v5965_v55, %s6198_s3  ;;  %v2826_v60 = vmul.f32 %v5965_v55, %v5599_v57  ;;  %v2828_v62 = vmul.f32 %v5965_v55, %v5601_v58  ;;  %v2827_v2 = vmul.f32 %v5965_v55, %v5611_v63  ;;  %v2829_v57 = vmul.f32 %v5965_v55, %v5625_v3 }
 0xbd1   : > { %v2833_v58 = vmul.f32 %v5963_v52, %v5625_v3  ;;  %v2836_v37 = vmul.f32 %v5965_v55, %v5767_v40 }
 0xc41   : > { %v3141_v0 = vpop.permute.xlu1 %3140 }
 0xc42   : > { %v2844_v44 = vpop.permute.xlu0 %2843 }
 0xc43   : > { %5117 = vmatpush3.xpose.msk.msra.mxu1 %vm786_vm0, %v2844_v44  ;;  %5127 = vmatpush3.xpose.msk.msra.mxu0 %vm786_vm0, %v2844_v44 }
 0xc44   : > { %5121 = vmatprep.subr.mxu1 %v5422_v39  ;;  %5136 = vmatprep.subr.mxu0 %v5422_v39 }
 0xc46   : > { %5119 = vmatmul.mubr.msk.f32.vlgmr.msra.gmra.mrb[24].mxu1 %vm786_vm0, %v2826_v60  ;;  %5129 = vmatmul.mubr.msk.f32.vlgmr.msra.gmra.mrb[18].mxu0 %vm786_vm0, %v2828_v62 }
 0xc47   : > { %5122 = vmatpush3.xpose.msk.msra.mxu1 %vm786_vm0, %v2844_v44  ;;  %5137 = vmatpush3.xpose.msk.msra.mxu0 %vm786_vm0, %v3141_v0 }
 0xc48   : > { %5123 = vmatprep.mubr.msk.f32.mxu1 %vm5423_vm1, %v5422_v39  ;;  %5138 = vmatprep.mubr.msk.f32.mxu0 %vm5423_vm1, %v5422_v39 }
 0xc49   : > { %5131 = vmatprep.subr.mxu1 %v5422_v39  ;;  %5146 = vmatprep.subr.mxu0 %v5422_v39 }
 0xc4a   : > { %5124 = vmatmul.mubr.msk.f32.vlgmr.msra.gmra.mrb[26].mxu1 %vm786_vm0, %v2827_v2  ;;  %5139 = vmatmul.mubr.msk.f32.vlgmr.msra.gmra.mrb[20].mxu0 %vm786_vm0, %v2830_v38 }
 0xc4b   : > { %5132 = vmatpush3.xpose.msk.msra.mxu1 %vm786_vm0, %v2844_v44  ;;  %5147 = vmatpush3.xpose.msk.msra.mxu0 %vm786_vm0, %v3141_v0  ;;  %v2839_v44 = vmul.f32 %v5963_v52, %v5739_v5 }
 0xc4c   : > { %5133 = vmatprep.mubr.msk.f32.mxu1 %vm5423_vm1, %v5422_v39  ;;  %5148 = vmatprep.mubr.msk.f32.mxu0 %vm5423_vm1, %v5422_v39 }
 0xc4d   : > { %5141 = vmatprep.subr.mxu1 %v5422_v39  ;;  %5156 = vmatprep.subr.mxu0 %v5422_v39 }
 0xc4e   : > { %5134 = vmatmul.mubr.msk.f32.vlgmr.msra.gmra.mrb[28].mxu1 %vm786_vm0, %v2829_v57  ;;  %5149 = vmatmul.mubr.msk.f32.vlgmr.msra.gmra.mrb[22].mxu0 %vm786_vm0, %v2832_v36 }
 0xc4f   : > { %5142 = vmatpush3.xpose.msk.msra.mxu1 %vm786_vm0, %v3141_v0  ;;  %5143 = vmatprep.mubr.msk.f32.mxu1 %vm5423_vm1, %v5422_v39 }
 0xc50   : > { %5151 = vmatprep.subr.mxu1 %v5422_v39  ;;  %5158 = vmatprep.mubr.msk.f32.mxu0 %vm5423_vm1, %v5422_v39 }
 0xc52   : > { %5144 = vmatmul.mubr.msk.f32.vlgmr.msra.gmra.mrb[30].mxu1 %vm786_vm0, %v2831_v4 }
 0xc53   : > { %5152 = vmatpush3.xpose.msk.msra.mxu1 %vm786_vm0, %v3141_v0  ;;  %5153 = vmatprep.mubr.msk.f32.mxu1 %vm5423_vm1, %v5422_v39 }
 0xc54   : > { %5161 = vmatprep.subr.mxu1 %v5422_v39 }
 0xc56   : > { %5154 = vmatmul.mubr.msk.f32.vlgmr.msra.gmra.mrb[32].mxu1 %vm786_vm0, %v2833_v58 }
 0xc57   : > { %5163 = vmatprep.mubr.msk.f32.mxu1 %vm5423_vm1, %v5422_v39 }
 0xd19   : > { %v2916_v63 = vpop.f32.mrb[24].mxu1  ;;  %v3062_v23 = vpop.f32.mrb[18].mxu0 }
 0xd1a   : > { %v3436_v1 = vmul.f32 0.35355338, %v2916_v63  ;;  %v5120_v56 = vpop.f32.mrb[25].mxu1  ;;  %v5130_v61 = vpop.f32.mrb[19].mxu0  ;;  %v3438_v3 = vmul.f32 0.35355338, %v3062_v23 }
 0xd1c   : > { %v3444_v6 = vadd.f32 %v3436_v1, %v5666_v10  ;;  %v3446_v10 = vadd.f32 %v3438_v3, %v5684_v24 }
 0xd1d   : > { %v2989_v7 = vpop.f32.mrb[26].mxu1  ;;  %v3213_v8 = vpop.f32.mrb[20].mxu0 }
 0xd1e   : > { %v3437_v11 = vmul.f32 0.35355338, %v2989_v7  ;;  %v5125_v12 = vpop.f32.mrb[27].mxu1  ;;  %v5140_v13 = vpop.f32.mrb[21].mxu0  ;;  %v3452_v15 = vsel %vm1628_vm2, %v3444_v6, -inf }
 0xd1f   : > { %3453 = vmax.xlane.f32.xlu1 %v3452_v15  ;;  %v3440_v22 = vmul.f32 0.35355338, %v3213_v8 }
 0xd20   : > { %v3445_v16 = vadd.f32 %v3437_v11, %v5674_v17  ;;  %v3458_v17 = vsel %vm1628_vm2, %v3446_v10, -inf }
 0xd21   : > { %v3135_v18 = vpop.f32.mrb[28].mxu1  ;;  %v3359_v19 = vpop.f32.mrb[22].mxu0  ;;  %v3448_v32 = vadd.f32 %v3440_v22, %v5698_v35 }
 0xd22   : > { %v3439_v20 = vmul.f32 0.35355338, %v3135_v18  ;;  %v5135_v42 = vpop.f32.mrb[29].mxu1  ;;  %v5150_v21 = vpop.f32.mrb[23].mxu0  ;;  %v3455_v25 = vsel %vm1628_vm2, %v3445_v16, -inf }
 0xd23   : > { %3456 = vmax.xlane.f32.xlu0 %v3455_v25  ;;  %v3442_v31 = vmul.f32 0.35355338, %v3359_v19 }
 0xd24   : > { %v3447_v26 = vadd.f32 %v3439_v20, %v5689_v27  ;;  %v3464_v27 = vsel %vm1628_vm2, %v3448_v32, -inf }
 0xd25   : > { %v3286_v28 = vpop.f32.mrb[30].mxu1  ;;  %v3450_v45 = vadd.f32 %v3442_v31, %v5706_v47  ;;  %v2834_v47 = vmul.f32 %v5965_v55, %v5744_v9 }
 0xd26   : > { %v3441_v29 = vmul.f32 0.35355338, %v3286_v28  ;;  %v5145_v30 = vpop.f32.mrb[31].mxu1  ;;  %v3461_v14 = vsel %vm1628_vm2, %v3447_v26, -inf }
 0xd27   : > { %3462 = vmax.xlane.f32.xlu1 %v3461_v14  ;;  %3459 = vmax.xlane.f32.xlu0 %v3458_v17  ;;  %v3470_v35 = vsel %vm1628_vm2, %v3450_v45, -inf }
 0xd28   : > { %v3449_v33 = vadd.f32 %v3441_v29, %v5718_v54  ;;  %v2835_v54 = vmul.f32 %v5965_v55, %v5739_v5 }
 0xd29   : > { %v3432_v34 = vpop.f32.mrb[32].mxu1 }
 0xd2a   : > { %v3443_v41 = vmul.f32 0.35355338, %v3432_v34  ;;  %v5155_v24 = vpop.f32.mrb[33].mxu1  ;;  %v3467_v43 = vsel %vm1628_vm2, %v3449_v33, -inf  ;;  %v2840_v34 = vmul.f32 %v5963_v52, %v5767_v40 }
 0xd2b   : > { %3468 = vmax.xlane.f32.xlu1 %v3467_v43  ;;  %3465 = vmax.xlane.f32.xlu0 %v3464_v27 }
 0xd2c   : > { %v3451_v48 = vadd.f32 %v3443_v41, %v5726_v59  ;;  %v2837_v59 = vmul.f32 %v5965_v55, %v5776_v46 }
 0xd2e   : > { %v3473_v51 = vsel %vm1628_vm2, %v3451_v48, -inf }
 0xd2f   : > { %3474 = vmax.xlane.f32.xlu1 %v3473_v51  ;;  %3471 = vmax.xlane.f32.xlu0 %v3470_v35 }
 0xd40   : > { %3618 = vrot.lane.b32.xlu1 %v2835_v54, %s6199_s23 }
 0xd44   : > { %3695 = vrot.lane.b32.xlu1 %v2836_v37, %s6199_s23 }
 0xd45   : > { %3541 = vrot.lane.b32.xlu0 %v2834_v47, %s6199_s23 }
 0xd48   : > { %3772 = vrot.lane.b32.xlu1 %v2837_v59, %s6199_s23 }
 0xd49   : > { %3849 = vrot.lane.b32.xlu0 %v2838_v53, %s6199_s23 }
 0xd4c   : > { %3926 = vrot.lane.b32.xlu1 %v2839_v44, %s6199_s23 }
 0xdac   : > { %v3454_v60 = vpop.xlane.xlu1 %3453 }
 0xdad   : > { %v3476_v62 = vsub.f32 %v3444_v6, %v3454_v60 }
 0xdaf   : > { %v3484_v0 = vmul.f32 1.442695, %v3476_v62 }
 0xdb0   : > { %v3457_v2 = vpop.xlane.xlu0 %3456 }
 0xdb1   : > { %5374 = vpow2.f32 %v3484_v0  ;;  %v3477_v38 = vsub.f32 %v3445_v16, %v3457_v2 }
 0xdb3   : > { %v3486_v57 = vmul.f32 1.442695, %v3477_v38 }
 0xdb4   : > { %v3463_v55 = vpop.xlane.xlu1 %3462  ;;  %v3460_v36 = vpop.xlane.xlu0 %3459 }
 0xdb5   : > { %v3479_v4 = vsub.f32 %v3447_v26, %v3463_v55  ;;  %5376 = vpow2.f32 %v3486_v57  ;;  %v3478_v58 = vsub.f32 %v3446_v10, %v3460_v36 }
 0xdb7   : > { %v3490_v9 = vmul.f32 1.442695, %v3479_v4  ;;  %v3488_v63 = vmul.f32 1.442695, %v3478_v58 }
 0xdb8   : > { %v3469_v23 = vpop.xlane.xlu1 %3468  ;;  %v3466_v1 = vpop.xlane.xlu0 %3465 }
 0xdb9   : > { %5378 = vpow2.f32 %v3490_v9  ;;  %v3481_v5 = vsub.f32 %v3449_v33, %v3469_v23  ;;  %v3480_v56 = vsub.f32 %v3448_v32, %v3466_v1  ;;  %v2841_v33 = vmul.f32 %v5963_v52, %v5776_v46  ;;  %v4784_v1 = vld [vmem:[%s5841_s29 + $0x20] sm:$0xff] }
 0xdba   : > { %5380 = vpow2.f32 %v3488_v63 }
 0xdbb   : > { %v3494_v61 = vmul.f32 1.442695, %v3481_v5  ;;  %v5375_v6 = vpop.eup %5374  ;;  %v3492_v7 = vmul.f32 1.442695, %v3480_v56  ;;  %v4785_v5 = vld [vmem:[%s5841_s29 + $0x28] sm:$0xff] }
 0xdbc   : > { %v3475_v8 = vpop.xlane.xlu1 %3474  ;;  %v3472_v11 = vpop.xlane.xlu0 %3471  ;;  %v3500_v13 = vsel %vm1628_vm2, %v5375_v6, 0.0  ;;  %v5285_v56 = vpack.c.bf16 %v4785_v5, %v4784_v1  ;;  %v4799_v5 = vld [vmem:[%s5884_s0 + $0x58] sm:$0xff] }
 0xdbd   : > { %5382 = vpow2.f32 %v3494_v61  ;;  %v3483_v12 = vsub.f32 %v3451_v48, %v3475_v8  ;;  %v3482_v3 = vsub.f32 %v3450_v45, %v3472_v11  ;;  %3501 = vadd.xlane.f32.xlu0 %v3500_v13  ;;  %v4786_v61 = vld [vmem:[%s5841_s29 + $0x30] sm:$0xff] }
 0xdbe   : > { %5384 = vpow2.f32 %v3492_v7 }
 0xdbf   : > { %v3498_v15 = vmul.f32 1.442695, %v3483_v12  ;;  %v5377_v16 = vpop.eup %5376  ;;  %v3496_v18 = vmul.f32 1.442695, %v3482_v3 }
 0xdc0   : > { %v3619_v19 = vpop.permute.xlu1 %3618  ;;  %v3542_v20 = vpop.permute.xlu0 %3541  ;;  %v3503_v42 = vsel %vm1628_vm2, %v5377_v16, 0.0 }
 0xdc1   : > { %5386 = vpow2.f32 %v3498_v15  ;;  %5162 = vmatpush3.msra.mxu1 %v3619_v19  ;;  %5157 = vmatpush3.msra.mxu0 %v3542_v20 }
 0xdc2   : > { %5388 = vpow2.f32 %v3496_v18  ;;  %3504 = vadd.xlane.f32.xlu1 %v3503_v42  ;;  %5166 = vmatprep.subr.mxu0 %v5422_v39 }
 0xdc3   : > { %v5379_v21 = vpop.eup %5378  ;;  %5171 = vmatprep.subr.mxu1 %v5422_v39 }
 0xdc4   : > { %v5381_v22 = vpop.eup %5380  ;;  %v3509_v25 = vsel %vm1628_vm2, %v5379_v21, 0.0  ;;  %v3696_v41 = vpop.permute.xlu1 %3695 }
 0xdc5   : > { %v3506_v10 = vsel %vm1628_vm2, %v5381_v22, 0.0  ;;  %v3850_v43 = vpop.permute.xlu0 %3849 }
 0xdc6   : > { %3507 = vadd.xlane.f32.xlu0 %v3506_v10  ;;  %3510 = vadd.xlane.f32.xlu1 %v3509_v25 }
 0xdc7   : > { %v5383_v26 = vpop.eup %5382 }
 0xdc8   : > { %v5385_v28 = vpop.eup %5384  ;;  %v3515_v29 = vsel %vm1628_vm2, %v5383_v26, 0.0  ;;  %v3773_v24 = vpop.permute.xlu1 %3772 }
 0xdc9   : > { %v3512_v30 = vsel %vm1628_vm2, %v5385_v28, 0.0 }
 0xdca   : > { %3513 = vadd.xlane.f32.xlu0 %v3512_v30  ;;  %3516 = vadd.xlane.f32.xlu1 %v3515_v29 }
 0xdcb   : > { %v6069_v14 = vpop.eup %5386 }
 0xdcc   : > { %v6071_v31 = vpop.eup %5388  ;;  %v3521_v17 = vsel %vm1628_vm2, %v6069_v14, 0.0  ;;  %v3927_v27 = vpop.permute.xlu1 %3926 }
 0xdcd   : > { %v3518_v32 = vsel %vm1628_vm2, %v6071_v31, 0.0 }
 0xdce   : > { %3519 = vadd.xlane.f32.xlu0 %v3518_v32  ;;  %3522 = vadd.xlane.f32.xlu1 %v3521_v17 }
 0xddf   : > { %4080 = vrot.lane.b32.xlu1 %v2841_v33, %s6199_s23 }
 0xde4   : > { %4003 = vrot.lane.b32.xlu0 %v2840_v34, %s6199_s23 }
 0xe4a   : > { %v3502_v45 = vpop.xlane.xlu0 %3501 }
 0xe4b   : > { %5390 = vrcp.f32 %v3502_v45  ;;  %v4834_v45 = vld [vmem:[%s5861_s1 + $0x1] ss:$0 sm:$0xff]  ;;  %s769_s1 = scalar_lea.vmem %s6181_s18, %s5575_s20 }
 0xe4f   : > { %v3505_v48 = vpop.xlane.xlu1 %3504 }
 0xe50   : > { %5392 = vrcp.f32 %v3505_v48 }
 0xe53   : > { %v3508_v51 = vpop.xlane.xlu0 %3507  ;;  %v3511_v35 = vpop.xlane.xlu1 %3510 }
 0xe54   : > { %5394 = vrcp.f32 %v3508_v51 }
 0xe55   : > { %5396 = vrcp.f32 %v3511_v35  ;;  %v5391_v46 = vpop.eup %5390 }
 0xe56   : > { %v3532_v54 = vmul.f32 %v5391_v46, %v5375_v6  ;;  %v4787_v6 = vld [vmem:[%s5841_s29 + $0x38] sm:$0xff] }
 0xe57   : > { %v3514_v37 = vpop.xlane.xlu0 %3513  ;;  %v3517_v47 = vpop.xlane.xlu1 %3516  ;;  %v5289_v7 = vpack.c.bf16 %v4787_v6, %v4786_v61  ;;  %v4800_v61 = vld [vmem:[%s5884_s0 + $0x60] sm:$0xff]  ;;  %v4801_v6 = vld [vmem:[%s5884_s0 + $0x68] sm:$0xff] }
 0xe58   : > { %5398 = vrcp.f32 %v3514_v37  ;;  %5159 = vmatmul.mubr.msk.f32.vlgmr.msra.gmra.mrb[24].mxu0 %vm1628_vm2, %v3532_v54 }
 0xe59   : > { %5400 = vrcp.f32 %v3517_v47  ;;  %5167 = vmatpush3.msra.mxu0 %v3696_v41  ;;  %5168 = vmatprep.mubr.msk.f32.mxu0 %vm5423_vm1, %v5422_v39 }
 0xe5a   : > { %v5393_v40 = vpop.eup %5392  ;;  %5176 = vmatprep.subr.mxu0 %v5422_v39 }
 0xe5b   : > { %v3533_v52 = vmul.f32 %v5393_v40, %v5377_v16  ;;  %v3520_v59 = vpop.xlane.xlu0 %3519  ;;  %v3523_v53 = vpop.xlane.xlu1 %3522 }
 0xe5c   : > { %5402 = vrcp.f32 %v3520_v59 }
 0xe5d   : > { %5404 = vrcp.f32 %v3523_v53  ;;  %5164 = vmatmul.mubr.msk.f32.vlgmr.msra.gmra.mrb[34].mxu1 %vm1628_vm2, %v3533_v52 }
 0xe5e   : > { %v5395_v44 = vpop.eup %5394  ;;  %5172 = vmatpush3.msra.mxu1 %v3773_v24  ;;  %5173 = vmatprep.mubr.msk.f32.mxu1 %vm5423_vm1, %v5422_v39 }
 0xe5f   : > { %v5397_v60 = vpop.eup %5396  ;;  %v3534_v62 = vmul.f32 %v5395_v44, %v5381_v22  ;;  %5181 = vmatprep.subr.mxu1 %v5422_v39  ;;  %v4004_v36 = vpop.permute.xlu0 %4003 }
 0xe60   : > { %v3535_v0 = vmul.f32 %v5397_v60, %v5379_v21  ;;  %v4081_v58 = vpop.permute.xlu1 %4080 }
 0xe61   : > { %5169 = vmatmul.mubr.msk.f32.vlgmr.msra.gmra.mrb[26].mxu0 %vm1628_vm2, %v3534_v62 }
 0xe62   : > { %v5399_v2 = vpop.eup %5398  ;;  %5174 = vmatmul.mubr.msk.f32.vlgmr.msra.gmra.mrb[36].mxu1 %vm1628_vm2, %v3535_v0  ;;  %5177 = vmatpush3.msra.mxu0 %v3850_v43 }
 0xe63   : > { %v5401_v38 = vpop.eup %5400  ;;  %v3536_v57 = vmul.f32 %v5399_v2, %v5385_v28  ;;  %5182 = vmatpush3.msra.mxu1 %v3927_v27  ;;  %5178 = vmatprep.mubr.msk.f32.mxu0 %vm5423_vm1, %v5422_v39 }
 0xe64   : > { %v3537_v55 = vmul.f32 %v5401_v38, %v5383_v26  ;;  %5183 = vmatprep.mubr.msk.f32.mxu1 %vm5423_vm1, %v5422_v39  ;;  %5186 = vmatprep.subr.mxu0 %v5422_v39  ;;  %v4791_v38 = vld [vmem:[%s5874_s30 + $0x20] sm:$0xff] }
 0xe65   : > { %5191 = vmatprep.subr.mxu1 %v5422_v39  ;;  %5179 = vmatmul.mubr.msk.f32.vlgmr.msra.gmra.mrb[28].mxu0 %vm1628_vm2, %v3536_v57  ;;  %v4792_v57 = vld [vmem:[%s5874_s30 + $0x28] sm:$0xff] }
 0xe66   : > { %v5403_v4 = vpop.eup %5402  ;;  %5184 = vmatmul.mubr.msk.f32.vlgmr.msra.gmra.mrb[38].mxu1 %vm1628_vm2, %v3537_v55  ;;  %5187 = vmatpush3.msra.mxu0 %v4004_v36  ;;  %v5293_v55 = vpack.c.bf16 %v4792_v57, %v4791_v38  ;;  %v4793_v36 = vld [vmem:[%s5874_s30 + $0x30] sm:$0xff] }
 0xe67   : > { %v5405_v9 = vpop.eup %5404  ;;  %v3538_v63 = vmul.f32 %v5403_v4, %v6071_v31  ;;  %5192 = vmatpush3.msra.mxu1 %v4081_v58  ;;  %5188 = vmatprep.mubr.msk.f32.mxu0 %vm5423_vm1, %v5422_v39  ;;  %v4794_v4 = vld [vmem:[%s5874_s30 + $0x38] sm:$0xff] }
 0xe68   : > { %v3539_v23 = vmul.f32 %v5405_v9, %v6069_v14  ;;  %5193 = vmatprep.mubr.msk.f32.mxu1 %vm5423_vm1, %v5422_v39  ;;  %5286 = vmatprep.subr.bf16.mxu0 %v5285_v56  ;;  %v5297_v58 = vpack.c.bf16 %v4794_v4, %v4793_v36  ;;  %v4796_v9 = vld [vmem:[%s5884_s0 + $0x40] sm:$0xff] }
 0xe69   : > { %5189 = vmatmul.mubr.msk.f32.vlgmr.msra.gmra.mrb[30].mxu0 %vm1628_vm2, %v3538_v63  ;;  %5294 = vmatprep.subr.bf16.mxu1 %v5293_v55  ;;  %v4797_v63 = vld [vmem:[%s5884_s0 + $0x48] sm:$0xff]  ;;  %v4845_v36 = vld [vmem:[%s5942_s25 + $0x1] ss:$0 sm:$0xff] }
 0xe6a   : > { %5194 = vmatmul.mubr.msk.f32.vlgmr.msra.gmra.mrb[40].mxu1 %vm1628_vm2, %v3539_v23  ;;  %5288 = vmatpush3.bf16.msra.mxu0 %v5285_v56  ;;  %v4798_v23 = vld [vmem:[%s5884_s0 + $0x50] sm:$0xff]  ;;  %v5301_v1 = vpack.c.bf16 %v4797_v63, %v4796_v9  ;;  %v4846_v9 = vld [vmem:[%s5948_s4 + $0x1] ss:$0 sm:$0xff] }
 0xe6b   : > { %5290 = vmatprep.subr.bf16.mxu0 %v5289_v7  ;;  %5296 = vmatpush3.bf16.msra.mxu1 %v5293_v55  ;;  %v5305_v56 = vpack.c.bf16 %v4799_v5, %v4798_v23 }
 0xe6c   : > { %5298 = vmatprep.subr.bf16.mxu1 %v5297_v58 }
 0xe6e   : > { %5292 = vmatpush3.bf16.msra.mxu0 %v5289_v7  ;;  %v5309_v7 = vpack.c.bf16 %v4801_v6, %v4800_v61 }
 0xe6f   : > { %5300 = vmatpush3.bf16.msra.mxu1 %v5297_v58  ;;  %5302 = vmatprep.subr.bf16.mxu0 %v5301_v1 }
 0xf2b   : > { %v3613_v8 = vpop.f32.mrb[24].mxu0 }
 0xf2c   : > { %v5160_v11 = vpop.f32.mrb[25].mxu0  ;;  %v4156_v13 = vsel %vm786_vm0, %v3613_v8, 0.0 }
 0xf30   : > { %v3690_v12 = vpop.f32.mrb[34].mxu1 }
 0xf31   : > { %v4157_v39 = vsel %vm786_vm0, %v3690_v12, 0.0  ;;  %v5165_v3 = vpop.f32.mrb[35].mxu1 }
 0xf32   : > { %v4158_v15 = vadd.f32 %v4157_v39, %v4156_v13 }
 0xf34   : > { %v3767_v16 = vpop.f32.mrb[26].mxu0 }
 0xf35   : > { %v4159_v18 = vsel %vm786_vm0, %v3767_v16, 0.0  ;;  %v3844_v19 = vpop.f32.mrb[36].mxu1  ;;  %v5170_v20 = vpop.f32.mrb[27].mxu0  ;;  %v4837_v16 = vld [vmem:[%s5896_s24 + $0x1] ss:$0 sm:$0xff] }
 0xf36   : > { %v4160_v42 = vadd.f32 %v4159_v18, %v4158_v15  ;;  %v5175_v21 = vpop.f32.mrb[37].mxu1  ;;  %v4161_v22 = vsel %vm786_vm0, %v3844_v19, 0.0  ;;  %v4838_v19 = vld [vmem:[%s5902_s22 + $0x1] ss:$0 sm:$0xff] }
 0xf38   : > { %v4162_v25 = vadd.f32 %v4161_v22, %v4160_v42  ;;  %v3921_v10 = vpop.f32.mrb[28].mxu0 }
 0xf39   : > { %v4163_v26 = vsel %vm786_vm0, %v3921_v10, 0.0  ;;  %v3998_v28 = vpop.f32.mrb[38].mxu1  ;;  %v5180_v29 = vpop.f32.mrb[29].mxu0 }
 0xf3a   : > { %v4164_v30 = vsel %vm786_vm0, %v3998_v28, 0.0  ;;  %v5185_v14 = vpop.f32.mrb[39].mxu1  ;;  %5204 = vmatprep.mubr.msk.f32.mxu0 %vm786_vm0, %v4162_v25  ;;  %v4803_v28 = vld [vmem:[%s5884_s0 + $0x78] sm:$0xff] }
 0xf3b   : > { %v4165_v31 = vadd.f32 %v4164_v30, %v4163_v26  ;;  %v4802_v26 = vld [vmem:[%s5884_s0 + $0x70] sm:$0xff]  ;;  %v4839_v30 = vld [vmem:[%s5915_s2 + $0x1] ss:$0 sm:$0xff] }
 0xf3c   : > { %v4075_v17 = vpop.f32.mrb[30].mxu0  ;;  %v5313_v29 = vpack.c.bf16 %v4803_v28, %v4802_v26 }
 0xf3d   : > { %v4166_v32 = vsel %vm786_vm0, %v4075_v17, 0.0  ;;  %v4152_v33 = vpop.f32.mrb[40].mxu1  ;;  %v5190_v34 = vpop.f32.mrb[31].mxu0 }
 0xf3e   : > { %v4167_v41 = vadd.f32 %v4166_v32, %v4165_v31  ;;  %v5195_v24 = vpop.f32.mrb[41].mxu1  ;;  %v4168_v43 = vsel %vm786_vm0, %v4152_v33, 0.0 }
 0xf40   : > { %v4169_v27 = vadd.f32 %v4168_v43, %v4167_v41  ;;  %v4842_v41 = vld [vmem:[%s5926_s19 + $0x1] ss:$0 sm:$0xff] }
 0xf42   : > { %5205 = vmatmul.mubr.msk.f32.vlgmr.msra.gmra.mrb[32].mxu0 %vm786_vm0, %v4169_v27 }
 0xf43   : > { %5304 = vmatpush3.bf16.msra.mxu0 %v5301_v1 }
 0xf44   : > { %5306 = vmatprep.subr.bf16.mxu0 %v5305_v56 }
 0xf47   : > { %5308 = vmatpush3.bf16.msra.mxu0 %v5305_v56 }
 0xf48   : > { %5310 = vmatprep.subr.bf16.mxu0 %v5309_v7 }
 0xf4b   : > { %5312 = vmatpush3.bf16.msra.mxu0 %v5309_v7 }
 0xf4c   : > { %5314 = vmatprep.subr.bf16.mxu0 %v5313_v29 }
 0xf4f   : > { %5316 = vmatpush3.bf16.msra.mxu0 %v5313_v29 }
0x1015   : > { %v5206_v48 = vpop.f32.mrb[32].mxu0 }
0x1016   : > { %v4254_v51 = vadd.f32 %v5206_v48, %v4834_v45  ;;  %v4248_v35 = vpop.f32.mrb[33].mxu0 }
0x1017   : > { %v4249_v46 = vadd.f32 %v4834_v45, %v4248_v35 }
0x1018   : > { %v4258_v54 = vadd.f32 %v4254_v51, %v5954_v50 }
0x1019   : > { %v4257_v37 = vadd.f32 %v4249_v46, %v5952_v49 }
0x101a   : > { %v4262_v47 = vsel %vm786_vm0, %v4258_v54, 0.0 }
0x101b   : > { %4263 = vadd.xlane.f32.xlu1 %v4262_v47  ;;  %v4259_v40 = vsel %vm786_vm0, %v4257_v37, 0.0 }
0x101c   : > { %4260 = vadd.xlane.f32.xlu0 %v4259_v40 }
0x10a8   : > { %v4264_v52 = vpop.xlane.xlu1 %4263 }
0x10a9   : > { %v4266_v59 = vmul.f32 0.03125, %v4264_v52  ;;  %v4261_v53 = vpop.xlane.xlu0 %4260 }
0x10aa   : > { %v4265_v44 = vmul.f32 0.03125, %v4261_v53 }
0x10ab   : > { %v4268_v60 = vsub.f32 %v4258_v54, %v4266_v59 }
0x10ac   : > { %v4267_v62 = vsub.f32 %v4257_v37, %v4265_v44 }
0x10ad   : > { %v4270_v50 = vmul.f32 %v4268_v60, %v4268_v60 }
0x10ae   : > { %v4269_v0 = vmul.f32 %v4267_v62, %v4267_v62 }
0x10af   : > { %v4274_v2 = vsel %vm786_vm0, %v4270_v50, 0.0 }
0x10b0   : > { %v4271_v49 = vsel %vm786_vm0, %v4269_v0, 0.0 }
0x10b1   : > { %4272 = vadd.xlane.f32.xlu0 %v4271_v49 }
0x10b5   : > { %4275 = vadd.xlane.f32.xlu0 %v4274_v2 }
0x113e   : > { %v4273_v8 = vpop.xlane.xlu0 %4272 }
0x113f   : > { %v4277_v11 = vmul.f32 0.03125, %v4273_v8 }
0x1141   : > { %v4279_v12 = vadd.f32 1e-05, %v4277_v11 }
0x1142   : > { %v4276_v13 = vpop.xlane.xlu0 %4275 }
0x1143   : > { %5406 = vrsqrt.f32 %v4279_v12  ;;  %v4278_v39 = vmul.f32 0.03125, %v4276_v13 }
0x1145   : > { %v4280_v3 = vadd.f32 1e-05, %v4278_v39 }
0x1147   : > { %5408 = vrsqrt.f32 %v4280_v3 }
0x114d   : > { %v5407_v15 = vpop.eup %5406 }
0x114e   : > { %v4283_v18 = vmul.f32 %v5407_v15, %v4267_v62 }
0x1150   : > { %v4291_v20 = vmul.f32 %v4837_v16, %v4283_v18 }
0x1151   : > { %v5409_v42 = vpop.eup %5408 }
0x1152   : > { %v4284_v21 = vmul.f32 %v5409_v42, %v4268_v60  ;;  %v4299_v22 = vadd.f32 %v4838_v19, %v4291_v20 }
0x1154   : > { %v4292_v25 = vmul.f32 %v4837_v16, %v4284_v21  ;;  %5215 = vmatprep.mubr.msk.f32.mxu1 %vm786_vm0, %v4299_v22 }
0x1156   : > { %v4300_v10 = vadd.f32 %v4838_v19, %v4292_v25 }
0x1158   : > { %5216 = vmatmul.mubr.msk.f32.vlgmr.msra.gmra.mrb[42].mxu1 %vm786_vm0, %v4300_v10 }
0x122b   : > { %v5217_v14 = vpop.f32.mrb[42].mxu1 }
0x122c   : > { %v4385_v31 = vadd.f32 %v5217_v14, %v4839_v30  ;;  %v4379_v17 = vpop.f32.mrb[43].mxu1 }
0x122d   : > { %v4380_v32 = vadd.f32 %v4839_v30, %v4379_v17 }
0x122e   : > { %v4389_v34 = vmax.f32 %v4385_v31, 0.0 }
0x122f   : > { %v4388_v33 = vmax.f32 %v4380_v32, 0.0 }
0x1231   : > { %5234 = vmatprep.mubr.msk.f32.mxu0 %vm2573_vm3, %v4388_v33 }
0x1232   : > { %5235 = vmatmul.mubr.msk.f32.vlgmr.msra.gmra.mrb[34].mxu0 %vm2573_vm3, %v4389_v34 }
0x1305   : > { %v5236_v24 = vpop.f32.mrb[34].mxu0 }
0x1306   : > { %v4474_v43 = vadd.f32 %v5236_v24, %v4842_v41  ;;  %v4468_v27 = vpop.f32.mrb[35].mxu0 }
0x1307   : > { %v4469_v45 = vadd.f32 %v4842_v41, %v4468_v27 }
0x1308   : > { %v4478_v48 = vadd.f32 %v4474_v43, %v4300_v10 }
0x1309   : > { %v4477_v51 = vadd.f32 %v4469_v45, %v4299_v22 }
0x130a   : > { %v4482_v35 = vsel %vm786_vm0, %v4478_v48, 0.0 }
0x130b   : > { %4483 = vadd.xlane.f32.xlu0 %v4482_v35  ;;  %v4479_v46 = vsel %vm786_vm0, %v4477_v51, 0.0 }
0x130c   : > { %4480 = vadd.xlane.f32.xlu1 %v4479_v46 }
0x1398   : > { %v4484_v54 = vpop.xlane.xlu0 %4483 }
0x1399   : > { %v4486_v37 = vmul.f32 0.03125, %v4484_v54  ;;  %v4481_v47 = vpop.xlane.xlu1 %4480 }
0x139a   : > { %v4485_v40 = vmul.f32 0.03125, %v4481_v47 }
0x139b   : > { %v4488_v52 = vsub.f32 %v4478_v48, %v4486_v37 }
0x139c   : > { %v4487_v59 = vsub.f32 %v4477_v51, %v4485_v40 }
0x139d   : > { %v4490_v53 = vmul.f32 %v4488_v52, %v4488_v52 }
0x139e   : > { %v4489_v44 = vmul.f32 %v4487_v59, %v4487_v59 }
0x139f   : > { %v4494_v60 = vsel %vm786_vm0, %v4490_v53, 0.0 }
0x13a0   : > { %4495 = vadd.xlane.f32.xlu0 %v4494_v60  ;;  %v4491_v62 = vsel %vm786_vm0, %v4489_v44, 0.0 }
0x13a1   : > { %4492 = vadd.xlane.f32.xlu1 %v4491_v62 }
0x142d   : > { %v4496_v0 = vpop.xlane.xlu0 %4495 }
0x142e   : > { %v4498_v49 = vmul.f32 0.03125, %v4496_v0  ;;  %v4493_v50 = vpop.xlane.xlu1 %4492 }
0x142f   : > { %v4497_v2 = vmul.f32 0.03125, %v4493_v50 }
0x1430   : > { %v4500_v38 = vadd.f32 1e-05, %v4498_v49 }
0x1431   : > { %v4499_v57 = vadd.f32 1e-05, %v4497_v2 }
0x1432   : > { %5410 = vrsqrt.f32 %v4500_v38 }
0x1433   : > { %5412 = vrsqrt.f32 %v4499_v57 }
0x143c   : > { %v5411_v55 = vpop.eup %5410 }
0x143d   : > { %v5413_v4 = vpop.eup %5412  ;;  %v4504_v58 = vmul.f32 %v5411_v55, %v4488_v52 }
0x143e   : > { %v4503_v63 = vmul.f32 %v5413_v4, %v4487_v59 }
0x143f   : > { %v4512_v23 = vmul.f32 %v4845_v36, %v4504_v58 }
0x1440   : > { %v4511_v1 = vmul.f32 %v4845_v36, %v4503_v63 }
0x1441   : > { %v4520_v5 = vadd.f32 %v4846_v9, %v4512_v23 }
0x1442   : > { %v4519_v56 = vadd.f32 %v4846_v9, %v4511_v1 }
0x1443   : > { %v4523_v61 = vrot.slane %v4520_v5, 7 }
0x1445   : > { %v4525_v6 = vsel %vm4524_vm4, %v4523_v61, %v4519_v56 }
0x1446   : > { %4528 = vst.msk [vmem:[%s769_s1] sm:$0x3] %vm4527_vm5, %v4525_v6 }
0x1447 PF: > { %s28_s27 = sadd.s32 1, %s5420_s27  }
0x1448   : > { %p25_p4 = scmp.ge.s32.totalorder %s28_s27, 4  }
0x144a   :  { %27 = sbr.rel (!%p25_p4) target bundleno = 6 (0x6), region = 167 }

</bundles_post_ra>
